<compile_context>
chip_gen: v6e
topology: v6e:2x2x1
jax: 0.10.0
libtpu: 0.0.40
codegen_flags: <defaults>
</compile_context>

<pallas_src>
import jax
import jax.numpy as jnp
from jax.experimental import pallas as pl
from jax.experimental.pallas import tpu as pltpu


def _mish(v):
    # mish(v) = v * tanh(softplus(v)).  With e = exp(min(v, 20)):
    #   tanh(log1p(e)) = (e^2 + 2e) / (e^2 + 2e + 2)   (exact identity)
    # The clamp at 20 makes the ratio saturate to 1.0 for v > 20, matching
    # PyTorch's softplus threshold=20 behaviour (mish(v) ~= v there).
    e = jnp.exp(jnp.minimum(v, 20.0))
    num = e * (e + 2.0)
    return v * (num / (num + 2.0))


def resblock_kernel(x_ref, w1_ref, s1_ref, b1_ref, w2_ref, s2_ref, b2_ref,
                    o_ref, ypad_ref):
    # x_ref : (1, H, W, C) f32        w1_ref: (C, Hc)       bf16
    # s1/b1 : (1, Hc)      f32        w2_ref: (9*Hc, C)     bf16 (taps flattened (ky,kx,hc))
    # s2/b2 : (1, C)       f32        o_ref : (1, H, W, C)  f32
    # ypad_ref: VMEM scratch (H+2, W+2, Hc) f32 -- zero-padded hidden activation.
    _, H, W, C = x_ref.shape
    Hc = w1_ref.shape[1]

    # ---- BasicConv #1: 1x1 conv == (H*W, C) @ (C, Hc), single-pass bf16 MXU ----
    xf = x_ref[0].reshape(H * W, C).astype(jnp.bfloat16)
    t1 = jnp.dot(xf, w1_ref[...], preferred_element_type=jnp.float32)
    t1 = t1 * s1_ref[...] + b1_ref[...]
    y1 = _mish(t1)                                           # (H*W, Hc) f32

    # ---- stage Mish(BN1(conv1)) once into a zero-padded scratch (no RMW) ----
    # (Only the 1-pixel border strictly needs the zero fill; a full clear is
    #  kept for simplicity and costs a single aligned store.)
    ypad_ref[...] = jnp.zeros_like(ypad_ref)
    ypad_ref[1:H + 1, 1:W + 1, :] = y1.reshape(H, W, Hc)

    # ---- BasicConv #2: 3x3 SAME conv as ONE fat-K im2col matmul (K = 9*Hc) ----
    taps = [ypad_ref[ky:ky + H, kx:kx + W, :]                # shifted windows, zero border
            for ky in range(3) for kx in range(3)]
    ycat = jnp.concatenate(taps, axis=-1).astype(jnp.bfloat16)   # (H, W, 9*Hc)
    z = jnp.dot(ycat.reshape(H * W, 9 * Hc), w2_ref[...],
                preferred_element_type=jnp.float32)          # (H*W, C)
    z = z * s2_ref[...] + b2_ref[...]
    y2 = _mish(z)

    # ---- residual add; single lane-aligned output store ----
    out = x_ref[0].reshape(H * W, C) + y2
    o_ref[0] = out.reshape(H, W, C).astype(o_ref.dtype)


@jax.jit
def resblock_forward(x_nchw, w1, s1, b1, w2, s2, b2):
    x = jnp.transpose(x_nchw, (0, 2, 3, 1))                  # NCHW -> NHWC
    N, H, W, C = x.shape
    Hc = w1.shape[1]
    assert W % 8 == 0, "W must be a multiple of 8 for layout-preserving reshapes"

    w1b = w1.astype(jnp.bfloat16)                            # (C, Hc)
    w2b = w2.reshape(9 * Hc, C).astype(jnp.bfloat16)         # (ky,kx,hc) flattened rows
    s1m = s1.reshape(1, Hc).astype(jnp.float32)
    b1m = b1.reshape(1, Hc).astype(jnp.float32)
    s2m = s2.reshape(1, C).astype(jnp.float32)
    b2m = b2.reshape(1, C).astype(jnp.float32)

    out = pl.pallas_call(
        resblock_kernel,
        out_shape=jax.ShapeDtypeStruct((N, H, W, C), x.dtype),
        grid_spec=pltpu.PrefetchScalarGridSpec(
            num_scalar_prefetch=0,
            grid=(N,),
            in_specs=[
                pl.BlockSpec((1, H, W, C), lambda n: (n, 0, 0, 0)),
                pl.BlockSpec((C, Hc), lambda n: (0, 0)),
                pl.BlockSpec((1, Hc), lambda n: (0, 0)),
                pl.BlockSpec((1, Hc), lambda n: (0, 0)),
                pl.BlockSpec((9 * Hc, C), lambda n: (0, 0)),
                pl.BlockSpec((1, C), lambda n: (0, 0)),
                pl.BlockSpec((1, C), lambda n: (0, 0)),
            ],
            out_specs=pl.BlockSpec((1, H, W, C), lambda n: (n, 0, 0, 0)),
            scratch_shapes=[pltpu.VMEM((H + 2, W + 2, Hc), jnp.float32)],
        ),
        compiler_params=pltpu.CompilerParams(
            dimension_semantics=("parallel",),
            vmem_limit_bytes=32 * 1024 * 1024),
    )(x, w1b, s1m, b1m, w2b, s2m, b2m)
    return jnp.transpose(out, (0, 3, 1, 2))                  # NHWC -> NCHW


def ref_forward(x_nchw, w1, s1, b1, w2, s2, b2):
    """Plain-JAX reference.  Conv inputs are cast to bf16 with f32 accumulation,
    mirroring the kernel's intentional single-pass-bf16 MXU policy (per the perf
    review), so the check isolates structural correctness (shifts / BN / Mish /
    residual) at a tight tolerance.  All other math follows the PyTorch module
    exactly in f32 (the bf16-vs-f32 matmul deviation itself is ~1e-2)."""
    def mish(v):
        sp = jnp.where(v > 20.0, v, jnp.log1p(jnp.exp(jnp.minimum(v, 20.0))))
        return v * jnp.tanh(sp)

    bf = jnp.bfloat16
    w1_oihw = jnp.transpose(w1, (1, 0))[:, :, None, None]          # (Hc, C, 1, 1)
    y = jax.lax.conv_general_dilated(
        x_nchw.astype(bf), w1_oihw.astype(bf), (1, 1), "SAME",
        dimension_numbers=("NCHW", "OIHW", "NCHW"),
        preferred_element_type=jnp.float32,
        precision=jax.lax.Precision.HIGHEST)
    y = y * s1.reshape(1, -1, 1, 1) + b1.reshape(1, -1, 1, 1)
    y = mish(y)

    w2_oihw = jnp.transpose(w2, (3, 2, 0, 1))                      # (C, Hc, 3, 3)
    z = jax.lax.conv_general_dilated(
        y.astype(bf), w2_oihw.astype(bf), (1, 1), "SAME",
        dimension_numbers=("NCHW", "OIHW", "NCHW"),
        preferred_element_type=jnp.float32,
        precision=jax.lax.Precision.HIGHEST)
    z = z * s2.reshape(1, -1, 1, 1) + b2.reshape(1, -1, 1, 1)
    z = mish(z)
    return x_nchw + z


if __name__ == "__main__":
    key = jax.random.PRNGKey(0)
    ks = jax.random.split(key, 11)

    N, C, H, W = 2, 4, 16, 16
    Hc = C  # hidden_channels defaults to in_channels

    x = jax.random.normal(ks[0], (N, C, H, W), jnp.float32)

    # Conv weights (kernel layouts: w1 (Cin, Hc); w2 (kh, kw, Hc, Cout))
    w1 = 0.5 * jax.random.normal(ks[1], (C, Hc), jnp.float32)
    w2 = 0.2 * jax.random.normal(ks[2], (3, 3, Hc, C), jnp.float32)

    # BatchNorm (inference-mode) parameters, folded to per-channel scale/shift
    eps = 1e-5
    g1 = 1.0 + 0.1 * jax.random.normal(ks[3], (Hc,), jnp.float32)
    be1 = 0.1 * jax.random.normal(ks[4], (Hc,), jnp.float32)
    m1 = 0.1 * jax.random.normal(ks[5], (Hc,), jnp.float32)
    v1 = jax.random.uniform(ks[6], (Hc,), jnp.float32, 0.5, 1.5)
    g2 = 1.0 + 0.1 * jax.random.normal(ks[7], (C,), jnp.float32)
    be2 = 0.1 * jax.random.normal(ks[8], (C,), jnp.float32)
    m2 = 0.1 * jax.random.normal(ks[9], (C,), jnp.float32)
    v2 = jax.random.uniform(ks[10], (C,), jnp.float32, 0.5, 1.5)

    s1_vec = g1 / jnp.sqrt(v1 + eps)
    b1_vec = be1 - m1 * s1_vec
    s2_vec = g2 / jnp.sqrt(v2 + eps)
    b2_vec = be2 - m2 * s2_vec

    out = resblock_forward(x, w1, s1_vec, b1_vec, w2, s2_vec, b2_vec)
    jax.block_until_ready(out)

    ref = ref_forward(x, w1, s1_vec, b1_vec, w2, s2_vec, b2_vec)
    err = float(jnp.max(jnp.abs(out - ref)))
    assert out.shape == (N, C, H, W)
    if err < 1e-2:
        print("KERNEL_OK")
    else:
        print(f"MISMATCH max_abs_err={err}")
</pallas_src>

<mosaic_0001>
module attributes {stable_mosaic.version = 11 : i64} {
  func.func @resblock_kernel(%arg0: i32, %arg1: memref<1x16x16x4xf32, #tpu.memory_space<vmem>>, %arg2: memref<4x4xbf16, #tpu.memory_space<vmem>>, %arg3: memref<1x4xf32, #tpu.memory_space<vmem>>, %arg4: memref<1x4xf32, #tpu.memory_space<vmem>>, %arg5: memref<36x4xbf16, #tpu.memory_space<vmem>>, %arg6: memref<1x4xf32, #tpu.memory_space<vmem>>, %arg7: memref<1x4xf32, #tpu.memory_space<vmem>>, %arg8: memref<1x16x16x4xf32, #tpu.memory_space<vmem>>, %arg9: memref<18x18x4xf32, #tpu.memory_space<vmem>>) attributes {dimension_semantics = [#tpu.dimension_semantics<parallel>], iteration_bounds = array<i64: 2>, scalar_prefetch = 0 : i64, scratch_operands = 1 : i64, tpu.core_type = #tpu.core_type<tc>, window_params = [{transform_indices = @transform_0, window_bounds = array<i64: 1, 16, 16, 4>}, {pipeline_mode = #tpu.pipeline_mode<synchronous>, transform_indices = @transform_1, window_bounds = array<i64: 4, 4>}, {pipeline_mode = #tpu.pipeline_mode<synchronous>, transform_indices = @transform_2, window_bounds = array<i64: 1, 4>}, {pipeline_mode = #tpu.pipeline_mode<synchronous>, transform_indices = @transform_3, window_bounds = array<i64: 1, 4>}, {pipeline_mode = #tpu.pipeline_mode<synchronous>, transform_indices = @transform_4, window_bounds = array<i64: 36, 4>}, {pipeline_mode = #tpu.pipeline_mode<synchronous>, transform_indices = @transform_5, window_bounds = array<i64: 1, 4>}, {pipeline_mode = #tpu.pipeline_mode<synchronous>, transform_indices = @transform_6, window_bounds = array<i64: 1, 4>}, {transform_indices = @transform_7, window_bounds = array<i64: 1, 16, 16, 4>}]} {
    %c0 = arith.constant 0 : index
    %c0_0 = arith.constant 0 : index
    %c0_1 = arith.constant 0 : index
    %c0_2 = arith.constant 0 : index
    %0 = vector.load %arg1[%c0, %c0_0, %c0_1, %c0_2] : memref<1x16x16x4xf32, #tpu.memory_space<vmem>>, vector<1x16x16x4xf32>
    %1 = vector.shape_cast %0 : vector<1x16x16x4xf32> to vector<16x16x4xf32>
    %2 = vector.shape_cast %1 : vector<16x16x4xf32> to vector<256x4xf32>
    %3 = arith.truncf %2 : vector<256x4xf32> to vector<256x4xbf16>
    %c0_3 = arith.constant 0 : index
    %c0_4 = arith.constant 0 : index
    %4 = vector.load %arg2[%c0_3, %c0_4] : memref<4x4xbf16, #tpu.memory_space<vmem>>, vector<4x4xbf16>
    %cst = arith.constant dense<0.000000e+00> : vector<256x4xf32>
    %5 = tpu.matmul %3, %4, %cst {dimension_numbers = #tpu.dot_dimension_numbers<[1], [0], [0], [1], [0, 0, 1, 1], [], []>} : vector<256x4xbf16>, vector<4x4xbf16>, vector<256x4xf32> -> vector<256x4xf32>
    %c0_5 = arith.constant 0 : index
    %c0_6 = arith.constant 0 : index
    %6 = vector.load %arg3[%c0_5, %c0_6] : memref<1x4xf32, #tpu.memory_space<vmem>>, vector<1x4xf32>
    %7 = vector.broadcast %6 : vector<1x4xf32> to vector<256x4xf32>
    %8 = arith.mulf %5, %7 : vector<256x4xf32>
    %c0_7 = arith.constant 0 : index
    %c0_8 = arith.constant 0 : index
    %9 = vector.load %arg4[%c0_7, %c0_8] : memref<1x4xf32, #tpu.memory_space<vmem>>, vector<1x4xf32>
    %10 = vector.broadcast %9 : vector<1x4xf32> to vector<256x4xf32>
    %11 = arith.addf %8, %10 : vector<256x4xf32>
    %cst_9 = arith.constant 2.000000e+01 : f32
    %12 = vector.broadcast %cst_9 : f32 to vector<256x4xf32>
    %13 = arith.minimumf %11, %12 : vector<256x4xf32>
    %14 = math.exp %13 : vector<256x4xf32>
    %cst_10 = arith.constant 2.000000e+00 : f32
    %15 = vector.broadcast %cst_10 : f32 to vector<256x4xf32>
    %16 = arith.addf %14, %15 : vector<256x4xf32>
    %17 = arith.mulf %14, %16 : vector<256x4xf32>
    %cst_11 = arith.constant 2.000000e+00 : f32
    %18 = vector.broadcast %cst_11 : f32 to vector<256x4xf32>
    %19 = arith.addf %17, %18 : vector<256x4xf32>
    %20 = arith.divf %17, %19 : vector<256x4xf32>
    %21 = arith.mulf %11, %20 : vector<256x4xf32>
    %cst_12 = arith.constant 0.000000e+00 : f32
    %22 = vector.broadcast %cst_12 : f32 to vector<18x18x4xf32>
    %c0_13 = arith.constant 0 : index
    %c0_14 = arith.constant 0 : index
    %c0_15 = arith.constant 0 : index
    %23 = vector.load %arg9[%c0_13, %c0_14, %c0_15] : memref<18x18x4xf32, #tpu.memory_space<vmem>>, vector<18x18x4xf32>
    tpu.vector_store %arg9[%c0_13, %c0_14, %c0_15], %22 {strides = array<i32>} : memref<18x18x4xf32, #tpu.memory_space<vmem>>, vector<18x18x4xf32>,
    %24 = vector.shape_cast %21 : vector<256x4xf32> to vector<16x16x4xf32>
    %c1 = arith.constant 1 : index
    %c1_16 = arith.constant 1 : index
    %c0_17 = arith.constant 0 : index
    %25 = vector.load %arg9[%c1, %c1_16, %c0_17] : memref<18x18x4xf32, #tpu.memory_space<vmem>>, vector<16x16x4xf32>
    tpu.vector_store %arg9[%c1, %c1_16, %c0_17], %24 {strides = array<i32>} : memref<18x18x4xf32, #tpu.memory_space<vmem>>, vector<16x16x4xf32>,
    %c0_18 = arith.constant 0 : index
    %c0_19 = arith.constant 0 : index
    %c0_20 = arith.constant 0 : index
    %26 = vector.load %arg9[%c0_18, %c0_19, %c0_20] : memref<18x18x4xf32, #tpu.memory_space<vmem>>, vector<16x16x4xf32>
    %c0_21 = arith.constant 0 : index
    %c1_22 = arith.constant 1 : index
    %c0_23 = arith.constant 0 : index
    %27 = vector.load %arg9[%c0_21, %c1_22, %c0_23] : memref<18x18x4xf32, #tpu.memory_space<vmem>>, vector<16x16x4xf32>
    %c0_24 = arith.constant 0 : index
    %c2 = arith.constant 2 : index
    %c0_25 = arith.constant 0 : index
    %28 = vector.load %arg9[%c0_24, %c2, %c0_25] : memref<18x18x4xf32, #tpu.memory_space<vmem>>, vector<16x16x4xf32>
    %c1_26 = arith.constant 1 : index
    %c0_27 = arith.constant 0 : index
    %c0_28 = arith.constant 0 : index
    %29 = vector.load %arg9[%c1_26, %c0_27, %c0_28] : memref<18x18x4xf32, #tpu.memory_space<vmem>>, vector<16x16x4xf32>
    %c1_29 = arith.constant 1 : index
    %c1_30 = arith.constant 1 : index
    %c0_31 = arith.constant 0 : index
    %30 = vector.load %arg9[%c1_29, %c1_30, %c0_31] : memref<18x18x4xf32, #tpu.memory_space<vmem>>, vector<16x16x4xf32>
    %c1_32 = arith.constant 1 : index
    %c2_33 = arith.constant 2 : index
    %c0_34 = arith.constant 0 : index
    %31 = vector.load %arg9[%c1_32, %c2_33, %c0_34] : memref<18x18x4xf32, #tpu.memory_space<vmem>>, vector<16x16x4xf32>
    %c2_35 = arith.constant 2 : index
    %c0_36 = arith.constant 0 : index
    %c0_37 = arith.constant 0 : index
    %32 = vector.load %arg9[%c2_35, %c0_36, %c0_37] : memref<18x18x4xf32, #tpu.memory_space<vmem>>, vector<16x16x4xf32>
    %c2_38 = arith.constant 2 : index
    %c1_39 = arith.constant 1 : index
    %c0_40 = arith.constant 0 : index
    %33 = vector.load %arg9[%c2_38, %c1_39, %c0_40] : memref<18x18x4xf32, #tpu.memory_space<vmem>>, vector<16x16x4xf32>
    %c2_41 = arith.constant 2 : index
    %c2_42 = arith.constant 2 : index
    %c0_43 = arith.constant 0 : index
    %34 = vector.load %arg9[%c2_41, %c2_42, %c0_43] : memref<18x18x4xf32, #tpu.memory_space<vmem>>, vector<16x16x4xf32>
    %35 = tpu.concatenate %26, %27, %28, %29, %30, %31, %32, %33, %34 in 2 : vector<16x16x4xf32>, vector<16x16x4xf32>, vector<16x16x4xf32>, vector<16x16x4xf32>, vector<16x16x4xf32>, vector<16x16x4xf32>, vector<16x16x4xf32>, vector<16x16x4xf32>, vector<16x16x4xf32> -> vector<16x16x36xf32>
    %36 = arith.truncf %35 : vector<16x16x36xf32> to vector<16x16x36xbf16>
    %37 = vector.shape_cast %36 : vector<16x16x36xbf16> to vector<256x36xbf16>
    %c0_44 = arith.constant 0 : index
    %c0_45 = arith.constant 0 : index
    %38 = vector.load %arg5[%c0_44, %c0_45] : memref<36x4xbf16, #tpu.memory_space<vmem>>, vector<36x4xbf16>
    %cst_46 = arith.constant dense<0.000000e+00> : vector<256x4xf32>
    %39 = tpu.matmul %37, %38, %cst_46 {dimension_numbers = #tpu.dot_dimension_numbers<[1], [0], [0], [1], [0, 0, 1, 1], [], []>} : vector<256x36xbf16>, vector<36x4xbf16>, vector<256x4xf32> -> vector<256x4xf32>
    %c0_47 = arith.constant 0 : index
    %c0_48 = arith.constant 0 : index
    %40 = vector.load %arg6[%c0_47, %c0_48] : memref<1x4xf32, #tpu.memory_space<vmem>>, vector<1x4xf32>
    %41 = vector.broadcast %40 : vector<1x4xf32> to vector<256x4xf32>
    %42 = arith.mulf %39, %41 : vector<256x4xf32>
    %c0_49 = arith.constant 0 : index
    %c0_50 = arith.constant 0 : index
    %43 = vector.load %arg7[%c0_49, %c0_50] : memref<1x4xf32, #tpu.memory_space<vmem>>, vector<1x4xf32>
    %44 = vector.broadcast %43 : vector<1x4xf32> to vector<256x4xf32>
    %45 = arith.addf %42, %44 : vector<256x4xf32>
    %cst_51 = arith.constant 2.000000e+01 : f32
    %46 = vector.broadcast %cst_51 : f32 to vector<256x4xf32>
    %47 = arith.minimumf %45, %46 : vector<256x4xf32>
    %48 = math.exp %47 : vector<256x4xf32>
    %cst_52 = arith.constant 2.000000e+00 : f32
    %49 = vector.broadcast %cst_52 : f32 to vector<256x4xf32>
    %50 = arith.addf %48, %49 : vector<256x4xf32>
    %51 = arith.mulf %48, %50 : vector<256x4xf32>
    %cst_53 = arith.constant 2.000000e+00 : f32
    %52 = vector.broadcast %cst_53 : f32 to vector<256x4xf32>
    %53 = arith.addf %51, %52 : vector<256x4xf32>
    %54 = arith.divf %51, %53 : vector<256x4xf32>
    %55 = arith.mulf %45, %54 : vector<256x4xf32>
    %c0_54 = arith.constant 0 : index
    %c0_55 = arith.constant 0 : index
    %c0_56 = arith.constant 0 : index
    %c0_57 = arith.constant 0 : index
    %56 = vector.load %arg1[%c0_54, %c0_55, %c0_56, %c0_57] : memref<1x16x16x4xf32, #tpu.memory_space<vmem>>, vector<1x16x16x4xf32>
    %57 = vector.shape_cast %56 : vector<1x16x16x4xf32> to vector<16x16x4xf32>
    %58 = vector.shape_cast %57 : vector<16x16x4xf32> to vector<256x4xf32>
    %59 = arith.addf %58, %55 : vector<256x4xf32>
    %60 = vector.shape_cast %59 : vector<256x4xf32> to vector<16x16x4xf32>
    %c0_58 = arith.constant 0 : index
    %c0_59 = arith.constant 0 : index
    %c0_60 = arith.constant 0 : index
    %c0_61 = arith.constant 0 : index
    %61 = vector.load %arg8[%c0_58, %c0_59, %c0_60, %c0_61] : memref<1x16x16x4xf32, #tpu.memory_space<vmem>>, vector<1x16x16x4xf32>
    %62 = vector.shape_cast %61 : vector<1x16x16x4xf32> to vector<16x16x4xf32>
    %63 = vector.shape_cast %60 : vector<16x16x4xf32> to vector<1x16x16x4xf32>
    tpu.vector_store %arg8[%c0_58, %c0_59, %c0_60, %c0_61], %63 {strides = array<i32>} : memref<1x16x16x4xf32, #tpu.memory_space<vmem>>, vector<1x16x16x4xf32>,
    return
  }
  func.func @transform_0(%arg0: i32) -> (i32, i32, i32, i32) {
    %c0_i32 = arith.constant 0 : i32
    %c0_i32_0 = arith.constant 0 : i32
    %c0_i32_1 = arith.constant 0 : i32
    %c0_i32_2 = arith.constant 0 : i32
    return %arg0, %c0_i32, %c0_i32_0, %c0_i32_1 : i32, i32, i32, i32
  }
  func.func @transform_1(%arg0: i32) -> (i32, i32) {
    %c0_i32 = arith.constant 0 : i32
    %c0_i32_0 = arith.constant 0 : i32
    %c0_i32_1 = arith.constant 0 : i32
    return %c0_i32, %c0_i32_0 : i32, i32
  }
  func.func @transform_2(%arg0: i32) -> (i32, i32) {
    %c0_i32 = arith.constant 0 : i32
    %c0_i32_0 = arith.constant 0 : i32
    %c0_i32_1 = arith.constant 0 : i32
    return %c0_i32, %c0_i32_0 : i32, i32
  }
  func.func @transform_3(%arg0: i32) -> (i32, i32) {
    %c0_i32 = arith.constant 0 : i32
    %c0_i32_0 = arith.constant 0 : i32
    %c0_i32_1 = arith.constant 0 : i32
    return %c0_i32, %c0_i32_0 : i32, i32
  }
  func.func @transform_4(%arg0: i32) -> (i32, i32) {
    %c0_i32 = arith.constant 0 : i32
    %c0_i32_0 = arith.constant 0 : i32
    %c0_i32_1 = arith.constant 0 : i32
    return %c0_i32, %c0_i32_0 : i32, i32
  }
  func.func @transform_5(%arg0: i32) -> (i32, i32) {
    %c0_i32 = arith.constant 0 : i32
    %c0_i32_0 = arith.constant 0 : i32
    %c0_i32_1 = arith.constant 0 : i32
    return %c0_i32, %c0_i32_0 : i32, i32
  }
  func.func @transform_6(%arg0: i32) -> (i32, i32) {
    %c0_i32 = arith.constant 0 : i32
    %c0_i32_0 = arith.constant 0 : i32
    %c0_i32_1 = arith.constant 0 : i32
    return %c0_i32, %c0_i32_0 : i32, i32
  }
  func.func @transform_7(%arg0: i32) -> (i32, i32, i32, i32) {
    %c0_i32 = arith.constant 0 : i32
    %c0_i32_0 = arith.constant 0 : i32
    %c0_i32_1 = arith.constant 0 : i32
    %c0_i32_2 = arith.constant 0 : i32
    return %arg0, %c0_i32, %c0_i32_0, %c0_i32_1 : i32, i32, i32, i32
  }
}

</mosaic_0001>

<bundles_post_ra>
// kernel: resblock_forward.1
= control target key start
LH: loop header
LB: loop body
LE: loop exit
PB: predicated region body
PF: predicated region fallthrough
CT: control target
= control target key end

     0   :  { %s4480_s24 = smov 0   ;;  %s6119_s0 = inlined_call_operand.vmem [shape: f32[2,16,16,4], index: 0, kind: input, shape index: {}]   ;;  %s6120_s1 = inlined_call_operand.vmem [shape: bf16[4,4], index: 1, kind: input, shape index: {}]   ;;  %s6121_s2 = inlined_call_operand.vmem [shape: f32[1,4], index: 2, kind: input, shape index: {}]   ;;  %s6122_s3 = inlined_call_operand.vmem [shape: f32[1,4], index: 3, kind: input, shape index: {}]   ;;  %s6123_s4 = inlined_call_operand.vmem [shape: bf16[36,4], index: 4, kind: input, shape index: {}]   ;;  %s6124_s5 = inlined_call_operand.vmem [shape: f32[1,4], index: 5, kind: input, shape index: {}]   ;;  %s6125_s6 = inlined_call_operand.vmem [shape: f32[1,4], index: 6, kind: input, shape index: {}]   ;;  %s6126_s7 = inlined_call_operand.vmem [shape: f32[2,16,16,4], index: 7, kind: output, shape index: {}]  }
   0x1 LB: > { %s3339_s25 = sadd.s32 4294967295, %s4429_s24   ;;  %p3343_p0 = scmp.ge.s32.totalorder %s4429_s24, 1  ;;  %s4429_s24 = sphi %s4480_s24, %s17_s24  }
   0x2   : > { %p237_p1 = scmp.lt.s32.totalorder %s4429_s24, 3 }
   0x4   : > { %p238_p2 = pnand %p3343_p0, %p237_p1 }
   0x5   : > { %p269_p3 = scmp.lt.s32.totalorder (!%p238_p2), %s3339_s25, 1  ;;  %s4432_s9 = smov (!%p238_p2), 4  }
   0x6   : > { %241 = sbr.rel (%p238_p2) target bundleno = 889 (0x379), region = 48  ;;  %s4433_s10 = smov (!%p238_p2), 24  }
   0x7   : > { %s4434_s11 = smov (!%p238_p2), 8   ;;  %s4435_s16 = smov (!%p238_p2), 12  }
   0x8   : > { %s4436_s17 = smov (!%p238_p2), 28   ;;  %s4437_s18 = smov (!%p238_p2), 16  }
   0x9   : > { %s4438_s19 = smov (!%p238_p2), 32   ;;  %s4439_s20 = smov (!%p238_p2), 20  }
   0xb   : > { %v328_v0 = vld [vmem:[%s6120_s1] sm:$0x3]  ;;  %vm378_vm0 = vcmask 1041408   ;;  %s6128_s25 = smov (!%p269_p3, %s3339_s25), 1  ;;  %vm329_vm1 = vcmask 31744   ;;  %vm911_vm2 = vcmask 25600  }
   0xc   : > { %3499 = vmatprep.subr.msk.bf16.mxu0 %vm378_vm0, %v328_v0  ;;  %v380_v1 = vsel %vm378_vm0, %v328_v0, 0  ;;  %s3389_s28 = sshll.u32 %s6128_s25, 8  ;;  %v4431_v50 = vmov 0.0   ;;  %v4611_v60 = vld [vmem:[%s6121_s2] ss:$0 sm:$0xff]  ;;  %vm2342_vm3 = vcmask 64512  }
   0xd   : > { %3428 = vmatpush3.bf16.msra.mxu0 %v380_v1  ;;  %s4501_s8 = scalar_lea.vmem %s6119_s0, %s3389_s28  ;;  %916 = vst.msk [vmem:[#allocation2 + $0x30] sm:$0xff] %vm329_vm1, %v4431_v50  ;;  %917 = vst.msk [vmem:[#allocation2 + $0x38] sm:$0xff] %vm329_vm1, %v4431_v50  ;;  %v4616_v62 = vld [vmem:[%s6122_s3] ss:$0 sm:$0xff]  ;;  %vm2375_vm4 = vcmask 97280   ;;  %vm2408_vm5 = vcmask 130048   ;;  %s5868_s14 = scalar_lea.vmem %s6126_s7, %s3389_s28 }
   0xe   : > { %v280_v2 = vld [vmem:[%s4501_s8] sm:$0xff]  ;;  %v281_v3 = vld [vmem:[%s4501_s8 + $0x8] sm:$0xff]  ;;  %v282_v4 = vld [vmem:[%s4501_s8 + $0x10] sm:$0xff]  ;;  %909 = vst.msk [vmem:[#allocation2] sm:$0xff] %vm329_vm1, %v4431_v50  ;;  %vm2441_vm6 = vcmask 162816   ;;  %vm2474_vm7 = vcmask 195584  }
   0xf   : > { %v312_v5 = vpack.c.bf16 %v281_v3, %v280_v2  ;;  %v283_v6 = vld [vmem:[%s4501_s8 + $0x18] sm:$0xff]  ;;  %v284_v7 = vld [vmem:[%s4501_s8 + $0x20] sm:$0xff]  ;;  %v285_v8 = vld [vmem:[%s4501_s8 + $0x28] sm:$0xff]  ;;  %910 = vst.msk [vmem:[#allocation2 + $0x8] sm:$0xff] %vm329_vm1, %v4431_v50  ;;  %vm2507_vm8 = vcmask 228352   ;;  %vm2540_vm9 = vcmask 261120  }
  0x10   : > { %v313_v9 = vpack.c.bf16 %v283_v6, %v282_v4  ;;  %v314_v10 = vpack.c.bf16 %v285_v8, %v284_v7  ;;  %v286_v11 = vld [vmem:[%s4501_s8 + $0x30] sm:$0xff]  ;;  %v287_v12 = vld [vmem:[%s4501_s8 + $0x38] sm:$0xff]  ;;  %v288_v13 = vld [vmem:[%s4501_s8 + $0x40] sm:$0xff]  ;;  %913 = vst.msk [vmem:[#allocation2 + $0x18] sm:$0xff] %vm329_vm1, %v4431_v50  ;;  %vm2609_vm10 = vcmask 293888  }
  0x11   : > { %3429 = vmatprep.mubr.msk.bf16.mxu0 %vm329_vm1, %v312_v5  ;;  %v289_v14 = vld [vmem:[%s4501_s8 + $0x48] sm:$0xff]  ;;  %v315_v15 = vpack.c.bf16 %v287_v12, %v286_v11  ;;  %v290_v17 = vld [vmem:[%s4501_s8 + $0x50] sm:$0xff]  ;;  %v291_v18 = vld [vmem:[%s4501_s8 + $0x58] sm:$0xff]  ;;  %914 = vst.msk [vmem:[#allocation2 + $0x20] sm:$0xff] %vm329_vm1, %v4431_v50 }
  0x12   : > { %3430 = vmatmul.mubr.msk.bf16.vlgmr.msra.gmra.mxu0 %vm329_vm1, %v313_v9  ;;  %v316_v16 = vpack.c.bf16 %v289_v14, %v288_v13  ;;  %v292_v19 = vld [vmem:[%s4501_s8 + $0x60] sm:$0xff]  ;;  %v293_v20 = vld [vmem:[%s4501_s8 + $0x68] sm:$0xff]  ;;  %v317_v21 = vpack.c.bf16 %v291_v18, %v290_v17  ;;  %v294_v23 = vld [vmem:[%s4501_s8 + $0x70] sm:$0xff]  ;;  %919 = vst.msk [vmem:[#allocation2 + $0x48] sm:$0xff] %vm329_vm1, %v4431_v50 }
  0x13   : > { %3433 = vmatprep.mubr.msk.bf16.mxu0 %vm329_vm1, %v314_v10  ;;  %v318_v22 = vpack.c.bf16 %v293_v20, %v292_v19  ;;  %v295_v24 = vld [vmem:[%s4501_s8 + $0x78] sm:$0xff]  ;;  %v296_v25 = vld [vmem:[%s4501_s8 + $0x80] sm:$0xff]  ;;  %v297_v26 = vld [vmem:[%s4501_s8 + $0x88] sm:$0xff]  ;;  %920 = vst.msk [vmem:[#allocation2 + $0x50] sm:$0xff] %vm329_vm1, %v4431_v50 }
  0x14   : > { %v319_v27 = vpack.c.bf16 %v295_v24, %v294_v23  ;;  %v320_v28 = vpack.c.bf16 %v297_v26, %v296_v25  ;;  %v298_v29 = vld [vmem:[%s4501_s8 + $0x90] sm:$0xff]  ;;  %v299_v30 = vld [vmem:[%s4501_s8 + $0x98] sm:$0xff]  ;;  %v300_v31 = vld [vmem:[%s4501_s8 + $0xa0] sm:$0xff]  ;;  %922 = vst.msk [vmem:[#allocation2 + $0x60] sm:$0xff] %vm329_vm1, %v4431_v50 }
  0x15   : > { %v301_v32 = vld [vmem:[%s4501_s8 + $0xa8] sm:$0xff]  ;;  %v321_v33 = vpack.c.bf16 %v299_v30, %v298_v29  ;;  %v302_v35 = vld [vmem:[%s4501_s8 + $0xb0] sm:$0xff]  ;;  %v303_v36 = vld [vmem:[%s4501_s8 + $0xb8] sm:$0xff]  ;;  %923 = vst.msk [vmem:[#allocation2 + $0x68] sm:$0xff] %vm329_vm1, %v4431_v50 }
  0x16   : > { %v322_v34 = vpack.c.bf16 %v301_v32, %v300_v31  ;;  %v304_v37 = vld [vmem:[%s4501_s8 + $0xc0] sm:$0xff]  ;;  %v305_v38 = vld [vmem:[%s4501_s8 + $0xc8] sm:$0xff]  ;;  %v323_v39 = vpack.c.bf16 %v303_v36, %v302_v35  ;;  %v306_v41 = vld [vmem:[%s4501_s8 + $0xd0] sm:$0xff]  ;;  %925 = vst.msk [vmem:[#allocation2 + $0x78] sm:$0xff] %vm329_vm1, %v4431_v50 }
  0x17   : > { %v324_v40 = vpack.c.bf16 %v305_v38, %v304_v37  ;;  %v307_v42 = vld [vmem:[%s4501_s8 + $0xd8] sm:$0xff]  ;;  %v308_v43 = vld [vmem:[%s4501_s8 + $0xe0] sm:$0xff]  ;;  %v309_v44 = vld [vmem:[%s4501_s8 + $0xe8] sm:$0xff]  ;;  %926 = vst.msk [vmem:[#allocation2 + $0x80] sm:$0xff] %vm329_vm1, %v4431_v50 }
  0x18   : > { %v325_v45 = vpack.c.bf16 %v307_v42, %v306_v41  ;;  %v326_v46 = vpack.c.bf16 %v309_v44, %v308_v43  ;;  %v310_v47 = vld [vmem:[%s4501_s8 + $0xf0] sm:$0xff]  ;;  %v311_v48 = vld [vmem:[%s4501_s8 + $0xf8] sm:$0xff]  ;;  %928 = vst.msk [vmem:[#allocation2 + $0x90] sm:$0xff] %vm329_vm1, %v4431_v50  ;;  %929 = vst.msk [vmem:[#allocation2 + $0x98] sm:$0xff] %vm329_vm1, %v4431_v50 }
  0x19   : > { %v327_v49 = vpack.c.bf16 %v311_v48, %v310_v47  ;;  %931 = vst.msk [vmem:[#allocation2 + $0xa8] sm:$0xff] %vm329_vm1, %v4431_v50  ;;  %932 = vst.msk [vmem:[#allocation2 + $0xb0] sm:$0xff] %vm329_vm1, %v4431_v50  ;;  %v1029_v51 = vld [vmem:[#allocation2 + $0x1] sm:$0xff] }
  0x1a   : > { %3434 = vmatmul.mubr.msk.bf16.gmra.mxu0 %vm329_vm1, %v315_v15  ;;  %934 = vst.msk [vmem:[#allocation2 + $0xc0] sm:$0xff] %vm329_vm1, %v4431_v50  ;;  %935 = vst.msk [vmem:[#allocation2 + $0xc8] sm:$0xff] %vm329_vm1, %v4431_v50  ;;  %v1061_v56 = vld [vmem:[#allocation2 + $0x2] sm:$0xff] }
  0x1b   : > { %3437 = vmatprep.mubr.msk.bf16.mxu0 %vm329_vm1, %v316_v16  ;;  %937 = vst.msk [vmem:[#allocation2 + $0xd8] sm:$0xff] %vm329_vm1, %v4431_v50  ;;  %938 = vst.msk [vmem:[#allocation2 + $0xe0] sm:$0xff] %vm329_vm1, %v4431_v50 }
  0x1c   : > { %940 = vst.msk [vmem:[#allocation2 + $0xf0] sm:$0xff] %vm329_vm1, %v4431_v50  ;;  %941 = vst.msk [vmem:[#allocation2 + $0xf8] sm:$0xff] %vm329_vm1, %v4431_v50 }
  0x1d   : > { %943 = vst.msk [vmem:[#allocation2 + $0x108] sm:$0xff] %vm329_vm1, %v4431_v50  ;;  %944 = vst.msk [vmem:[#allocation2 + $0x110] sm:$0xff] %vm329_vm1, %v4431_v50 }
  0x1e   : > { %946 = vst.msk [vmem:[#allocation2 + $0x120] sm:$0xff] %vm329_vm1, %v4431_v50  ;;  %947 = vst.msk [vmem:[#allocation2 + $0x128] sm:$0xff] %vm329_vm1, %v4431_v50 }
  0x1f   : > { %949 = vst.msk [vmem:[#allocation2 + $0x138] sm:$0xff] %vm329_vm1, %v4431_v50  ;;  %950 = vst.msk [vmem:[#allocation2 + $0x140] sm:$0xff] %vm329_vm1, %v4431_v50 }
  0x20   : > { %952 = vst.msk [vmem:[#allocation2 + $0x150] sm:$0xff] %vm329_vm1, %v4431_v50  ;;  %953 = vst.msk [vmem:[#allocation2 + $0x158] sm:$0xff] %vm329_vm1, %v4431_v50 }
  0x21   : > { %955 = vst.msk [vmem:[#allocation2 + $0x168] sm:$0xff] %vm329_vm1, %v4431_v50  ;;  %956 = vst.msk [vmem:[#allocation2 + $0x170] sm:$0xff] %vm329_vm1, %v4431_v50 }
  0x22   : > { %3438 = vmatmul.mubr.msk.bf16.gmra.mxu0 %vm329_vm1, %v317_v21  ;;  %958 = vst.msk [vmem:[#allocation2 + $0x180] sm:$0xff] %vm329_vm1, %v4431_v50  ;;  %959 = vst.msk [vmem:[#allocation2 + $0x188] sm:$0xff] %vm329_vm1, %v4431_v50 }
  0x23   : > { %3441 = vmatprep.mubr.msk.bf16.mxu0 %vm329_vm1, %v318_v22  ;;  %961 = vst.msk [vmem:[#allocation2 + $0x198] sm:$0xff] %vm329_vm1, %v4431_v50  ;;  %962 = vst.msk [vmem:[#allocation2 + $0x1a0] sm:$0xff] %vm329_vm1, %v4431_v50 }
  0x24   : > { %918 = vst.msk [vmem:[#allocation2 + $0x40] sm:$0x3] %vm911_vm2, %v4431_v50  ;;  %912 = vst.msk [vmem:[#allocation2 + $0x10] sm:$0x3] %vm911_vm2, %v4431_v50 }
  0x25   : > { %915 = vst.msk [vmem:[#allocation2 + $0x28] sm:$0x3] %vm911_vm2, %v4431_v50  ;;  %921 = vst.msk [vmem:[#allocation2 + $0x58] sm:$0x3] %vm911_vm2, %v4431_v50 }
  0x26   : > { %924 = vst.msk [vmem:[#allocation2 + $0x70] sm:$0x3] %vm911_vm2, %v4431_v50  ;;  %927 = vst.msk [vmem:[#allocation2 + $0x88] sm:$0x3] %vm911_vm2, %v4431_v50 }
  0x27   : > { %930 = vst.msk [vmem:[#allocation2 + $0xa0] sm:$0x3] %vm911_vm2, %v4431_v50  ;;  %933 = vst.msk [vmem:[#allocation2 + $0xb8] sm:$0x3] %vm911_vm2, %v4431_v50 }
  0x28   : > { %936 = vst.msk [vmem:[#allocation2 + $0xd0] sm:$0x3] %vm911_vm2, %v4431_v50  ;;  %939 = vst.msk [vmem:[#allocation2 + $0xe8] sm:$0x3] %vm911_vm2, %v4431_v50 }
  0x29   : > { %942 = vst.msk [vmem:[#allocation2 + $0x100] sm:$0x3] %vm911_vm2, %v4431_v50  ;;  %945 = vst.msk [vmem:[#allocation2 + $0x118] sm:$0x3] %vm911_vm2, %v4431_v50 }
  0x2a   : > { %3442 = vmatmul.mubr.msk.bf16.gmra.mxu0 %vm329_vm1, %v319_v27  ;;  %948 = vst.msk [vmem:[#allocation2 + $0x130] sm:$0x3] %vm911_vm2, %v4431_v50  ;;  %951 = vst.msk [vmem:[#allocation2 + $0x148] sm:$0x3] %vm911_vm2, %v4431_v50  ;;  %v1220_v54 = vld [vmem:[#allocation2 + $0x198] sm:$0xff]  ;;  %v1221_v55 = vld [vmem:[#allocation2 + $0x1a0] sm:$0xff] }
  0x2b   : > { %3445 = vmatprep.mubr.msk.bf16.mxu0 %vm329_vm1, %v320_v28  ;;  %954 = vst.msk [vmem:[#allocation2 + $0x160] sm:$0x3] %vm911_vm2, %v4431_v50  ;;  %957 = vst.msk [vmem:[#allocation2 + $0x178] sm:$0x3] %vm911_vm2, %v4431_v50  ;;  %v1030_v52 = vld [vmem:[#allocation2 + $0x9] sm:$0xff]  ;;  %v3528_v57 = vpack.i.bf16 %v1221_v55, %v1220_v54 }
  0x2c   : > { %960 = vst.msk [vmem:[#allocation2 + $0x190] sm:$0x3] %vm911_vm2, %v4431_v50  ;;  %963 = vst.msk [vmem:[#allocation2 + $0x1a8] sm:$0x3] %vm911_vm2, %v4431_v50  ;;  %v3518_v53 = vpack.i.bf16 %v1030_v52, %v1029_v51  ;;  %v1062_v58 = vld [vmem:[#allocation2 + $0xa] sm:$0xff] }
  0x2d   : > { %v3523_v59 = vpack.i.bf16 %v1062_v58, %v1061_v56  ;;  %3529 = vrot.lane.b32.xlu1 %v3528_v57, %s4433_s10 }
  0x2e   : > { %3519 = vrot.lane.b32.xlu0 %v3518_v53, %s4432_s9 }
  0x32   : > { %3446 = vmatmul.mubr.msk.bf16.gmra.mxu0 %vm329_vm1, %v321_v33  ;;  %3524 = vrot.lane.b32.xlu0 %v3523_v59, %s4434_s11 }
  0x33   : > { %3449 = vmatprep.mubr.msk.bf16.mxu0 %vm329_vm1, %v322_v34 }
  0x3a   : > { %3450 = vmatmul.mubr.msk.bf16.gmra.mxu0 %vm329_vm1, %v323_v39 }
  0x3b   : > { %3453 = vmatprep.mubr.msk.bf16.mxu0 %vm329_vm1, %v324_v40 }
  0x42   : > { %3454 = vmatmul.mubr.msk.bf16.gmra.mxu0 %vm329_vm1, %v325_v45 }
  0x43   : > { %3457 = vmatprep.mubr.msk.bf16.mxu0 %vm329_vm1, %v326_v46 }
  0x4a   : > { %3458 = vmatmul.mubr.msk.bf16.gmra.mxu0 %vm329_vm1, %v327_v49 }
  0xd2   : > { %v3431_v61 = vpop.f32.mrf.mxu0 }
  0xd3   : > { %v552_v63 = vmul.f32 %v3431_v61, %v4611_v60 }
  0xd4   : > { %v416_v0 = vpop.f32.mrf.mxu0 }
  0xd5   : > { %v4620_v1 = vadd.f32 %v4616_v62, %v552_v63  ;;  %v550_v2 = vmul.f32 %v4611_v60, %v416_v0 }
  0xd6   : > { %v3432_v3 = vpop.f32.mrf.mxu0 }
  0xd7   : > { %v623_v4 = vmin.f32 %v4620_v1, 20.0  ;;  %v4625_v5 = vadd.f32 %v4616_v62, %v550_v2  ;;  %v553_v6 = vmul.f32 %v3432_v3, %v4611_v60 }
  0xd8   : > { %v419_v7 = vpop.f32.mrf.mxu0 }
  0xd9   : > { %v657_v8 = vmul.f32 1.442695, %v623_v4  ;;  %v621_v9 = vmin.f32 %v4625_v5, 20.0  ;;  %v4630_v10 = vadd.f32 %v4616_v62, %v553_v6  ;;  %v551_v11 = vmul.f32 %v4611_v60, %v419_v7 }
  0xda   : > { %v3435_v12 = vpop.f32.mrf.mxu0 }
  0xdb   : > { %4161 = vpow2.f32 %v657_v8  ;;  %v653_v13 = vmul.f32 1.442695, %v621_v9  ;;  %v624_v14 = vmin.f32 %v4630_v10, 20.0  ;;  %v4635_v15 = vadd.f32 %v4616_v62, %v551_v11 }
  0xdc   : > { %v556_v16 = vmul.f32 %v3435_v12, %v4611_v60  ;;  %v432_v17 = vpop.f32.mrf.mxu0 }
  0xdd   : > { %4163 = vpow2.f32 %v653_v13  ;;  %v659_v18 = vmul.f32 1.442695, %v624_v14  ;;  %v622_v19 = vmin.f32 %v4635_v15, 20.0  ;;  %v554_v20 = vmul.f32 %v4611_v60, %v432_v17 }
  0xde   : > { %v4641_v21 = vadd.f32 %v4616_v62, %v556_v16  ;;  %v3436_v22 = vpop.f32.mrf.mxu0 }
  0xdf   : > { %4165 = vpow2.f32 %v659_v18  ;;  %v655_v23 = vmul.f32 1.442695, %v622_v19  ;;  %v4644_v24 = vadd.f32 %v4616_v62, %v554_v20  ;;  %v557_v25 = vmul.f32 %v3436_v22, %v4611_v60 }
  0xe0   : > { %v627_v26 = vmin.f32 %v4641_v21, 20.0  ;;  %v435_v27 = vpop.f32.mrf.mxu0 }
  0xe1   : > { %4167 = vpow2.f32 %v655_v23  ;;  %v625_v28 = vmin.f32 %v4644_v24, 20.0  ;;  %v4650_v29 = vadd.f32 %v4616_v62, %v557_v25  ;;  %v555_v30 = vmul.f32 %v4611_v60, %v435_v27 }
  0xe2   : > { %v665_v31 = vmul.f32 1.442695, %v627_v26  ;;  %v3439_v32 = vpop.f32.mrf.mxu0 }
  0xe3   : > { %v661_v33 = vmul.f32 1.442695, %v625_v28  ;;  %v628_v34 = vmin.f32 %v4650_v29, 20.0  ;;  %v4655_v35 = vadd.f32 %v4616_v62, %v555_v30  ;;  %v560_v36 = vmul.f32 %v3439_v32, %v4611_v60 }
  0xe4   : > { %4169 = vpow2.f32 %v665_v31  ;;  %v448_v37 = vpop.f32.mrf.mxu0 }
  0xe5   : > { %4171 = vpow2.f32 %v661_v33  ;;  %v667_v38 = vmul.f32 1.442695, %v628_v34  ;;  %v626_v39 = vmin.f32 %v4655_v35, 20.0  ;;  %v4660_v40 = vadd.f32 %v4616_v62, %v560_v36 }
  0xe6   : > { %v558_v41 = vmul.f32 %v4611_v60, %v448_v37  ;;  %v3440_v42 = vpop.f32.mrf.mxu0 }
  0xe7   : > { %4173 = vpow2.f32 %v667_v38  ;;  %v663_v43 = vmul.f32 1.442695, %v626_v39  ;;  %v631_v44 = vmin.f32 %v4660_v40, 20.0  ;;  %v561_v45 = vmul.f32 %v3440_v42, %v4611_v60 }
  0xe8   : > { %v4162_v46 = vpop.eup %4161  ;;  %v4666_v47 = vadd.f32 %v4616_v62, %v558_v41  ;;  %v451_v48 = vpop.f32.mrf.mxu0 }
  0xe9   : > { %v719_v49 = vadd.f32 2.0, %v4162_v46  ;;  %4175 = vpow2.f32 %v663_v43  ;;  %v673_v50 = vmul.f32 1.442695, %v631_v44  ;;  %v4669_v51 = vadd.f32 %v4616_v62, %v561_v45 }
  0xea   : > { %v4164_v52 = vpop.eup %4163  ;;  %v629_v53 = vmin.f32 %v4666_v47, 20.0  ;;  %v559_v54 = vmul.f32 %v4611_v60, %v451_v48  ;;  %v3443_v55 = vpop.f32.mrf.mxu0 }
  0xeb   : > { %v4673_v56 = vmul.f32 %v4162_v46, %v719_v49  ;;  %v717_v57 = vadd.f32 2.0, %v4164_v52  ;;  %4177 = vpow2.f32 %v673_v50  ;;  %v632_v58 = vmin.f32 %v4669_v51, 20.0 }
  0xec   : > { %v4166_v59 = vpop.eup %4165  ;;  %v669_v61 = vmul.f32 1.442695, %v629_v53  ;;  %v4677_v63 = vadd.f32 %v4616_v62, %v559_v54  ;;  %v564_v0 = vmul.f32 %v3443_v55, %v4611_v60  ;;  %v464_v2 = vpop.f32.mrf.mxu0 }
  0xed   : > { %v783_v3 = vadd.f32 2.0, %v4673_v56  ;;  %v4681_v4 = vmul.f32 %v4164_v52, %v717_v57  ;;  %v720_v6 = vadd.f32 2.0, %v4166_v59  ;;  %v675_v7 = vmul.f32 1.442695, %v632_v58 }
  0xee   : > { %v4168_v8 = vpop.eup %4167  ;;  %4179 = vpow2.f32 %v669_v61  ;;  %v630_v9 = vmin.f32 %v4677_v63, 20.0  ;;  %v4685_v11 = vadd.f32 %v4616_v62, %v564_v0  ;;  %v562_v12 = vmul.f32 %v4611_v60, %v464_v2  ;;  %v3444_v13 = vpop.f32.mrf.mxu0 }
  0xef   : > { %4181 = vrcp.f32 %v783_v3  ;;  %v781_v14 = vadd.f32 2.0, %v4681_v4  ;;  %v4689_v16 = vmul.f32 %v4166_v59, %v720_v6  ;;  %v718_v17 = vadd.f32 2.0, %v4168_v8 }
  0xf0   : > { %4183 = vpow2.f32 %v675_v7  ;;  %v671_v18 = vmul.f32 1.442695, %v630_v9  ;;  %v635_v19 = vmin.f32 %v4685_v11, 20.0  ;;  %v4693_v20 = vadd.f32 %v4616_v62, %v562_v12  ;;  %v467_v22 = vpop.f32.mrf.mxu0 }
  0xf1   : > { %v4170_v23 = vpop.eup %4169  ;;  %4185 = vrcp.f32 %v781_v14  ;;  %v784_v25 = vadd.f32 2.0, %v4689_v16  ;;  %v4696_v26 = vmul.f32 %v4168_v8, %v718_v17  ;;  %v565_v27 = vmul.f32 %v3444_v13, %v4611_v60 }
  0xf2   : > { %v4172_v28 = vpop.eup %4171  ;;  %v723_v30 = vadd.f32 2.0, %v4170_v23  ;;  %4187 = vpow2.f32 %v671_v18  ;;  %v681_v31 = vmul.f32 1.442695, %v635_v19  ;;  %v633_v32 = vmin.f32 %v4693_v20, 20.0  ;;  %v3447_v33 = vpop.f32.mrf.mxu0 }
  0xf3   : > { %4189 = vrcp.f32 %v784_v25  ;;  %v782_v34 = vadd.f32 2.0, %v4696_v26  ;;  %v721_v36 = vadd.f32 2.0, %v4172_v28  ;;  %v4702_v37 = vadd.f32 %v4616_v62, %v565_v27 }
  0xf4   : > { %v4174_v38 = vpop.eup %4173  ;;  %v4704_v39 = vmul.f32 %v4170_v23, %v723_v30  ;;  %4191 = vpow2.f32 %v681_v31  ;;  %v677_v41 = vmul.f32 1.442695, %v633_v32  ;;  %v563_v42 = vmul.f32 %v4611_v60, %v467_v22  ;;  %v480_v43 = vpop.f32.mrf.mxu0 }
  0xf5   : > { %4193 = vrcp.f32 %v782_v34  ;;  %v4707_v44 = vmul.f32 %v4172_v28, %v721_v36  ;;  %v724_v45 = vadd.f32 2.0, %v4174_v38  ;;  %v636_v46 = vmin.f32 %v4702_v37, 20.0 }
  0xf6   : > { %v4176_v48 = vpop.eup %4175  ;;  %v787_v49 = vadd.f32 2.0, %v4704_v39  ;;  %4195 = vpow2.f32 %v677_v41  ;;  %v4712_v50 = vadd.f32 %v4616_v62, %v563_v42  ;;  %v568_v52 = vmul.f32 %v3447_v33, %v4611_v60  ;;  %v3448_v58 = vpop.f32.mrf.mxu0 }
  0xf7   : > { %v785_v53 = vadd.f32 2.0, %v4707_v44  ;;  %v4716_v54 = vmul.f32 %v4174_v38, %v724_v45  ;;  %v722_v55 = vadd.f32 2.0, %v4176_v48  ;;  %v683_v57 = vmul.f32 1.442695, %v636_v46 }
  0xf8   : > { %v4178_v59 = vpop.eup %4177  ;;  %4197 = vrcp.f32 %v787_v49  ;;  %v634_v61 = vmin.f32 %v4712_v50, 20.0  ;;  %v4720_v0 = vadd.f32 %v4616_v62, %v568_v52  ;;  %v566_v2 = vmul.f32 %v4611_v60, %v480_v43  ;;  %v483_v19 = vpop.f32.mrf.mxu0 }
  0xf9   : > { %4199 = vrcp.f32 %v785_v53  ;;  %v788_v3 = vadd.f32 2.0, %v4716_v54  ;;  %v4724_v6 = vmul.f32 %v4176_v48, %v722_v55  ;;  %v727_v7 = vadd.f32 2.0, %v4178_v59 }
  0xfa   : > { %4201 = vpow2.f32 %v683_v57  ;;  %v679_v8 = vmul.f32 1.442695, %v634_v61  ;;  %v639_v9 = vmin.f32 %v4720_v0, 20.0  ;;  %v4728_v12 = vadd.f32 %v4616_v62, %v566_v2  ;;  %v3451_v33 = vpop.f32.mrf.mxu0 }
  0xfb   : > { %v4180_v13 = vpop.eup %4179  ;;  %4203 = vrcp.f32 %v788_v3  ;;  %v786_v14 = vadd.f32 2.0, %v4724_v6  ;;  %v4731_v17 = vmul.f32 %v4178_v59, %v727_v7  ;;  %v569_v18 = vmul.f32 %v3448_v58, %v4611_v60 }
  0xfc   : > { %v4182_v22 = vpop.eup %4181  ;;  %v725_v23 = vadd.f32 2.0, %v4180_v13  ;;  %4205 = vpow2.f32 %v679_v8  ;;  %v689_v25 = vmul.f32 1.442695, %v639_v9  ;;  %v637_v27 = vmin.f32 %v4728_v12, 20.0  ;;  %v496_v58 = vpop.f32.mrf.mxu0 }
  0xfd   : > { %v4184_v28 = vpop.eup %4183  ;;  %v818_v30 = vmul.f32 %v4182_v22, %v4673_v56  ;;  %4207 = vrcp.f32 %v786_v14  ;;  %v791_v31 = vadd.f32 2.0, %v4731_v17  ;;  %v4738_v32 = vadd.f32 %v4616_v62, %v569_v18 }
  0xfe   : > { %v4186_v34 = vpop.eup %4185  ;;  %v4740_v36 = vmul.f32 %v4180_v13, %v725_v23  ;;  %v728_v38 = vadd.f32 2.0, %v4184_v28  ;;  %4209 = vpow2.f32 %v689_v25  ;;  %v685_v41 = vmul.f32 1.442695, %v637_v27  ;;  %v3452_v23 = vpop.f32.mrf.mxu0 }
  0xff   : > { %v4188_v42 = vpop.eup %4187  ;;  %v879_v43 = vmul.f32 %v818_v30, %v4620_v1  ;;  %v814_v45 = vmul.f32 %v4186_v34, %v4681_v4  ;;  %4211 = vrcp.f32 %v791_v31  ;;  %v640_v56 = vmin.f32 %v4738_v32, 20.0 }
 0x100   : > { %v4190_v46 = vpop.eup %4189  ;;  %v789_v48 = vadd.f32 2.0, %v4740_v36  ;;  %v4746_v49 = vmul.f32 %v4184_v28, %v728_v38  ;;  %v726_v52 = vadd.f32 2.0, %v4188_v42  ;;  %4213 = vpow2.f32 %v685_v41 }
 0x101   : > { %v4192_v53 = vpop.eup %4191  ;;  %967 = vst.msk [vmem:[#allocation2 + $0x31] sm:$0xff] %vm329_vm1, %v879_v43  ;;  %v877_v55 = vmul.f32 %v814_v45, %v4625_v5  ;;  %v820_v57 = vmul.f32 %v4190_v46, %v4689_v16  ;;  %v691_v1 = vmul.f32 1.442695, %v640_v56  ;;  %v567_v4 = vmul.f32 %v4611_v60, %v483_v19 }
 0x102   : > { %v4194_v59 = vpop.eup %4193  ;;  %4215 = vrcp.f32 %v789_v48  ;;  %v792_v61 = vadd.f32 2.0, %v4746_v49  ;;  %v4753_v2 = vmul.f32 %v4188_v42, %v726_v52  ;;  %v731_v3 = vadd.f32 2.0, %v4192_v53  ;;  %v499_v48 = vpop.f32.mrf.mxu0 }
 0x103   : > { %v4196_v7 = vpop.eup %4195  ;;  %965 = vst.msk [vmem:[#allocation2 + $0x19] sm:$0xff] %vm329_vm1, %v877_v55  ;;  %v880_v8 = vmul.f32 %v820_v57, %v4630_v10  ;;  %v816_v5 = vmul.f32 %v4194_v59, %v4696_v26  ;;  %4217 = vpow2.f32 %v691_v1  ;;  %v4759_v16 = vadd.f32 %v4616_v62, %v567_v4 }
 0x104   : > { %4219 = vrcp.f32 %v792_v61  ;;  %v790_v9 = vadd.f32 2.0, %v4753_v2  ;;  %v4762_v13 = vmul.f32 %v4192_v53, %v731_v3  ;;  %v729_v14 = vadd.f32 2.0, %v4196_v7  ;;  %v3455_v4 = vpop.f32.mrf.mxu0 }
 0x105   : > { %v4198_v18 = vpop.eup %4197  ;;  %968 = vst.msk [vmem:[#allocation2 + $0x39] sm:$0xff] %vm329_vm1, %v880_v8  ;;  %v878_v19 = vmul.f32 %v816_v5, %v4635_v15  ;;  %v638_v22 = vmin.f32 %v4759_v16, 20.0  ;;  %v572_v10 = vmul.f32 %v3451_v33, %v4611_v60  ;;  %v570_v26 = vmul.f32 %v4611_v60, %v496_v58 }
 0x106   : > { %v4200_v25 = vpop.eup %4199  ;;  %v826_v27 = vmul.f32 %v4198_v18, %v4704_v39  ;;  %4221 = vrcp.f32 %v790_v9  ;;  %v795_v28 = vadd.f32 2.0, %v4762_v13  ;;  %v4771_v30 = vmul.f32 %v4196_v7, %v729_v14 }
 0x107   : > { %v4202_v31 = vpop.eup %4201  ;;  %966 = vst.msk [vmem:[#allocation2 + $0x21] sm:$0xff] %vm329_vm1, %v878_v19  ;;  %v822_v15 = vmul.f32 %v4200_v25, %v4707_v44  ;;  %v687_v34 = vmul.f32 1.442695, %v638_v22  ;;  %v4776_v38 = vadd.f32 %v4616_v62, %v572_v10  ;;  %v4779_v33 = vadd.f32 %v4616_v62, %v570_v26 }
 0x108   : > { %v4204_v41 = vpop.eup %4203  ;;  %v883_v39 = vmul.f32 %v826_v27, %v4641_v21  ;;  %4223 = vrcp.f32 %v795_v28  ;;  %v793_v42 = vadd.f32 2.0, %v4771_v30  ;;  %v732_v43 = vadd.f32 2.0, %v4202_v31  ;;  %v1033_v1 = vld [vmem:[#allocation2 + $0x31] sm:$0xff] }
 0x109   : > { %v4206_v45 = vpop.eup %4205  ;;  %v881_v56 = vmul.f32 %v822_v15, %v4644_v24  ;;  %v828_v46 = vmul.f32 %v4204_v41, %v4716_v54  ;;  %4225 = vpow2.f32 %v687_v34  ;;  %v643_v44 = vmin.f32 %v4776_v38, 20.0  ;;  %v512_v15 = vpop.f32.mrf.mxu0 }
 0x10a   : > { %v4208_v52 = vpop.eup %4207  ;;  %971 = vst.msk [vmem:[#allocation2 + $0x61] sm:$0xff] %vm329_vm1, %v883_v39  ;;  %4227 = vrcp.f32 %v793_v42  ;;  %v4787_v53 = vmul.f32 %v4202_v31, %v732_v43  ;;  %v730_v21 = vadd.f32 2.0, %v4206_v45  ;;  %v641_v9 = vmin.f32 %v4779_v33, 20.0 }
 0x10b   : > { %v4210_v55 = vpop.eup %4209  ;;  %969 = vst.msk [vmem:[#allocation2 + $0x49] sm:$0xff] %vm329_vm1, %v881_v56  ;;  %v884_v57 = vmul.f32 %v828_v46, %v4650_v29  ;;  %v824_v24 = vmul.f32 %v4208_v52, %v4724_v6  ;;  %v697_v54 = vmul.f32 1.442695, %v643_v44  ;;  %v573_v25 = vmul.f32 %v3452_v23, %v4611_v60 }
 0x10c   : > { %v4212_v58 = vpop.eup %4211  ;;  %v796_v59 = vadd.f32 2.0, %v4787_v53  ;;  %v4793_v61 = vmul.f32 %v4206_v45, %v730_v21  ;;  %v1065_v3 = vld [vmem:[#allocation2 + $0x32] sm:$0xff]  ;;  %v1066_v7 = vld [vmem:[#allocation2 + $0x3a] sm:$0xff]  ;;  %v735_v5 = vadd.f32 2.0, %v4210_v55  ;;  %v571_v31 = vmul.f32 %v4611_v60, %v499_v48  ;;  %v3456_v21 = vpop.f32.mrf.mxu0 }
 0x10d   : > { %v1034_v8 = vld [vmem:[#allocation2 + $0x39] sm:$0xff]  ;;  %v4214_v14 = vpop.eup %4213  ;;  %972 = vst.msk [vmem:[#allocation2 + $0x69] sm:$0xff] %vm329_vm1, %v884_v57  ;;  %v882_v29 = vmul.f32 %v824_v24, %v4655_v35  ;;  %v834_v6 = vmul.f32 %v4212_v58, %v4731_v17  ;;  %v4799_v18 = vpack.i.bf16 %v1066_v7, %v1065_v3  ;;  %v1190_v35 = vld [vmem:[#allocation2 + $0x30] sm:$0xff]  ;;  %v693_v45 = vmul.f32 1.442695, %v641_v9 }
 0x10e   : > { %v3533_v19 = vpack.i.bf16 %v1034_v8, %v1033_v1  ;;  %v1191_v22 = vld [vmem:[#allocation2 + $0x38] sm:$0xff]  ;;  %4229 = vrcp.f32 %v796_v59  ;;  %v794_v10 = vadd.f32 2.0, %v4793_v61  ;;  %v4802_v26 = vmul.f32 %v4210_v55, %v735_v5  ;;  %v515_v8 = vpop.f32.mrf.mxu0  ;;  %v1064_v9 = vld [vmem:[#allocation2 + $0x22] sm:$0xff] }
 0x10f   : > { %v4216_v27 = vpop.eup %4215  ;;  %970 = vst.msk [vmem:[#allocation2 + $0x51] sm:$0xff] %vm329_vm1, %v882_v29  ;;  %v887_v28 = vmul.f32 %v834_v6, %v4660_v40  ;;  %3539 = vrot.lane.b32.xlu0 %v4799_v18, %s4434_s11  ;;  %v733_v17 = vadd.f32 2.0, %v4214_v14  ;;  %v3558_v23 = vpack.i.bf16 %v1191_v22, %v1190_v35  ;;  %v4819_v44 = vadd.f32 %v4616_v62, %v573_v25  ;;  %v1031_v35 = vld [vmem:[#allocation2 + $0x19] sm:$0xff] }
 0x110   : > { %3534 = vrot.lane.b32.xlu1 %v3533_v19, %s4432_s9  ;;  %v4218_v34 = vpop.eup %4217  ;;  %v830_v41 = vmul.f32 %v4216_v27, %v4740_v36  ;;  %4231 = vrcp.f32 %v794_v10  ;;  %v799_v39 = vadd.f32 2.0, %v4802_v26  ;;  %v4832_v1 = vadd.f32 %v4616_v62, %v571_v31  ;;  %v3459_v22 = vpop.f32.mrf.mxu0 }
 0x111   : > { %v4220_v42 = vpop.eup %4219  ;;  %975 = vst.msk [vmem:[#allocation2 + $0x91] sm:$0xff] %vm329_vm1, %v887_v28  ;;  %v4814_v40 = vmul.f32 %v4214_v14, %v733_v17  ;;  %v736_v43 = vadd.f32 2.0, %v4218_v34  ;;  %4233 = vpow2.f32 %v697_v54  ;;  %v644_v55 = vmin.f32 %v4819_v44, 20.0  ;;  %v1032_v14 = vld [vmem:[#allocation2 + $0x21] sm:$0xff] }
 0x112   : > { %v885_v56 = vmul.f32 %v830_v41, %v4666_v47  ;;  %v836_v46 = vmul.f32 %v4220_v42, %v4746_v49  ;;  %4235 = vrcp.f32 %v799_v39  ;;  %v576_v54 = vmul.f32 %v3455_v4, %v4611_v60  ;;  %v4873_v39 = vld [vmem:[#allocation2 + $0x20] sm:$0xff] }
 0x113   : > { %v4222_v36 = vpop.eup %4221  ;;  %3559 = vrot.lane.b32.xlu0 %v3558_v23, %s4433_s10  ;;  %v797_v48 = vadd.f32 2.0, %v4814_v40  ;;  %v4824_v52 = vmul.f32 %v4218_v34, %v736_v43  ;;  %4237 = vpow2.f32 %v693_v45  ;;  %v699_v3 = vmul.f32 1.442695, %v644_v55 }
 0x114   : > { %3544 = vrot.lane.b32.xlu1 %v3558_v23, %s4435_s16  ;;  %973 = vst.msk [vmem:[#allocation2 + $0x79] sm:$0xff] %vm329_vm1, %v885_v56  ;;  %v888_v47 = vmul.f32 %v836_v46, %v4669_v51  ;;  %v832_v49 = vmul.f32 %v4222_v36, %v4753_v2  ;;  %v642_v29 = vmin.f32 %v4832_v1, 20.0  ;;  %v4847_v6 = vadd.f32 %v4616_v62, %v576_v54  ;;  %v1100_v36 = vld [vmem:[#allocation2 + $0x68] sm:$0xff] }
 0x115   : > { %v4224_v57 = vpop.eup %4223  ;;  %4239 = vrcp.f32 %v797_v48  ;;  %v800_v24 = vadd.f32 2.0, %v4824_v52  ;;  %v575_v10 = vmul.f32 %v4611_v60, %v515_v8  ;;  %v580_v25 = vmul.f32 %v3459_v22, %v4611_v60 }
 0x116   : > { %v4226_v58 = vpop.eup %4225  ;;  %976 = vst.msk [vmem:[#allocation2 + $0x99] sm:$0xff] %vm329_vm1, %v888_v47  ;;  %v886_v59 = vmul.f32 %v832_v49, %v4677_v63  ;;  %v842_v51 = vmul.f32 %v4224_v57, %v4762_v13  ;;  %v1063_v13 = vld [vmem:[#allocation2 + $0x1a] sm:$0xff]  ;;  %v695_v17 = vmul.f32 1.442695, %v642_v29  ;;  %v4868_v41 = vpack.i.bf16 %v1032_v14, %v1031_v35 }
 0x117   : > { %v4228_v2 = vpop.eup %4227  ;;  %3564 = vrot.lane.b32.xlu0 %v3533_v19, %s4436_s17  ;;  %4241 = vrcp.f32 %v800_v24  ;;  %v734_v7 = vadd.f32 2.0, %v4226_v58  ;;  %v4866_v34 = vpack.i.bf16 %v1064_v9, %v1063_v13  ;;  %v4877_v45 = vadd.f32 %v4616_v62, %v575_v10  ;;  %v4888_v47 = vld [vmem:[#allocation2 + $0x18] sm:$0xff]  ;;  %v1099_v24 = vld [vmem:[#allocation2 + $0x60] sm:$0xff] }
 0x118   : > { %3549 = vrot.lane.b32.xlu1 %v3533_v19, %s4437_s18  ;;  %974 = vst.msk [vmem:[#allocation2 + $0x81] sm:$0xff] %vm329_vm1, %v886_v59  ;;  %v891_v4 = vmul.f32 %v842_v51, %v4685_v11  ;;  %v838_v5 = vmul.f32 %v4228_v2, %v4771_v30  ;;  %4243 = vpow2.f32 %v699_v3  ;;  %v574_v19 = vmul.f32 %v4611_v60, %v512_v15  ;;  %v1131_v13 = vld [vmem:[#allocation2 + $0x61] sm:$0xff] }
 0x119   : > { %v4843_v63 = vmul.f32 %v4226_v58, %v734_v7  ;;  %v577_v30 = vmul.f32 %v3456_v21, %v4611_v60  ;;  %v4882_v48 = vadd.f32 %v4616_v62, %v580_v25  ;;  %v3583_v57 = vpack.i.bf16 %v4873_v39, %v4888_v47  ;;  %v1132_v58 = vld [vmem:[#allocation2 + $0x69] sm:$0xff] }
 0x11a   : > { %979 = vst.msk [vmem:[#allocation2 + $0xc1] sm:$0xff] %vm329_vm1, %v891_v4  ;;  %v889_v11 = vmul.f32 %v838_v5, %v4693_v20  ;;  %v647_v20 = vmin.f32 %v4847_v6, 20.0  ;;  %v4862_v31 = vadd.f32 %v4616_v62, %v574_v19  ;;  %v4895_v54 = vpack.i.bf16 %v1100_v36, %v1099_v24  ;;  %v528_v4 = vpop.f32.mrf.mxu0 }
 0x11b   : > { %v4230_v27 = vpop.eup %4229  ;;  %3569 = vrot.lane.b32.xlu0 %v4799_v18, %s4438_s19  ;;  %v798_v28 = vadd.f32 2.0, %v4843_v63  ;;  %v4871_v23 = vadd.f32 %v4616_v62, %v577_v30  ;;  %v651_v8 = vmin.f32 %v4882_v48, 20.0  ;;  %v4912_v29 = vpack.i.bf16 %v1132_v58, %v1131_v13 }
 0x11c   : > { %3554 = vrot.lane.b32.xlu1 %v4799_v18, %s4439_s20  ;;  %977 = vst.msk [vmem:[#allocation2 + $0xa9] sm:$0xff] %vm329_vm1, %v889_v11  ;;  %v844_v15 = vmul.f32 %v4230_v27, %v4787_v53  ;;  %v705_v42 = vmul.f32 1.442695, %v647_v20  ;;  %v645_v43 = vmin.f32 %v4862_v31, 20.0  ;;  %v1163_v27 = vld [vmem:[#allocation2 + $0x62] sm:$0xff]  ;;  %v3460_v20 = vpop.f32.mrf.mxu0 }
 0x11d   : > { %v4232_v18 = vpop.eup %4231  ;;  %4245 = vrcp.f32 %v798_v28  ;;  %v713_v11 = vmul.f32 1.442695, %v651_v8  ;;  %v1164_v28 = vld [vmem:[#allocation2 + $0x6a] sm:$0xff] }
 0x11e   : > { %v4234_v56 = vpop.eup %4233  ;;  %v892_v53 = vmul.f32 %v844_v15, %v4702_v37  ;;  %v840_v46 = vmul.f32 %v4232_v18, %v4793_v61  ;;  %4247 = vpow2.f32 %v695_v17  ;;  %v701_v3 = vmul.f32 1.442695, %v645_v43  ;;  %v1036_v43 = vld [vmem:[#allocation2 + $0x51] sm:$0xff] }
 0x11f   : > { %v4236_v21 = vpop.eup %4235  ;;  %3574 = vrot.lane.b32.xlu0 %v4868_v41, %s4432_s9  ;;  %v739_v49 = vadd.f32 2.0, %v4234_v56  ;;  %4249 = vpow2.f32 %v705_v42  ;;  %v578_v17 = vmul.f32 %v4611_v60, %v528_v4  ;;  %v4928_v18 = vpack.i.bf16 %v1164_v28, %v1163_v27 }
 0x120   : > { %3579 = vrot.lane.b32.xlu1 %v4866_v34, %s4434_s11  ;;  %v4238_v55 = vpop.eup %4237  ;;  %980 = vst.msk [vmem:[#allocation2 + $0xc9] sm:$0xff] %vm329_vm1, %v892_v53  ;;  %v890_v37 = vmul.f32 %v840_v46, %v4712_v50  ;;  %v850_v61 = vmul.f32 %v4236_v21, %v4802_v26  ;;  %v648_v50 = vmin.f32 %v4871_v23, 20.0  ;;  %v646_v26 = vmin.f32 %v4877_v45, 20.0  ;;  %v531_v21 = vpop.f32.mrf.mxu0 }
 0x121   : > { %v4897_v59 = vmul.f32 %v4234_v56, %v739_v49  ;;  %v737_v51 = vadd.f32 2.0, %v4238_v55  ;;  %4251 = vpow2.f32 %v701_v3  ;;  %v4931_v42 = vadd.f32 %v4616_v62, %v578_v17  ;;  %v1068_v3 = vld [vmem:[#allocation2 + $0x52] sm:$0xff] }
 0x122   : > { %v4240_v2 = vpop.eup %4239  ;;  %978 = vst.msk [vmem:[#allocation2 + $0xb1] sm:$0xff] %vm329_vm1, %v890_v37  ;;  %v895_v7 = vmul.f32 %v850_v61, %v4720_v0  ;;  %v707_v19 = vmul.f32 1.442695, %v648_v50  ;;  %v703_v22 = vmul.f32 1.442695, %v646_v26  ;;  %v579_v50 = vmul.f32 %v4611_v60, %v531_v21 }
 0x123   : > { %v846_v5 = vmul.f32 %v4240_v2, %v4814_v40  ;;  %3584 = vrot.lane.b32.xlu0 %v3583_v57, %s4435_s16  ;;  %v803_v9 = vadd.f32 2.0, %v4897_v59  ;;  %v4909_v14 = vmul.f32 %v4238_v55, %v737_v51  ;;  %v649_v36 = vmin.f32 %v4931_v42, 20.0  ;;  %v1035_v55 = vld [vmem:[#allocation2 + $0x49] sm:$0xff] }
 0x124   : > { %3609 = vrot.lane.b32.xlu1 %v4895_v54, %s4435_s16  ;;  %v4242_v0 = vpop.eup %4241  ;;  %983 = vst.msk [vmem:[#allocation2 + $0xf1] sm:$0xff] %vm329_vm1, %v895_v7  ;;  %v4158_v57 = vld [vmem:[%s6123_s4 + $0x10] ss:$0 sps:$4 sm:$0x33]   ;;  %v4948_v24 = vpack.i.bf16 %v1036_v43, %v1035_v55  ;;  %v4963_v4 = vadd.f32 %v4616_v62, %v579_v50 }
 0x125   : > { %v4244_v40 = vpop.eup %4243  ;;  %v893_v30 = vmul.f32 %v846_v5, %v4728_v12  ;;  %v852_v10 = vmul.f32 %v4242_v0, %v4824_v52  ;;  %4253 = vrcp.f32 %v803_v9  ;;  %v801_v25 = vadd.f32 2.0, %v4909_v14  ;;  %v1067_v51 = vld [vmem:[#allocation2 + $0x4a] sm:$0xff]  ;;  %3500 = vmatprep.subr.msk.bf16.mxu1 %vm378_vm0, %v4158_v57 }
 0x126   : > { %v740_v35 = vadd.f32 2.0, %v4244_v40  ;;  %4255 = vpow2.f32 %v707_v19  ;;  %v581_v12 = vmul.f32 %v3460_v20, %v4611_v60  ;;  %v709_v58 = vmul.f32 1.442695, %v649_v36  ;;  %v4968_v0 = vld [vmem:[#allocation2 + $0x50] sm:$0xff] }
 0x127   : > { %981 = vst.msk [vmem:[#allocation2 + $0xd9] sm:$0xff] %vm329_vm1, %v893_v30  ;;  %v896_v15 = vmul.f32 %v852_v10, %v4738_v32  ;;  %3589 = vrot.lane.b32.xlu0 %v4868_v41, %s4437_s18  ;;  %4257 = vrcp.f32 %v801_v25  ;;  %v4965_v60 = vpack.i.bf16 %v1068_v3, %v1067_v51  ;;  %v650_v19 = vmin.f32 %v4963_v4, 20.0  ;;  %v4978_v30 = vld [vmem:[#allocation2 + $0x48] sm:$0xff]  ;;  %v1103_v51 = vld [vmem:[#allocation2 + $0x90] sm:$0xff] }
 0x128   : > { %3614 = vrot.lane.b32.xlu1 %v4912_v29, %s4437_s18  ;;  %v4925_v52 = vmul.f32 %v4244_v40, %v740_v35  ;;  %4259 = vpow2.f32 %v703_v22  ;;  %v4935_v56 = vadd.f32 %v4616_v62, %v581_v12  ;;  %v3653_v28 = vpack.i.bf16 %v4968_v0, %v4978_v30 }
 0x129   : > { %984 = vst.msk [vmem:[#allocation2 + $0xf9] sm:$0xff] %vm329_vm1, %v896_v15  ;;  %4261 = vpow2.f32 %v713_v11  ;;  %v711_v25 = vmul.f32 1.442695, %v650_v19  ;;  %v1135_v19 = vld [vmem:[#allocation2 + $0x91] sm:$0xff] }
 0x12a   : > { %v4246_v32 = vpop.eup %4245  ;;  %v804_v41 = vadd.f32 2.0, %v4925_v52  ;;  %v652_v61 = vmin.f32 %v4935_v56, 20.0 }
 0x12b   : > { %v4248_v53 = vpop.eup %4247  ;;  %v848_v46 = vmul.f32 %v4246_v32, %v4843_v63  ;;  %3594 = vrot.lane.b32.xlu0 %v4866_v34, %s4439_s20 }
 0x12c   : > { %3619 = vrot.lane.b32.xlu1 %v4928_v18, %s4439_s20  ;;  %v4250_v49 = vpop.eup %4249  ;;  %4263 = vrcp.f32 %v804_v41  ;;  %v738_v37 = vadd.f32 2.0, %v4248_v53  ;;  %v715_v7 = vmul.f32 1.442695, %v652_v61  ;;  %v4159_v41 = vld [vmem:[%s6123_s4 + $0x8] sm:$0xff]  }
 0x12d   : > { %v894_v63 = vmul.f32 %v848_v46, %v4759_v16  ;;  %v743_v34 = vadd.f32 2.0, %v4250_v49  ;;  %4265 = vpow2.f32 %v709_v58  ;;  %v2659_v46 = vsel %vm378_vm0, %v4158_v57, 0 }
 0x12e   : > { %v4950_v2 = vmul.f32 %v4248_v53, %v738_v37  ;;  %v4252_v26 = vpop.eup %4251  ;;  %4267 = vpow2.f32 %v715_v7  ;;  %3462 = vmatpush3.bf16.msra.mxu1 %v2659_v46 }
 0x12f   : > { %982 = vst.msk [vmem:[#allocation2 + $0xe1] sm:$0xff] %vm329_vm1, %v894_v63  ;;  %3599 = vrot.lane.b32.xlu0 %v4912_v29, %s4432_s9  ;;  %v4959_v16 = vmul.f32 %v4250_v49, %v743_v34  ;;  %v741_v13 = vadd.f32 2.0, %v4252_v26  ;;  %3463 = vmatprep.subr.bf16.mxu1 %v4159_v41 }
 0x130   : > { %3639 = vrot.lane.b32.xlu1 %v4948_v24, %s4432_s9  ;;  %v802_v8 = vadd.f32 2.0, %v4950_v2 }
 0x131   : > { %v807_v5 = vadd.f32 2.0, %v4959_v16  ;;  %v4976_v11 = vmul.f32 %v4252_v26, %v741_v13 }
 0x132   : > { %v4254_v9 = vpop.eup %4253  ;;  %4269 = vrcp.f32 %v802_v8  ;;  %3464 = vmatpush3.bf16.msra.mxu1 %v4159_v41 }
 0x133   : > { %v4256_v22 = vpop.eup %4255  ;;  %3604 = vrot.lane.b32.xlu0 %v4928_v18, %s4434_s11  ;;  %v858_v62 = vmul.f32 %v4254_v9, %v4897_v59  ;;  %4271 = vrcp.f32 %v807_v5  ;;  %v805_v20 = vadd.f32 2.0, %v4976_v11  ;;  %v1136_v5 = vld [vmem:[#allocation2 + $0x99] sm:$0xff] }
 0x134   : > { %3644 = vrot.lane.b32.xlu1 %v4965_v60, %s4434_s11  ;;  %v4258_v40 = vpop.eup %4257  ;;  %v744_v10 = vadd.f32 2.0, %v4256_v22  ;;  %4273 = vpow2.f32 %v711_v25 }
 0x135   : > { %v4260_v27 = vpop.eup %4259  ;;  %v899_v35 = vmul.f32 %v858_v62, %v4776_v38  ;;  %v854_v17 = vmul.f32 %v4258_v40, %v4909_v14  ;;  %4275 = vrcp.f32 %v805_v20  ;;  %v1167_v62 = vld [vmem:[#allocation2 + $0x92] sm:$0xff]  ;;  %v1168_v40 = vld [vmem:[#allocation2 + $0x9a] sm:$0xff] }
 0x136   : > { %v4262_v15 = vpop.eup %4261  ;;  %v4985_v59 = vmul.f32 %v4256_v22, %v744_v10  ;;  %v742_v12 = vadd.f32 2.0, %v4260_v27  ;;  %v3693_v22 = vpack.i.bf16 %v1136_v5, %v1135_v19  ;;  %v3520_v5 = vpop.permute.xlu0 %3519 }
 0x137   : > { %3624 = vrot.lane.b32.xlu0 %v4895_v54, %s4433_s10  ;;  %987 = vst.msk [vmem:[#allocation2 + $0x121] sm:$0xff] %vm329_vm1, %v899_v35  ;;  %v897_v32 = vmul.f32 %v854_v17, %v4779_v33  ;;  %v747_v38 = vadd.f32 2.0, %v4262_v15  ;;  %v3698_v17 = vpack.i.bf16 %v1168_v40, %v1167_v62  ;;  %v1144_v62 = vld [vmem:[#allocation2 + $0xf9] sm:$0xff] }
 0x138   : > { %3654 = vrot.lane.b32.xlu1 %v3653_v28, %s4433_s10  ;;  %v808_v14 = vadd.f32 2.0, %v4985_v59  ;;  %v4993_v43 = vmul.f32 %v4260_v27, %v742_v12 }
 0x139   : > { %v4264_v53 = vpop.eup %4263  ;;  %985 = vst.msk [vmem:[#allocation2 + $0x109] sm:$0xff] %vm329_vm1, %v897_v32  ;;  %v4999_v54 = vmul.f32 %v4262_v15, %v747_v38 }
 0x13a   : > { %v860_v36 = vmul.f32 %v4264_v53, %v4925_v52  ;;  %4277 = vrcp.f32 %v808_v14  ;;  %v806_v33 = vadd.f32 2.0, %v4993_v43  ;;  %v4266_v49 = vpop.eup %4265  ;;  %v4160_v52 = vld [vmem:[%s6123_s4] sm:$0xff]  }
 0x13b   : > { %3629 = vrot.lane.b32.xlu0 %v4912_v29, %s4436_s17  ;;  %v811_v21 = vadd.f32 2.0, %v4999_v54  ;;  %v4268_v37 = vpop.eup %4267  ;;  %v745_v61 = vadd.f32 2.0, %v4266_v49  ;;  %v1104_v29 = vld [vmem:[#allocation2 + $0x98] sm:$0xff]  ;;  %3465 = vmatprep.subr.bf16.mxu1 %v4160_v52 }
 0x13c   : > { %3659 = vrot.lane.b32.xlu1 %v4948_v24, %s4436_s17  ;;  %v900_v55 = vmul.f32 %v860_v36, %v4819_v44  ;;  %4279 = vrcp.f32 %v806_v33  ;;  %v748_v57 = vadd.f32 2.0, %v4268_v37  ;;  %v5019_v7 = vpack.i.bf16 %v1104_v29, %v1103_v51  ;;  %3466 = vmatpush3.bf16.msra.mxu1 %v4160_v52  ;;  %v1071_v14 = vld [vmem:[#allocation2 + $0x7a] sm:$0xff]  ;;  %v1171_v29 = vld [vmem:[#allocation2 + $0xc2] sm:$0xff]  ;;  %v1075_v51 = vld [vmem:[#allocation2 + $0xaa] sm:$0xff] }
 0x13d   : > { %4281 = vrcp.f32 %v811_v21  ;;  %v777_v44 = vmul.f32 %v4266_v49, %v745_v61  ;;  %v1140_v61 = vld [vmem:[#allocation2 + $0xc9] sm:$0xff] }
 0x13e   : > { %988 = vst.msk [vmem:[#allocation2 + $0x129] sm:$0xff] %vm329_vm1, %v900_v55  ;;  %v780_v3 = vmul.f32 %v4268_v37, %v748_v57  ;;  %v1139_v37 = vld [vmem:[#allocation2 + $0xc1] sm:$0xff]  ;;  %v1172_v57 = vld [vmem:[#allocation2 + $0xca] sm:$0xff] }
 0x13f   : > { %v4270_v63 = vpop.eup %4269  ;;  %3634 = vrot.lane.b32.xlu0 %v4928_v18, %s4438_s19  ;;  %v809_v26 = vadd.f32 2.0, %v777_v44 }
 0x140   : > { %3664 = vrot.lane.b32.xlu1 %v4965_v60, %s4438_s19  ;;  %v4272_v34 = vpop.eup %4271  ;;  %v856_v58 = vmul.f32 %v4270_v63, %v4950_v2  ;;  %v812_v13 = vadd.f32 2.0, %v780_v3  ;;  %v3778_v63 = vpack.i.bf16 %v1172_v57, %v1171_v29 }
 0x141   : > { %v866_v50 = vmul.f32 %v4272_v34, %v4959_v16  ;;  %v4274_v18 = vpop.eup %4273  ;;  %4283 = vrcp.f32 %v809_v26  ;;  %v1044_v34 = vld [vmem:[#allocation2 + $0xb1] sm:$0xff] }
 0x142   : > { %v898_v8 = vmul.f32 %v856_v58, %v4832_v1  ;;  %v4276_v9 = vpop.eup %4275  ;;  %4285 = vrcp.f32 %v812_v13  ;;  %v746_v16 = vadd.f32 2.0, %v4274_v18  ;;  %v1201_v26 = vld [vmem:[#allocation2 + $0xb0] sm:$0xff]  ;;  %v5078_v13 = vpop.permute.xlu1 %3529 }
 0x143   : > { %3649 = vrot.lane.b32.xlu0 %v3653_v28, %s4435_s16  ;;  %v903_v2 = vmul.f32 %v866_v50, %v4847_v6  ;;  %v862_v1 = vmul.f32 %v4276_v9, %v4976_v11  ;;  %v1040_v11 = vld [vmem:[#allocation2 + $0x81] sm:$0xff]  ;;  %v1112_v9 = vld [vmem:[#allocation2 + $0xf8] sm:$0xff] }
 0x144   : > { %3689 = vrot.lane.b32.xlu1 %v5019_v7, %s4435_s16  ;;  %986 = vst.msk [vmem:[#allocation2 + $0x111] sm:$0xff] %vm329_vm1, %v898_v8  ;;  %v778_v10 = vmul.f32 %v4274_v18, %v746_v16  ;;  %v1200_v50 = vld [vmem:[#allocation2 + $0xa8] sm:$0xff]  ;;  %v5080_v18 = vpop.permute.xlu0 %3524 }
 0x145   : > { %991 = vst.msk [vmem:[#allocation2 + $0x151] sm:$0xff] %vm329_vm1, %v903_v2  ;;  %v901_v6 = vmul.f32 %v862_v1, %v4862_v31  ;;  %v3808_v8 = vpack.i.bf16 %v1201_v26, %v1200_v50  ;;  %v1111_v2 = vld [vmem:[#allocation2 + $0xf0] sm:$0xff] }
 0x146   : > { %v810_v28 = vadd.f32 2.0, %v778_v10  ;;  %v1143_v1 = vld [vmem:[#allocation2 + $0xf1] sm:$0xff] }
 0x147   : > { %v4278_v25 = vpop.eup %4277  ;;  %3669 = vrot.lane.b32.xlu0 %v4948_v24, %s4437_s18  ;;  %989 = vst.msk [vmem:[#allocation2 + $0x139] sm:$0xff] %vm329_vm1, %v901_v6  ;;  %v1039_v24 = vld [vmem:[#allocation2 + $0x79] sm:$0xff] }
 0x148   : > { %3694 = vrot.lane.b32.xlu1 %v3693_v22, %s4437_s18  ;;  %v868_v27 = vmul.f32 %v4278_v25, %v4985_v59  ;;  %4287 = vrcp.f32 %v810_v28  ;;  %v3718_v32 = vpack.i.bf16 %v1040_v11, %v1039_v24  ;;  %v3853_v25 = vpack.i.bf16 %v1144_v62, %v1143_v1  ;;  %v1175_v6 = vld [vmem:[#allocation2 + $0xf2] sm:$0xff]  ;;  %v1048_v11 = vld [vmem:[#allocation2 + $0xe1] sm:$0xff] }
 0x149   : > { %v4280_v35 = vpop.eup %4279  ;;  %v1079_v24 = vld [vmem:[#allocation2 + $0xda] sm:$0xff] }
 0x14a   : > { %v4282_v20 = vpop.eup %4281  ;;  %v904_v15 = vmul.f32 %v868_v27, %v4871_v23  ;;  %v864_v12 = vmul.f32 %v4280_v35, %v4993_v43  ;;  %v1072_v23 = vld [vmem:[#allocation2 + $0x82] sm:$0xff]  ;;  %v1176_v27 = vld [vmem:[#allocation2 + $0xfa] sm:$0xff] }
 0x14b   : > { %3674 = vrot.lane.b32.xlu0 %v4965_v60, %s4439_s20  ;;  %v874_v31 = vmul.f32 %v4282_v20, %v4999_v54  ;;  %v3723_v41 = vpack.i.bf16 %v1072_v23, %v1071_v14  ;;  %v1197_v54 = vld [vmem:[#allocation2 + $0x80] sm:$0xff]  ;;  %v1204_v23 = vld [vmem:[#allocation2 + $0xd8] sm:$0xff] }
 0x14c   : > { %3699 = vrot.lane.b32.xlu1 %v3698_v17, %s4439_s20  ;;  %992 = vst.msk [vmem:[#allocation2 + $0x159] sm:$0xff] %vm329_vm1, %v904_v15  ;;  %v902_v59 = vmul.f32 %v864_v12, %v4877_v45  ;;  %v1047_v20 = vld [vmem:[#allocation2 + $0xd9] sm:$0xff] }
 0x14d   : > { %v907_v38 = vmul.f32 %v874_v31, %v4882_v48  ;;  %v1196_v48 = vld [vmem:[#allocation2 + $0x78] sm:$0xff]  ;;  %v5106_v31 = vpack.i.bf16 %v1048_v11, %v1047_v20  ;;  %v1147_v20 = vld [vmem:[#allocation2 + $0x121] sm:$0xff]  ;;  %v1148_v11 = vld [vmem:[#allocation2 + $0x129] sm:$0xff] }
 0x14e   : > { %990 = vst.msk [vmem:[#allocation2 + $0x141] sm:$0xff] %vm329_vm1, %v902_v59  ;;  %v4284_v60 = vpop.eup %4283  ;;  %v3728_v33 = vpack.i.bf16 %v1197_v54, %v1196_v48  ;;  %v1080_v59 = vld [vmem:[#allocation2 + $0xe2] sm:$0xff] }
 0x14f   : > { %3679 = vrot.lane.b32.xlu0 %v3693_v22, %s4432_s9  ;;  %995 = vst.msk [vmem:[#allocation2 + $0x181] sm:$0xff] %vm329_vm1, %v907_v38  ;;  %v4286_v43 = vpop.eup %4285  ;;  %v870_v53 = vmul.f32 %v4284_v60, %v777_v44  ;;  %v1043_v44 = vld [vmem:[#allocation2 + $0xa9] sm:$0xff]  ;;  %v5115_v14 = vpack.i.bf16 %v1080_v59, %v1079_v24  ;;  %v1205_v60 = vld [vmem:[#allocation2 + $0xe0] sm:$0xff] }
 0x150   : > { %3719 = vrot.lane.b32.xlu1 %v3718_v32, %s4432_s9  ;;  %v876_v46 = vmul.f32 %v4286_v43, %v780_v3  ;;  %v3798_v58 = vpack.i.bf16 %v1044_v34, %v1043_v44  ;;  %v1076_v3 = vld [vmem:[#allocation2 + $0xb2] sm:$0xff]  ;;  %v3522_v43 = vunpack.i.h.bf16 %v3520_v5  ;;  %v997_v48 = vld [vmem:[#allocation2] sm:$0xff] }
 0x151   : > { %v905_v45 = vmul.f32 %v870_v53, %v4931_v42  ;;  %v1107_v42 = vld [vmem:[#allocation2 + $0xc0] sm:$0xff] }
 0x152   : > { %v908_v36 = vmul.f32 %v876_v46, %v4935_v56  ;;  %v1108_v56 = vld [vmem:[#allocation2 + $0xc8] sm:$0xff]  ;;  %v3888_v46 = vpack.i.bf16 %v1205_v60, %v1204_v23 }
 0x153   : > { %3684 = vrot.lane.b32.xlu0 %v3698_v17, %s4434_s11  ;;  %993 = vst.msk [vmem:[#allocation2 + $0x169] sm:$0xff] %vm329_vm1, %v905_v45  ;;  %v3768_v52 = vpack.i.bf16 %v1108_v56, %v1107_v42  ;;  %v998_v45 = vld [vmem:[#allocation2 + $0x8] sm:$0xff] }
 0x154   : > { %3724 = vrot.lane.b32.xlu1 %v3723_v41, %s4434_s11  ;;  %996 = vst.msk [vmem:[#allocation2 + $0x189] sm:$0xff] %vm329_vm1, %v908_v36  ;;  %v3527_v36 = vunpack.i.h.bf16 %v5080_v18 }
 0x155   : > { %v4288_v21 = vpop.eup %4287 }
 0x156   : > { %v872_v49 = vmul.f32 %v4288_v21, %v778_v10  ;;  %v2311_v21 = vsel %vm329_vm1, %v998_v45, %v3522_v43  ;;  %v5169_v43 = vpack.i.bf16 %v1148_v11, %v1147_v20 }
 0x157   : > { %3704 = vrot.lane.b32.xlu0 %v5019_v7, %s4433_s10  ;;  %v3803_v7 = vpack.i.bf16 %v1076_v3, %v1075_v51 }
 0x158   : > { %3729 = vrot.lane.b32.xlu1 %v3728_v33, %s4433_s10  ;;  %v906_v55 = vmul.f32 %v872_v49, %v4963_v4  ;;  %v3773_v4 = vpack.i.bf16 %v1140_v61, %v1139_v37  ;;  %v1115_v37 = vld [vmem:[#allocation2 + $0x120] sm:$0xff]  ;;  %v1116_v61 = vld [vmem:[#allocation2 + $0x128] sm:$0xff] }
 0x15a   : > { %994 = vst.msk [vmem:[#allocation2 + $0x171] sm:$0xff] %vm329_vm1, %v906_v55 }
 0x15b   : > { %3709 = vrot.lane.b32.xlu0 %v3693_v22, %s4436_s17  ;;  %v3848_v22 = vpack.i.bf16 %v1112_v9, %v1111_v2 }
 0x15c   : > { %3734 = vrot.lane.b32.xlu1 %v3718_v32, %s4436_s17 }
 0x15f   : > { %3714 = vrot.lane.b32.xlu0 %v3698_v17, %s4438_s19  ;;  %v3858_v17 = vpack.i.bf16 %v1176_v27, %v1175_v6 }
 0x160   : > { %3739 = vrot.lane.b32.xlu1 %v3723_v41, %s4438_s19 }
 0x163   : > { %3744 = vrot.lane.b32.xlu0 %v3728_v33, %s4435_s16  ;;  %v3526_v33 = vunpack.i.l.bf16 %v5080_v18 }
 0x164   : > { %3769 = vrot.lane.b32.xlu1 %v3768_v52, %s4435_s16 }
 0x167   : > { %3749 = vrot.lane.b32.xlu0 %v3718_v32, %s4437_s18 }
 0x168   : > { %3774 = vrot.lane.b32.xlu1 %v3773_v4, %s4437_s18 }
 0x16b   : > { %3754 = vrot.lane.b32.xlu0 %v3723_v41, %s4439_s20  ;;  %v3521_v41 = vunpack.i.l.bf16 %v3520_v5 }
 0x16c   : > { %3779 = vrot.lane.b32.xlu1 %v3778_v63, %s4439_s20 }
 0x16d   : > { %v2310_v49 = vsel %vm329_vm1, %v997_v48, %v3521_v41 }
 0x16e   : > { %v2343_v57 = vsel %vm2342_vm3, %v2310_v49, %v3526_v33  ;;  %v1180_v33 = vld [vmem:[#allocation2 + $0x12a] sm:$0xff] }
 0x16f   : > { %3759 = vrot.lane.b32.xlu0 %v3773_v4, %s4432_s9 }
 0x170   : > { %3799 = vrot.lane.b32.xlu1 %v3798_v58, %s4432_s9 }
 0x173   : > { %3764 = vrot.lane.b32.xlu0 %v3778_v63, %s4434_s11 }
 0x174   : > { %3804 = vrot.lane.b32.xlu1 %v3803_v7, %s4434_s11 }
 0x177   : > { %3784 = vrot.lane.b32.xlu0 %v3768_v52, %s4433_s10 }
 0x178   : > { %3809 = vrot.lane.b32.xlu1 %v3808_v8, %s4433_s10 }
 0x17b   : > { %3789 = vrot.lane.b32.xlu0 %v3773_v4, %s4436_s17 }
 0x17c   : > { %3814 = vrot.lane.b32.xlu1 %v3798_v58, %s4436_s17 }
 0x17f   : > { %3794 = vrot.lane.b32.xlu0 %v3778_v63, %s4438_s19  ;;  %v2344_v63 = vsel %vm2342_vm3, %v2311_v21, %v3527_v36  ;;  %v1179_v36 = vld [vmem:[#allocation2 + $0x122] sm:$0xff] }
 0x180   : > { %3819 = vrot.lane.b32.xlu1 %v3803_v7, %s4438_s19 }
 0x181   : > { %v5084_v19 = vpop.permute.xlu0 %3539 }
 0x182   : > { %v5086_v16 = vpop.permute.xlu1 %3534 }
 0x183   : > { %3824 = vrot.lane.b32.xlu0 %v3808_v8, %s4435_s16 }
 0x184   : > { %3849 = vrot.lane.b32.xlu1 %v3848_v22, %s4435_s16 }
 0x185   : > { %v5090_v40 = vpop.permute.xlu0 %3559 }
 0x186   : > { %v5092_v10 = vpop.permute.xlu1 %3544  ;;  %v3562_v26 = vunpack.i.h.bf16 %v5090_v40  ;;  %v3561_v8 = vunpack.i.l.bf16 %v5090_v40 }
 0x187   : > { %3829 = vrot.lane.b32.xlu0 %v3798_v58, %s4437_s18  ;;  %v5137_v58 = vpack.i.bf16 %v1116_v61, %v1115_v37  ;;  %v3547_v21 = vunpack.i.h.bf16 %v5092_v10  ;;  %v3546_v49 = vunpack.i.l.bf16 %v5092_v10  ;;  %v1051_v37 = vld [vmem:[#allocation2 + $0x109] sm:$0xff] }
 0x188   : > { %3854 = vrot.lane.b32.xlu1 %v3853_v25, %s4437_s18 }
 0x189   : > { %v5096_v28 = vpop.permute.xlu0 %3564 }
 0x18a   : > { %v5098_v35 = vpop.permute.xlu1 %3549  ;;  %v3567_v2 = vunpack.i.h.bf16 %v5096_v28  ;;  %v3566_v9 = vunpack.i.l.bf16 %v5096_v28 }
 0x18b   : > { %3834 = vrot.lane.b32.xlu0 %v3803_v7, %s4439_s20  ;;  %v3552_v10 = vunpack.i.h.bf16 %v5098_v35 }
 0x18c   : > { %3859 = vrot.lane.b32.xlu1 %v3858_v17, %s4439_s20 }
 0x18d   : > { %v5102_v15 = vpop.permute.xlu0 %3569 }
 0x18e   : > { %v5104_v12 = vpop.permute.xlu1 %3554  ;;  %v3572_v28 = vunpack.i.h.bf16 %v5102_v15  ;;  %v3571_v24 = vunpack.i.l.bf16 %v5102_v15 }
 0x18f   : > { %3839 = vrot.lane.b32.xlu0 %v3853_v25, %s4432_s9 }
 0x190   : > { %3879 = vrot.lane.b32.xlu1 %v5106_v31, %s4432_s9 }
 0x191   : > { %v5113_v38 = vpop.permute.xlu0 %3574 }
 0x192   : > { %v5111_v32 = vpop.permute.xlu1 %3579  ;;  %v3577_v62 = vunpack.i.h.bf16 %v5113_v38  ;;  %v3576_v40 = vunpack.i.l.bf16 %v5113_v38 }
 0x193   : > { %3844 = vrot.lane.b32.xlu0 %v3858_v17, %s4434_s11  ;;  %v3582_v23 = vunpack.i.h.bf16 %v5111_v32  ;;  %v3581_v60 = vunpack.i.l.bf16 %v5111_v32 }
 0x194   : > { %3884 = vrot.lane.b32.xlu1 %v5115_v14, %s4434_s11  ;;  %v2312_v41 = vsel %vm329_vm1, %v4888_v47, %v3576_v40  ;;  %v2313_v15 = vsel %vm329_vm1, %v4873_v39, %v3577_v62 }
 0x195   : > { %v3585_v53 = vpop.permute.xlu0 %3584  ;;  %v2345_v39 = vsel %vm2342_vm3, %v2312_v41, %v3581_v60  ;;  %v2346_v47 = vsel %vm2342_vm3, %v2313_v15, %v3582_v23  ;;  %v3537_v15 = vunpack.i.h.bf16 %v5086_v16 }
 0x196   : > { %v5120_v54 = vpop.permute.xlu1 %3609  ;;  %v3587_v56 = vunpack.i.h.bf16 %v3585_v53  ;;  %v3586_v52 = vunpack.i.l.bf16 %v3585_v53  ;;  %v2378_v61 = vsel %vm2375_vm4, %v2345_v39, %v3546_v49 }
 0x197   : > { %3864 = vrot.lane.b32.xlu0 %v3848_v22, %s4433_s10 }
 0x198   : > { %3889 = vrot.lane.b32.xlu1 %v3888_v46, %s4433_s10  ;;  %v2377_v51 = vsel %vm2375_vm4, %v2344_v63, %v3587_v56  ;;  %v2376_v3 = vsel %vm2375_vm4, %v2343_v57, %v3586_v52  ;;  %v5192_v52 = vpack.i.bf16 %v1180_v33, %v1179_v36  ;;  %v3542_v36 = vunpack.i.h.bf16 %v5084_v19 }
 0x199   : > { %v3590_v55 = vpop.permute.xlu0 %3589  ;;  %v3541_v33 = vunpack.i.l.bf16 %v5084_v19 }
 0x19a   : > { %v5128_v42 = vpop.permute.xlu1 %3614  ;;  %v3592_v4 = vunpack.i.h.bf16 %v3590_v55  ;;  %v3591_v29 = vunpack.i.l.bf16 %v3590_v55 }
 0x19b   : > { %3869 = vrot.lane.b32.xlu0 %v3853_v25, %s4436_s17 }
 0x19c   : > { %3894 = vrot.lane.b32.xlu1 %v5106_v31, %s4436_s17  ;;  %v2409_v5 = vsel %vm2408_vm5, %v2376_v3, %v3591_v29  ;;  %v2410_v18 = vsel %vm2408_vm5, %v2377_v51, %v3592_v4  ;;  %v2379_v4 = vsel %vm2375_vm4, %v2346_v47, %v3547_v21  ;;  %v3551_v29 = vunpack.i.l.bf16 %v5098_v35  ;;  %v4417_v47 = vld [vmem:[#allocation2 + $0x30] sm:$0xff]  ;;  %v4418_v21 = vld [vmem:[#allocation2 + $0x38] sm:$0xff] }
 0x19d   : > { %v3595_v44 = vpop.permute.xlu0 %3594  ;;  %v2412_v3 = vsel %vm2408_vm5, %v2379_v4, %v3552_v10  ;;  %v2315_v49 = vsel %vm329_vm1, %v4418_v21, %v3537_v15 }
 0x19e   : > { %v5135_v34 = vpop.permute.xlu1 %3619  ;;  %v3597_v7 = vunpack.i.h.bf16 %v3595_v44  ;;  %v3596_v50 = vunpack.i.l.bf16 %v3595_v44  ;;  %v2411_v51 = vsel %vm2408_vm5, %v2378_v61, %v3551_v29 }
 0x19f   : > { %3874 = vrot.lane.b32.xlu0 %v3858_v17, %s4438_s19 }
 0x1a0   : > { %3899 = vrot.lane.b32.xlu1 %v5115_v14, %s4438_s19  ;;  %v2442_v22 = vsel %vm2441_vm6, %v2409_v5, %v3596_v50  ;;  %v2443_v1 = vsel %vm2441_vm6, %v2410_v18, %v3597_v7  ;;  %v3556_v5 = vunpack.i.l.bf16 %v5104_v12 }
 0x1a1   : > { %v5154_v25 = vpop.permute.xlu0 %3599  ;;  %v2475_v27 = vsel %vm2474_vm7, %v2442_v22, %v3561_v8  ;;  %v2476_v17 = vsel %vm2474_vm7, %v2443_v1, %v3562_v26  ;;  %v1083_v26 = vld [vmem:[#allocation2 + $0x10a] sm:$0xff]  ;;  %v3557_v8 = vunpack.i.h.bf16 %v5104_v12 }
 0x1a2   : > { %v5156_v6 = vpop.permute.xlu1 %3639  ;;  %v2508_v59 = vsel %vm2507_vm8, %v2475_v27, %v3566_v9  ;;  %v2509_v38 = vsel %vm2507_vm8, %v2476_v17, %v3567_v2  ;;  %v2444_v35 = vsel %vm2441_vm6, %v2411_v51, %v3556_v5 }
 0x1a3   : > { %3904 = vrot.lane.b32.xlu0 %v3888_v46, %s4435_s16  ;;  %v2541_v45 = vsel %vm2540_vm9, %v2508_v59, %v3571_v24  ;;  %v2542_v48 = vsel %vm2540_vm9, %v2509_v38, %v3572_v28  ;;  %v2445_v9 = vsel %vm2441_vm6, %v2412_v3, %v3557_v8  ;;  %v5228_v28 = vld [vmem:[#allocation2 + $0x108] sm:$0xff]  ;;  %v5230_v24 = vld [vmem:[#allocation2 + $0x110] sm:$0xff]  ;;  %v1120_v8 = vld [vmem:[#allocation2 + $0x158] sm:$0xff] }
 0x1a4   : > { %3929 = vrot.lane.b32.xlu1 %v5137_v58, %s4435_s16  ;;  %v2573_v32 = vpack.c.bf16 %v2542_v48, %v2541_v45  ;;  %v3536_v45 = vunpack.i.l.bf16 %v5086_v16  ;;  %v3968_v48 = vpack.i.bf16 %v5230_v24, %v5228_v28 }
 0x1a5   : > { %v5175_v53 = vpop.permute.xlu0 %3604 }
 0x1a6   : > { %v5177_v46 = vpop.permute.xlu1 %3644  ;;  %3467 = vmatprep.mubr.msk.bf16.mxu1 %vm2609_vm10, %v2573_v32  ;;  %v2314_v16 = vsel %vm329_vm1, %v4417_v47, %v3536_v45  ;;  %v1184_v47 = vld [vmem:[#allocation2 + $0x15a] sm:$0xff] }
 0x1a7   : > { %3909 = vrot.lane.b32.xlu0 %v5106_v31, %s4437_s18  ;;  %v1052_v31 = vld [vmem:[#allocation2 + $0x111] sm:$0xff]  ;;  %v2347_v19 = vsel %vm2342_vm3, %v2314_v16, %v3541_v33 }
 0x1a8   : > { %3934 = vrot.lane.b32.xlu1 %v5169_v43, %s4437_s18  ;;  %v5204_v44 = vpack.i.bf16 %v1052_v31, %v1051_v37 }
 0x1a9   : > { %v5190_v55 = vpop.permute.xlu0 %3624 }
 0x1aa   : > { %v3655_v56 = vpop.permute.xlu1 %3654 }
 0x1ab   : > { %3914 = vrot.lane.b32.xlu0 %v5115_v14, %s4439_s20  ;;  %v3657_v7 = vunpack.i.h.bf16 %v3655_v56  ;;  %v3656_v50 = vunpack.i.l.bf16 %v3655_v56  ;;  %v1084_v14 = vld [vmem:[#allocation2 + $0x112] sm:$0xff] }
 0x1ac   : > { %3939 = vrot.lane.b32.xlu1 %v5192_v52, %s4439_s20  ;;  %v5218_v62 = vpack.i.bf16 %v1084_v14, %v1083_v26  ;;  %v1119_v14 = vld [vmem:[#allocation2 + $0x150] sm:$0xff] }
 0x1ad   : > { %v5202_v57 = vpop.permute.xlu0 %3629  ;;  %v2478_v40 = vsel %vm2474_vm7, %v2445_v9, %v3657_v7  ;;  %v2477_v12 = vsel %vm2474_vm7, %v2444_v35, %v3656_v50  ;;  %v3627_v7 = vunpack.i.h.bf16 %v5190_v55 }
 0x1ae   : > { %v3660_v63 = vpop.permute.xlu1 %3659 }
 0x1af   : > { %v3662_v18 = vunpack.i.h.bf16 %v3660_v63  ;;  %v3661_v2 = vunpack.i.l.bf16 %v3660_v63  ;;  %3919 = vrot.lane.b32.xlu0 %v5169_v43, %s4432_s9 }
 0x1b0   : > { %3959 = vrot.lane.b32.xlu1 %v5204_v44, %s4432_s9 }
 0x1b1   : > { %v5216_v22 = vpop.permute.xlu0 %3634  ;;  %v2510_v20 = vsel %vm2507_vm8, %v2477_v12, %v3661_v2  ;;  %v2511_v11 = vsel %vm2507_vm8, %v2478_v40, %v3662_v18  ;;  %v3632_v2 = vunpack.i.h.bf16 %v5202_v57  ;;  %v3642_v40 = vunpack.i.h.bf16 %v5156_v6 }
 0x1b2   : > { %v3665_v1 = vpop.permute.xlu1 %3664  ;;  %v3641_v12 = vunpack.i.l.bf16 %v5156_v6 }
 0x1b3   : > { %v3667_v27 = vunpack.i.h.bf16 %v3665_v1  ;;  %v3666_v17 = vunpack.i.l.bf16 %v3665_v1  ;;  %3924 = vrot.lane.b32.xlu0 %v5192_v52, %s4434_s11  ;;  %v2317_v33 = vsel %vm329_vm1, %v4968_v0, %v3642_v40 }
 0x1b4   : > { %3964 = vrot.lane.b32.xlu1 %v5218_v62, %s4434_s11 }
 0x1b5   : > { %v2543_v59 = vsel %vm2540_vm9, %v2510_v20, %v3666_v17  ;;  %v2544_v38 = vsel %vm2540_vm9, %v2511_v11, %v3667_v27  ;;  %v3650_v23 = vpop.permute.xlu0 %3649  ;;  %v5280_v27 = vpack.i.bf16 %v1120_v8, %v1119_v14  ;;  %v3637_v17 = vunpack.i.h.bf16 %v5216_v22 }
 0x1b6   : > { %v5234_v60 = vpop.permute.xlu1 %3689  ;;  %v2574_v41 = vpack.c.bf16 %v2544_v38, %v2543_v59  ;;  %v3652_v56 = vunpack.i.h.bf16 %v3650_v23  ;;  %v3651_v37 = vunpack.i.l.bf16 %v3650_v23  ;;  %v3636_v20 = vunpack.i.l.bf16 %v5216_v22  ;;  %v1151_v59 = vld [vmem:[#allocation2 + $0x151] sm:$0xff]  ;;  %v1152_v38 = vld [vmem:[#allocation2 + $0x159] sm:$0xff] }
 0x1b7   : > { %3944 = vrot.lane.b32.xlu0 %v5137_v58, %s4433_s10  ;;  %v2348_v58 = vsel %vm2342_vm3, %v2315_v49, %v3542_v36  ;;  %v3647_v23 = vunpack.i.h.bf16 %v5177_v46  ;;  %v2316_v36 = vsel %vm329_vm1, %v4978_v30, %v3641_v12  ;;  %v3612_v49 = vunpack.i.h.bf16 %v5120_v54 }
 0x1b8   : > { %3468 = vmatmul.mubr.msk.bf16.vlgmr.msra.gmra.mxu1 %vm2609_vm10, %v2574_v41  ;;  %3969 = vrot.lane.b32.xlu1 %v3968_v48, %s4433_s10  ;;  %v2381_v29 = vsel %vm2375_vm4, %v2348_v58, %v3652_v56  ;;  %v2380_v63 = vsel %vm2375_vm4, %v2347_v19, %v3651_v37  ;;  %v3646_v41 = vunpack.i.l.bf16 %v5177_v46  ;;  %v3611_v30 = vunpack.i.l.bf16 %v5120_v54 }
 0x1b9   : > { %v3670_v32 = vpop.permute.xlu0 %3669  ;;  %v2350_v21 = vsel %vm2342_vm3, %v2317_v33, %v3647_v23  ;;  %v3617_v58 = vunpack.i.h.bf16 %v5128_v42  ;;  %v3616_v54 = vunpack.i.l.bf16 %v5128_v42  ;;  %v3621_v42 = vunpack.i.l.bf16 %v5135_v34 }
 0x1ba   : > { %v5246_v39 = vpop.permute.xlu1 %3694  ;;  %v3672_v31 = vunpack.i.h.bf16 %v3670_v32  ;;  %v3671_v61 = vunpack.i.l.bf16 %v3670_v32  ;;  %v1183_v32 = vld [vmem:[#allocation2 + $0x152] sm:$0xff]  ;;  %v2349_v16 = vsel %vm2342_vm3, %v2316_v36, %v3646_v41  ;;  %v2383_v19 = vsel %vm2375_vm4, %v2350_v21, %v3612_v49 }
 0x1bb   : > { %3949 = vrot.lane.b32.xlu0 %v5169_v43, %s4436_s17  ;;  %v3626_v43 = vunpack.i.l.bf16 %v5190_v55  ;;  %v3631_v55 = vunpack.i.l.bf16 %v5202_v57  ;;  %v5314_v37 = vpack.i.bf16 %v1184_v47, %v1183_v32  ;;  %v3602_v36 = vunpack.i.h.bf16 %v5154_v25 }
 0x1bc   : > { %3974 = vrot.lane.b32.xlu1 %v5204_v44, %s4436_s17  ;;  %v2413_v50 = vsel %vm2408_vm5, %v2380_v63, %v3671_v61  ;;  %v2414_v26 = vsel %vm2408_vm5, %v2381_v29, %v3672_v31  ;;  %v1056_v31 = vld [vmem:[#allocation2 + $0x141] sm:$0xff]  ;;  %v2382_v61 = vsel %vm2375_vm4, %v2349_v16, %v3611_v30  ;;  %v3601_v33 = vunpack.i.l.bf16 %v5154_v25 }
 0x1bd   : > { %v3675_v4 = vpop.permute.xlu0 %3674  ;;  %v3606_v32 = vunpack.i.l.bf16 %v5175_v53  ;;  %v4420_v25 = vld [vmem:[#allocation2 + $0x68] sm:$0xff] }
 0x1be   : > { %v5256_v10 = vpop.permute.xlu1 %3699  ;;  %v3677_v51 = vunpack.i.h.bf16 %v3675_v4  ;;  %v3676_v3 = vunpack.i.l.bf16 %v3675_v4 }
 0x1bf   : > { %3954 = vrot.lane.b32.xlu0 %v5192_v52, %s4438_s19 }
 0x1c0   : > { %v2446_v5 = vsel %vm2441_vm6, %v2413_v50, %v3676_v3  ;;  %v2447_v18 = vsel %vm2441_vm6, %v2414_v26, %v3677_v51  ;;  %3979 = vrot.lane.b32.xlu1 %v5218_v62, %s4438_s19  ;;  %v2415_v51 = vsel %vm2408_vm5, %v2382_v61, %v3616_v54  ;;  %v2416_v3 = vsel %vm2408_vm5, %v2383_v19, %v3617_v58  ;;  %v1087_v50 = vld [vmem:[#allocation2 + $0x13a] sm:$0xff] }
 0x1c1   : > { %v2479_v35 = vsel %vm2474_vm7, %v2446_v5, %v3626_v43  ;;  %v2480_v9 = vsel %vm2474_vm7, %v2447_v18, %v3627_v7  ;;  %v5274_v1 = vpop.permute.xlu0 %3679  ;;  %v3622_v26 = vunpack.i.h.bf16 %v5135_v34  ;;  %v2448_v5 = vsel %vm2441_vm6, %v2415_v51, %v3621_v42 }
 0x1c2   : > { %v5276_v52 = vpop.permute.xlu1 %3719  ;;  %v2512_v57 = vsel %vm2507_vm8, %v2479_v35, %v3631_v55  ;;  %v2513_v11 = vsel %vm2507_vm8, %v2480_v9, %v3632_v2 }
 0x1c3   : > { %3984 = vrot.lane.b32.xlu0 %v3968_v48, %s4435_s16  ;;  %v2545_v22 = vsel %vm2540_vm9, %v2512_v57, %v3636_v20  ;;  %v2546_v45 = vsel %vm2540_vm9, %v2513_v11, %v3637_v17  ;;  %v5297_v48 = vpack.i.bf16 %v1152_v38, %v1151_v59  ;;  %v2449_v18 = vsel %vm2441_vm6, %v2416_v3, %v3622_v26  ;;  %v5348_v57 = vld [vmem:[#allocation2 + $0x138] sm:$0xff]  ;;  %v5350_v11 = vld [vmem:[#allocation2 + $0x140] sm:$0xff]  ;;  %v1124_v26 = vld [vmem:[#allocation2 + $0x188] sm:$0xff] }
 0x1c4   : > { %4009 = vrot.lane.b32.xlu1 %v5280_v27, %s4435_s16  ;;  %v2575_v46 = vpack.c.bf16 %v2546_v45, %v2545_v22  ;;  %v4048_v45 = vpack.i.bf16 %v5350_v11, %v5348_v57 }
 0x1c5   : > { %v5291_v6 = vpop.permute.xlu0 %3684 }
 0x1c6   : > { %v5293_v15 = vpop.permute.xlu1 %3724  ;;  %3471 = vmatprep.mubr.msk.bf16.mxu1 %vm2609_vm10, %v2575_v46  ;;  %v3607_v46 = vunpack.i.h.bf16 %v5175_v53 }
 0x1c7   : > { %3989 = vrot.lane.b32.xlu0 %v5204_v44, %s4437_s18  ;;  %v1055_v44 = vld [vmem:[#allocation2 + $0x139] sm:$0xff] }
 0x1c8   : > { %4014 = vrot.lane.b32.xlu1 %v5297_v48, %s4437_s18  ;;  %v5326_v63 = vpack.i.bf16 %v1056_v31, %v1055_v44  ;;  %v2319_v31 = vsel %vm329_vm1, %v4420_v25, %v3602_v36  ;;  %v3691_v25 = vunpack.i.l.bf16 %v5234_v60 }
 0x1c9   : > { %v5312_v0 = vpop.permute.xlu0 %3704  ;;  %v2352_v61 = vsel %vm2342_vm3, %v2319_v31, %v3607_v46  ;;  %v1008_v46 = vld [vmem:[#allocation2 + $0x80] sm:$0xff] }
 0x1ca   : > { %v3730_v56 = vpop.permute.xlu1 %3729  ;;  %v3707_v3 = vunpack.i.h.bf16 %v5312_v0 }
 0x1cb   : > { %3994 = vrot.lane.b32.xlu0 %v5218_v62, %s4439_s20  ;;  %v3732_v7 = vunpack.i.h.bf16 %v3730_v56  ;;  %v3731_v43 = vunpack.i.l.bf16 %v3730_v56  ;;  %v1088_v62 = vld [vmem:[#allocation2 + $0x142] sm:$0xff] }
 0x1cc   : > { %4019 = vrot.lane.b32.xlu1 %v5314_v37, %s4439_s20  ;;  %v5340_v35 = vpack.i.bf16 %v1088_v62, %v1087_v50  ;;  %v1123_v62 = vld [vmem:[#allocation2 + $0x180] sm:$0xff] }
 0x1cd   : > { %v5324_v4 = vpop.permute.xlu0 %3709  ;;  %v2482_v9 = vsel %vm2474_vm7, %v2449_v18, %v3732_v7  ;;  %v2481_v34 = vsel %vm2474_vm7, %v2448_v5, %v3731_v43  ;;  %v3706_v7 = vunpack.i.l.bf16 %v5312_v0 }
 0x1ce   : > { %v3735_v29 = vpop.permute.xlu1 %3734  ;;  %v3711_v0 = vunpack.i.l.bf16 %v5324_v4 }
 0x1cf   : > { %v3737_v14 = vunpack.i.h.bf16 %v3735_v29  ;;  %v3736_v8 = vunpack.i.l.bf16 %v3735_v29  ;;  %3999 = vrot.lane.b32.xlu0 %v5297_v48, %s4432_s9 }
 0x1d0   : > { %4039 = vrot.lane.b32.xlu1 %v5326_v63, %s4432_s9 }
 0x1d1   : > { %v5338_v2 = vpop.permute.xlu0 %3714  ;;  %v2514_v17 = vsel %vm2507_vm8, %v2481_v34, %v3736_v8  ;;  %v2515_v20 = vsel %vm2507_vm8, %v2482_v9, %v3737_v14  ;;  %v3712_v8 = vunpack.i.h.bf16 %v5324_v4  ;;  %v3722_v9 = vunpack.i.h.bf16 %v5276_v52 }
 0x1d2   : > { %v3740_v55 = vpop.permute.xlu1 %3739  ;;  %v3721_v34 = vunpack.i.l.bf16 %v5276_v52 }
 0x1d3   : > { %v3742_v40 = vunpack.i.h.bf16 %v3740_v55  ;;  %v3741_v12 = vunpack.i.l.bf16 %v3740_v55  ;;  %4004 = vrot.lane.b32.xlu0 %v5314_v37, %s4434_s11 }
 0x1d4   : > { %4044 = vrot.lane.b32.xlu1 %v5340_v35, %s4434_s11 }
 0x1d5   : > { %v2547_v59 = vsel %vm2540_vm9, %v2514_v17, %v3741_v12  ;;  %v2548_v38 = vsel %vm2540_vm9, %v2515_v20, %v3742_v40  ;;  %v3745_v41 = vpop.permute.xlu0 %3744  ;;  %v4078_v40 = vpack.i.bf16 %v1124_v26, %v1123_v62  ;;  %v3717_v12 = vunpack.i.h.bf16 %v5338_v2 }
 0x1d6   : > { %v2576_v23 = vpack.c.bf16 %v2548_v38, %v2547_v59  ;;  %v5356_v22 = vpop.permute.xlu1 %3769  ;;  %v3747_v21 = vunpack.i.h.bf16 %v3745_v41  ;;  %v3746_v49 = vunpack.i.l.bf16 %v3745_v41  ;;  %v3716_v17 = vunpack.i.l.bf16 %v5338_v2  ;;  %v1155_v59 = vld [vmem:[#allocation2 + $0x181] sm:$0xff]  ;;  %v1156_v38 = vld [vmem:[#allocation2 + $0x189] sm:$0xff] }
 0x1d7   : > { %4024 = vrot.lane.b32.xlu0 %v5280_v27, %s4433_s10  ;;  %v4419_v27 = vld [vmem:[#allocation2 + $0x60] sm:$0xff]  ;;  %v3726_v41 = vunpack.i.l.bf16 %v5293_v15 }
 0x1d8   : > { %3472 = vmatmul.mubr.msk.bf16.gmra.mxu1 %vm2609_vm10, %v2576_v23  ;;  %4049 = vrot.lane.b32.xlu1 %v4048_v45, %s4433_s10  ;;  %v2318_v44 = vsel %vm329_vm1, %v4419_v27, %v3601_v33  ;;  %v2385_v54 = vsel %vm2375_vm4, %v2352_v61, %v3747_v21  ;;  %v3727_v23 = vunpack.i.h.bf16 %v5293_v15  ;;  %v1007_v33 = vld [vmem:[#allocation2 + $0x78] sm:$0xff]  ;;  %v2321_v21 = vsel %vm329_vm1, %v1008_v46, %v3722_v9  ;;  %v1187_v15 = vld [vmem:[#allocation2 + $0x182] sm:$0xff] }
 0x1d9   : > { %v3750_v47 = vpop.permute.xlu0 %3749  ;;  %v2351_v53 = vsel %vm2342_vm3, %v2318_v44, %v3606_v32  ;;  %v4083_v32 = vpack.i.bf16 %v1156_v38, %v1155_v59  ;;  %v3692_v44 = vunpack.i.h.bf16 %v5234_v60  ;;  %v3696_v60 = vunpack.i.l.bf16 %v5246_v39  ;;  %v5452_v59 = vld [vmem:[#allocation2 + $0x168] sm:$0xff]  ;;  %v5454_v38 = vld [vmem:[#allocation2 + $0x170] sm:$0xff] }
 0x1da   : > { %v5368_v16 = vpop.permute.xlu1 %3774  ;;  %v3752_v30 = vunpack.i.h.bf16 %v3750_v47  ;;  %v3751_v56 = vunpack.i.l.bf16 %v3750_v47  ;;  %v2320_v47 = vsel %vm329_vm1, %v1007_v33, %v3721_v34  ;;  %v2354_v27 = vsel %vm2342_vm3, %v2321_v21, %v3727_v23 }
 0x1db   : > { %4029 = vrot.lane.b32.xlu0 %v5297_v48, %s4436_s17  ;;  %v2384_v48 = vsel %vm2375_vm4, %v2351_v53, %v3746_v49  ;;  %v3682_v21 = vunpack.i.h.bf16 %v5274_v1 }
 0x1dc   : > { %4054 = vrot.lane.b32.xlu1 %v5326_v63, %s4436_s17  ;;  %v2417_v43 = vsel %vm2408_vm5, %v2384_v48, %v3751_v56  ;;  %v2418_v50 = vsel %vm2408_vm5, %v2385_v54, %v3752_v30  ;;  %v1188_v30 = vld [vmem:[#allocation2 + $0x18a] sm:$0xff]  ;;  %v2353_v56 = vsel %vm2342_vm3, %v2320_v47, %v3726_v41  ;;  %v2387_v48 = vsel %vm2375_vm4, %v2354_v27, %v3692_v44 }
 0x1dd   : > { %v3755_v19 = vpop.permute.xlu0 %3754  ;;  %v5428_v61 = vpack.i.bf16 %v1188_v30, %v1187_v15  ;;  %v2386_v54 = vsel %vm2375_vm4, %v2353_v56, %v3691_v25  ;;  %v4133_v47 = vpack.i.bf16 %v5454_v38, %v5452_v59  ;;  %v3686_v15 = vunpack.i.l.bf16 %v5291_v6  ;;  %v1009_v25 = vld [vmem:[#allocation2 + $0x90] sm:$0xff] }
 0x1de   : > { %v5378_v58 = vpop.permute.xlu1 %3779  ;;  %v3757_v29 = vunpack.i.h.bf16 %v3755_v19  ;;  %v3756_v51 = vunpack.i.l.bf16 %v3755_v19  ;;  %v1060_v19 = vld [vmem:[#allocation2 + $0x171] sm:$0xff] }
 0x1df   : > { %4034 = vrot.lane.b32.xlu0 %v5314_v37, %s4438_s19 }
 0x1e0   : > { %v2450_v42 = vsel %vm2441_vm6, %v2417_v43, %v3756_v51  ;;  %v2451_v14 = vsel %vm2441_vm6, %v2418_v50, %v3757_v29  ;;  %4059 = vrot.lane.b32.xlu1 %v5340_v35, %s4438_s19  ;;  %v3697_v29 = vunpack.i.h.bf16 %v5246_v39  ;;  %v2419_v43 = vsel %vm2408_vm5, %v2386_v54, %v3696_v60 }
 0x1e1   : > { %v2483_v5 = vsel %vm2474_vm7, %v2450_v42, %v3706_v7  ;;  %v2484_v18 = vsel %vm2474_vm7, %v2451_v14, %v3707_v3  ;;  %v5396_v55 = vpop.permute.xlu0 %3759  ;;  %v1091_v42 = vld [vmem:[#allocation2 + $0x16a] sm:$0xff]  ;;  %v1092_v14 = vld [vmem:[#allocation2 + $0x172] sm:$0xff] }
 0x1e2   : > { %v5398_v37 = vpop.permute.xlu1 %3799  ;;  %v2516_v4 = vsel %vm2507_vm8, %v2483_v5, %v3711_v0  ;;  %v2517_v20 = vsel %vm2507_vm8, %v2484_v18, %v3712_v8  ;;  %v2420_v50 = vsel %vm2408_vm5, %v2387_v48, %v3697_v29  ;;  %v3701_v8 = vunpack.i.l.bf16 %v5256_v10 }
 0x1e3   : > { %4064 = vrot.lane.b32.xlu0 %v4048_v45, %s4435_s16  ;;  %v2549_v2 = vsel %vm2540_vm9, %v2516_v4, %v3716_v17  ;;  %v2550_v45 = vsel %vm2540_vm9, %v2517_v20, %v3717_v12  ;;  %v4108_v12 = vpack.i.bf16 %v1092_v14, %v1091_v42 }
 0x1e4   : > { %4079 = vrot.lane.b32.xlu1 %v4078_v40, %s4435_s16  ;;  %v2577_v49 = vpack.c.bf16 %v2550_v45, %v2549_v2  ;;  %v2452_v5 = vsel %vm2441_vm6, %v2419_v43, %v3701_v8  ;;  %v1253_v43 = vld [vmem:[#allocation2 + $0x1a1] sm:$0xff] }
 0x1e5   : > { %v5410_v52 = vpop.permute.xlu0 %3764 }
 0x1e6   : > { %v5412_v36 = vpop.permute.xlu1 %3804  ;;  %3475 = vmatprep.mubr.msk.bf16.mxu1 %vm2609_vm10, %v2577_v49  ;;  %v3687_v49 = vunpack.i.h.bf16 %v5291_v6 }
 0x1e7   : > { %4069 = vrot.lane.b32.xlu0 %v5326_v63, %s4437_s18  ;;  %v1059_v63 = vld [vmem:[#allocation2 + $0x169] sm:$0xff] }
 0x1e8   : > { %4084 = vrot.lane.b32.xlu1 %v4083_v32, %s4437_s18  ;;  %v4103_v7 = vpack.i.bf16 %v1060_v19, %v1059_v63 }
 0x1e9   : > { %v5426_v31 = vpop.permute.xlu0 %3784 }
 0x1ea   : > { %v3810_v53 = vpop.permute.xlu1 %3809  ;;  %v3787_v14 = vunpack.i.h.bf16 %v5426_v31 }
 0x1eb   : > { %4074 = vrot.lane.b32.xlu0 %v5340_v35, %s4439_s20  ;;  %v3812_v62 = vunpack.i.h.bf16 %v3810_v53  ;;  %v3811_v26 = vunpack.i.l.bf16 %v3810_v53  ;;  %v3702_v35 = vunpack.i.h.bf16 %v5256_v10  ;;  %v1010_v53 = vld [vmem:[#allocation2 + $0x98] sm:$0xff] }
 0x1ec   : > { %4089 = vrot.lane.b32.xlu1 %v5428_v61, %s4439_s20 }
 0x1ed   : > { %v5438_v51 = vpop.permute.xlu0 %3789  ;;  %v2453_v18 = vsel %vm2441_vm6, %v2420_v50, %v3702_v35  ;;  %v2485_v4 = vsel %vm2474_vm7, %v2452_v5, %v3811_v26  ;;  %v3786_v35 = vunpack.i.l.bf16 %v5426_v31 }
 0x1ee   : > { %v3815_v3 = vpop.permute.xlu1 %3814  ;;  %v2486_v17 = vsel %vm2474_vm7, %v2453_v18, %v3812_v62  ;;  %v3792_v18 = vunpack.i.h.bf16 %v5438_v51 }
 0x1ef   : > { %v3817_v39 = vunpack.i.h.bf16 %v3815_v3  ;;  %v3816_v0 = vunpack.i.l.bf16 %v3815_v3  ;;  %4094 = vrot.lane.b32.xlu0 %v4078_v40, %s4433_s10  ;;  %v1252_v3 = vld [vmem:[#allocation2 + $0x199] sm:$0xff] }
 0x1f0   : > { %4104 = vrot.lane.b32.xlu1 %v4103_v7, %s4432_s9  ;;  %v4128_v5 = vpack.i.bf16 %v1253_v43, %v1252_v3 }
 0x1f1   : > { %v5448_v9 = vpop.permute.xlu0 %3794  ;;  %v2518_v40 = vsel %vm2507_vm8, %v2485_v4, %v3816_v0  ;;  %v2519_v23 = vsel %vm2507_vm8, %v2486_v17, %v3817_v39 }
 0x1f2   : > { %v3820_v34 = vpop.permute.xlu1 %3819 }
 0x1f3   : > { %v3822_v20 = vunpack.i.h.bf16 %v3820_v34  ;;  %v3821_v10 = vunpack.i.l.bf16 %v3820_v34  ;;  %4099 = vrot.lane.b32.xlu0 %v4083_v32, %s4436_s17  ;;  %v3681_v32 = vunpack.i.l.bf16 %v5274_v1  ;;  %v2323_v1 = vsel %vm329_vm1, %v1010_v53, %v3682_v21 }
 0x1f4   : > { %4109 = vrot.lane.b32.xlu1 %v4108_v12, %s4434_s11  ;;  %v2356_v6 = vsel %vm2342_vm3, %v2323_v1, %v3687_v49  ;;  %v3791_v34 = vunpack.i.l.bf16 %v5438_v51  ;;  %v3772_v53 = vunpack.i.h.bf16 %v5356_v22 }
 0x1f5   : > { %v2551_v41 = vsel %vm2540_vm9, %v2518_v40, %v3821_v10  ;;  %v2552_v2 = vsel %vm2540_vm9, %v2519_v23, %v3822_v20  ;;  %v3825_v33 = vpop.permute.xlu0 %3824  ;;  %v2322_v54 = vsel %vm329_vm1, %v1009_v25, %v3681_v32  ;;  %v1284_v10 = vld [vmem:[#allocation2 + $0x19a] sm:$0xff]  ;;  %v1285_v40 = vld [vmem:[#allocation2 + $0x1a2] sm:$0xff]  ;;  %v3802_v23 = vunpack.i.h.bf16 %v5398_v37 }
 0x1f6   : > { %v2578_v45 = vpack.c.bf16 %v2552_v2, %v2551_v41  ;;  %v5462_v46 = vpop.permute.xlu1 %3849  ;;  %v3827_v27 = vunpack.i.h.bf16 %v3825_v33  ;;  %v3826_v44 = vunpack.i.l.bf16 %v3825_v33  ;;  %v2355_v48 = vsel %vm2342_vm3, %v2322_v54, %v3686_v15  ;;  %v1012_v15 = vld [vmem:[#allocation2 + $0xb0] sm:$0xff] }
 0x1f7   : > { %4134 = vrot.lane.b32.xlu0 %v4133_v47, %s4435_s16  ;;  %v3801_v41 = vunpack.i.l.bf16 %v5398_v37  ;;  %v3796_v2 = vunpack.i.l.bf16 %v5448_v9  ;;  %v3807_v33 = vunpack.i.h.bf16 %v5412_v36  ;;  %v4153_v21 = vpack.i.bf16 %v1285_v40, %v1284_v10 }
 0x1f8   : > { %3476 = vmatmul.mubr.msk.bf16.gmra.mxu1 %vm2609_vm10, %v2578_v45  ;;  %4114 = vrot.lane.b32.xlu1 %v4133_v47, %s4433_s10  ;;  %v2389_v50 = vsel %vm2375_vm4, %v2356_v6, %v3827_v27  ;;  %v2388_v62 = vsel %vm2375_vm4, %v2355_v48, %v3826_v44  ;;  %v3806_v47 = vunpack.i.l.bf16 %v5412_v36  ;;  %v2325_v27 = vsel %vm329_vm1, %v1012_v15, %v3802_v23  ;;  %v1014_v15 = vld [vmem:[#allocation2 + $0xc8] sm:$0xff] }
 0x1f9   : > { %v3830_v30 = vpop.permute.xlu0 %3829  ;;  %v2358_v25 = vsel %vm2342_vm3, %v2325_v27, %v3807_v33  ;;  %v3777_v6 = vunpack.i.h.bf16 %v5368_v16  ;;  %v3766_v33 = vunpack.i.l.bf16 %v5410_v52 }
 0x1fa   : > { %v5473_v56 = vpop.permute.xlu1 %3854  ;;  %v3832_v63 = vunpack.i.h.bf16 %v3830_v30  ;;  %v3831_v19 = vunpack.i.l.bf16 %v3830_v30  ;;  %v2391_v48 = vsel %vm2375_vm4, %v2358_v25, %v3772_v53 }
 0x1fb   : > { %4139 = vrot.lane.b32.xlu0 %v4103_v7, %s4437_s18 }
 0x1fc   : > { %4119 = vrot.lane.b32.xlu1 %v4103_v7, %s4436_s17  ;;  %v2421_v7 = vsel %vm2408_vm5, %v2388_v62, %v3831_v19  ;;  %v2422_v8 = vsel %vm2408_vm5, %v2389_v50, %v3832_v63  ;;  %v3771_v63 = vunpack.i.l.bf16 %v5356_v22  ;;  %v2424_v22 = vsel %vm2408_vm5, %v2391_v48, %v3777_v6 }
 0x1fd   : > { %v3835_v29 = vpop.permute.xlu0 %3834 }
 0x1fe   : > { %v5481_v60 = vpop.permute.xlu1 %3859  ;;  %v3837_v26 = vunpack.i.h.bf16 %v3835_v29  ;;  %v3836_v42 = vunpack.i.l.bf16 %v3835_v29  ;;  %v3776_v29 = vunpack.i.l.bf16 %v5368_v16 }
 0x1ff   : > { %4144 = vrot.lane.b32.xlu0 %v4108_v12, %s4439_s20 }
 0x200   : > { %v2454_v39 = vsel %vm2441_vm6, %v2421_v7, %v3836_v42  ;;  %v2455_v0 = vsel %vm2441_vm6, %v2422_v8, %v3837_v26  ;;  %4124 = vrot.lane.b32.xlu1 %v4108_v12, %s4438_s19  ;;  %v3797_v12 = vunpack.i.h.bf16 %v5448_v9  ;;  %v3782_v42 = vunpack.i.h.bf16 %v5378_v58 }
 0x201   : > { %v2487_v17 = vsel %vm2474_vm7, %v2454_v39, %v3786_v35  ;;  %v2488_v31 = vsel %vm2474_vm7, %v2455_v0, %v3787_v14  ;;  %v5497_v4 = vpop.permute.xlu0 %3839  ;;  %v3781_v14 = vunpack.i.l.bf16 %v5378_v58 }
 0x202   : > { %v5499_v20 = vpop.permute.xlu1 %3879  ;;  %v2520_v51 = vsel %vm2507_vm8, %v2487_v17, %v3791_v34  ;;  %v2521_v45 = vsel %vm2507_vm8, %v2488_v31, %v3792_v18  ;;  %v2457_v39 = vsel %vm2441_vm6, %v2424_v22, %v3782_v42 }
 0x203   : > { %4149 = vrot.lane.b32.xlu0 %v5428_v61, %s4438_s19  ;;  %v2553_v9 = vsel %vm2540_vm9, %v2520_v51, %v3796_v2  ;;  %v2554_v49 = vsel %vm2540_vm9, %v2521_v45, %v3797_v12  ;;  %v1011_v61 = vld [vmem:[#allocation2 + $0xa8] sm:$0xff]  ;;  %v3762_v2 = vunpack.i.h.bf16 %v5396_v55  ;;  %v3761_v51 = vunpack.i.l.bf16 %v5396_v55 }
 0x204   : > { %4129 = vrot.lane.b32.xlu1 %v4128_v5, %s4436_s17  ;;  %v2324_v30 = vsel %vm329_vm1, %v1011_v61, %v3801_v41  ;;  %v2579_v44 = vpack.c.bf16 %v2554_v49, %v2553_v9  ;;  %v3767_v45 = vunpack.i.h.bf16 %v5410_v52  ;;  %v1013_v61 = vld [vmem:[#allocation2 + $0xc0] sm:$0xff] }
 0x205   : > { %v5512_v32 = vpop.permute.xlu0 %3844  ;;  %v2357_v36 = vsel %vm2342_vm3, %v2324_v30, %v3806_v47 }
 0x206   : > { %v5514_v37 = vpop.permute.xlu1 %3884  ;;  %3479 = vmatprep.mubr.msk.bf16.mxu1 %vm2609_vm10, %v2579_v44  ;;  %v2390_v1 = vsel %vm2375_vm4, %v2357_v36, %v3771_v63  ;;  %v2326_v44 = vsel %vm329_vm1, %v1013_v61, %v3761_v51  ;;  %v2327_v36 = vsel %vm329_vm1, %v1014_v15, %v3762_v2  ;;  %v3857_v15 = vunpack.i.h.bf16 %v5473_v56 }
 0x207   : > { %v2423_v50 = vsel %vm2408_vm5, %v2390_v1, %v3776_v29  ;;  %v2359_v25 = vsel %vm2342_vm3, %v2326_v44, %v3766_v33  ;;  %v2360_v55 = vsel %vm2342_vm3, %v2327_v36, %v3767_v45  ;;  %v3852_v33 = vunpack.i.h.bf16 %v5462_v46 }
 0x208   : > { %4154 = vrot.lane.b32.xlu1 %v4153_v21, %s4438_s19  ;;  %v2456_v8 = vsel %vm2441_vm6, %v2423_v50, %v3781_v14 }
 0x209   : > { %v5526_v19 = vpop.permute.xlu0 %3864 }
 0x20a   : > { %v3890_v54 = vpop.permute.xlu1 %3889  ;;  %v3867_v6 = vunpack.i.h.bf16 %v5526_v19  ;;  %v3866_v29 = vunpack.i.l.bf16 %v5526_v19 }
 0x20b   : > { %v3892_v62 = vunpack.i.h.bf16 %v3890_v54  ;;  %v3891_v26 = vunpack.i.l.bf16 %v3890_v54 }
 0x20d   : > { %v5532_v3 = vpop.permute.xlu0 %3869  ;;  %v2490_v5 = vsel %vm2474_vm7, %v2457_v39, %v3892_v62  ;;  %v2489_v18 = vsel %vm2474_vm7, %v2456_v8, %v3891_v26 }
 0x20e   : > { %v3895_v43 = vpop.permute.xlu1 %3894  ;;  %v3872_v26 = vunpack.i.h.bf16 %v5532_v3  ;;  %v3871_v42 = vunpack.i.l.bf16 %v5532_v3  ;;  %v3887_v3 = vunpack.i.h.bf16 %v5514_v37 }
 0x20f   : > { %v3897_v35 = vunpack.i.h.bf16 %v3895_v43  ;;  %v3896_v7 = vunpack.i.l.bf16 %v3895_v43 }
 0x211   : > { %v3875_v16 = vpop.permute.xlu0 %3874  ;;  %v2522_v31 = vsel %vm2507_vm8, %v2489_v18, %v3896_v7  ;;  %v2523_v10 = vsel %vm2507_vm8, %v2490_v5, %v3897_v35  ;;  %v3882_v18 = vunpack.i.h.bf16 %v5499_v20 }
 0x212   : > { %v3900_v0 = vpop.permute.xlu1 %3899  ;;  %v3877_v19 = vunpack.i.h.bf16 %v3875_v16  ;;  %v3876_v39 = vunpack.i.l.bf16 %v3875_v16 }
 0x213   : > { %v3902_v34 = vunpack.i.h.bf16 %v3900_v0  ;;  %v3901_v17 = vunpack.i.l.bf16 %v3900_v0 }
 0x215   : > { %v2555_v58 = vsel %vm2540_vm9, %v2522_v31, %v3901_v17  ;;  %v2556_v40 = vsel %vm2540_vm9, %v2523_v10, %v3902_v34  ;;  %v3905_v41 = vpop.permute.xlu0 %3904  ;;  %v3881_v34 = vunpack.i.l.bf16 %v5499_v20  ;;  %v3886_v17 = vunpack.i.l.bf16 %v5514_v37 }
 0x216   : > { %v2580_v23 = vpack.c.bf16 %v2556_v40, %v2555_v58  ;;  %v5546_v12 = vpop.permute.xlu1 %3929  ;;  %v3907_v9 = vunpack.i.h.bf16 %v3905_v41  ;;  %v3906_v49 = vunpack.i.l.bf16 %v3905_v41  ;;  %v1015_v40 = vld [vmem:[#allocation2 + $0xd8] sm:$0xff] }
 0x217   : > { %v2328_v2 = vsel %vm329_vm1, %v1015_v40, %v3881_v34  ;;  %v3846_v34 = vunpack.i.l.bf16 %v5512_v32  ;;  %v1017_v40 = vld [vmem:[#allocation2 + $0xf0] sm:$0xff] }
 0x218   : > { %3480 = vmatmul.mubr.msk.bf16.gmra.mxu1 %vm2609_vm10, %v2580_v23  ;;  %v2393_v52 = vsel %vm2375_vm4, %v2360_v55, %v3907_v9  ;;  %v2392_v54 = vsel %vm2375_vm4, %v2359_v25, %v3906_v49  ;;  %v1016_v23 = vld [vmem:[#allocation2 + $0xe0] sm:$0xff]  ;;  %v2361_v20 = vsel %vm2342_vm3, %v2328_v2, %v3886_v17 }
 0x219   : > { %v3910_v47 = vpop.permute.xlu0 %3909  ;;  %v2329_v51 = vsel %vm329_vm1, %v1016_v23, %v3882_v18  ;;  %v3847_v18 = vunpack.i.h.bf16 %v5512_v32  ;;  %v1018_v23 = vld [vmem:[#allocation2 + $0xf8] sm:$0xff] }
 0x21a   : > { %v5553_v21 = vpop.permute.xlu1 %3934  ;;  %v3912_v30 = vunpack.i.h.bf16 %v3910_v47  ;;  %v3911_v27 = vunpack.i.l.bf16 %v3910_v47  ;;  %v2362_v45 = vsel %vm2342_vm3, %v2329_v51, %v3887_v3  ;;  %v3851_v47 = vunpack.i.l.bf16 %v5462_v46 }
 0x21b   : > { %v2395_v61 = vsel %vm2375_vm4, %v2362_v45, %v3852_v33  ;;  %v3862_v46 = vunpack.i.h.bf16 %v5481_v60 }
 0x21c   : > { %v2425_v43 = vsel %vm2408_vm5, %v2392_v54, %v3911_v27  ;;  %v2426_v50 = vsel %vm2408_vm5, %v2393_v52, %v3912_v30  ;;  %v2394_v49 = vsel %vm2375_vm4, %v2361_v20, %v3851_v47  ;;  %v3856_v30 = vunpack.i.l.bf16 %v5473_v56 }
 0x21d   : > { %v3915_v53 = vpop.permute.xlu0 %3914  ;;  %v2428_v25 = vsel %vm2408_vm5, %v2395_v61, %v3857_v15  ;;  %v3861_v52 = vunpack.i.l.bf16 %v5481_v60 }
 0x21e   : > { %v5559_v63 = vpop.permute.xlu1 %3939  ;;  %v3917_v1 = vunpack.i.h.bf16 %v3915_v53  ;;  %v3916_v48 = vunpack.i.l.bf16 %v3915_v53  ;;  %v2427_v36 = vsel %vm2408_vm5, %v2394_v49, %v3856_v30  ;;  %v2461_v56 = vsel %vm2441_vm6, %v2428_v25, %v3862_v46 }
 0x220   : > { %v2458_v22 = vsel %vm2441_vm6, %v2425_v43, %v3916_v48  ;;  %v2459_v62 = vsel %vm2441_vm6, %v2426_v50, %v3917_v1 }
 0x221   : > { %v2491_v14 = vsel %vm2474_vm7, %v2458_v22, %v3866_v29  ;;  %v2492_v35 = vsel %vm2474_vm7, %v2459_v62, %v3867_v6  ;;  %v5573_v7 = vpop.permute.xlu0 %3919  ;;  %v2460_v6 = vsel %vm2441_vm6, %v2427_v36, %v3861_v52 }
 0x222   : > { %v5575_v8 = vpop.permute.xlu1 %3959  ;;  %v2524_v0 = vsel %vm2507_vm8, %v2491_v14, %v3871_v42  ;;  %v2525_v5 = vsel %vm2507_vm8, %v2492_v35, %v3872_v26 }
 0x223   : > { %v2557_v58 = vsel %vm2540_vm9, %v2524_v0, %v3876_v39  ;;  %v2558_v16 = vsel %vm2540_vm9, %v2525_v5, %v3877_v19  ;;  %v3842_v0 = vunpack.i.h.bf16 %v5497_v4  ;;  %v3841_v5 = vunpack.i.l.bf16 %v5497_v4 }
 0x224   : > { %v2581_v41 = vpack.c.bf16 %v2558_v16, %v2557_v58 }
 0x225   : > { %v5583_v31 = vpop.permute.xlu0 %3924  ;;  %v2330_v51 = vsel %vm329_vm1, %v1017_v40, %v3841_v5  ;;  %v2331_v20 = vsel %vm329_vm1, %v1018_v23, %v3842_v0 }
 0x226   : > { %v5585_v10 = vpop.permute.xlu1 %3964  ;;  %3483 = vmatprep.mubr.msk.bf16.mxu1 %vm2609_vm10, %v2581_v41  ;;  %v2363_v4 = vsel %vm2342_vm3, %v2330_v51, %v3846_v34  ;;  %v2364_v45 = vsel %vm2342_vm3, %v2331_v20, %v3847_v18  ;;  %v3931_v18 = vunpack.i.l.bf16 %v5546_v12  ;;  %v3941_v20 = vunpack.i.l.bf16 %v5559_v63 }
 0x229   : > { %v5594_v37 = vpop.permute.xlu0 %3944 }
 0x22a   : > { %v3970_v9 = vpop.permute.xlu1 %3969  ;;  %v3947_v15 = vunpack.i.h.bf16 %v5594_v37  ;;  %v3946_v30 = vunpack.i.l.bf16 %v5594_v37 }
 0x22b   : > { %v3972_v55 = vunpack.i.h.bf16 %v3970_v9  ;;  %v3971_v53 = vunpack.i.l.bf16 %v3970_v9 }
 0x22d   : > { %v5602_v27 = vpop.permute.xlu0 %3949  ;;  %v2494_v43 = vsel %vm2474_vm7, %v2461_v56, %v3972_v55  ;;  %v2493_v50 = vsel %vm2474_vm7, %v2460_v6, %v3971_v53 }
 0x22e   : > { %v3975_v44 = vpop.permute.xlu1 %3974  ;;  %v3952_v25 = vunpack.i.h.bf16 %v5602_v27  ;;  %v3951_v55 = vunpack.i.l.bf16 %v5602_v27 }
 0x22f   : > { %v3977_v54 = vunpack.i.h.bf16 %v3975_v44  ;;  %v3976_v1 = vunpack.i.l.bf16 %v3975_v44 }
 0x231   : > { %v3955_v48 = vpop.permute.xlu0 %3954  ;;  %v2526_v26 = vsel %vm2507_vm8, %v2493_v50, %v3976_v1  ;;  %v2527_v42 = vsel %vm2507_vm8, %v2494_v43, %v3977_v54 }
 0x232   : > { %v3980_v29 = vpop.permute.xlu1 %3979  ;;  %v3957_v52 = vunpack.i.h.bf16 %v3955_v48  ;;  %v3956_v54 = vunpack.i.l.bf16 %v3955_v48  ;;  %v3961_v48 = vunpack.i.l.bf16 %v5575_v8 }
 0x233   : > { %v3982_v22 = vunpack.i.h.bf16 %v3980_v29  ;;  %v3981_v62 = vunpack.i.l.bf16 %v3980_v29 }
 0x235   : > { %v2559_v60 = vsel %vm2540_vm9, %v2526_v26, %v3981_v62  ;;  %v2560_v14 = vsel %vm2540_vm9, %v2527_v42, %v3982_v22  ;;  %v3985_v35 = vpop.permute.xlu0 %3984  ;;  %v3962_v22 = vunpack.i.h.bf16 %v5575_v8  ;;  %v3967_v26 = vunpack.i.h.bf16 %v5585_v10 }
 0x236   : > { %v2582_v19 = vpack.c.bf16 %v2560_v14, %v2559_v60  ;;  %v5616_v39 = vpop.permute.xlu1 %4009  ;;  %v3987_v17 = vunpack.i.h.bf16 %v3985_v35  ;;  %v3986_v58 = vunpack.i.l.bf16 %v3985_v35  ;;  %v3966_v42 = vunpack.i.l.bf16 %v5585_v10 }
 0x237   : > { %v2332_v35 = vsel %vm329_vm1, %v5228_v28, %v3961_v48  ;;  %v3932_v10 = vunpack.i.h.bf16 %v5546_v12  ;;  %v3937_v28 = vunpack.i.h.bf16 %v5553_v21  ;;  %v3942_v12 = vunpack.i.h.bf16 %v5559_v63 }
 0x238   : > { %3484 = vmatmul.mubr.msk.bf16.gmra.mxu1 %vm2609_vm10, %v2582_v19  ;;  %v2397_v32 = vsel %vm2375_vm4, %v2364_v45, %v3987_v17  ;;  %v2396_v47 = vsel %vm2375_vm4, %v2363_v4, %v3986_v58  ;;  %v2333_v19 = vsel %vm329_vm1, %v5230_v24, %v3962_v22  ;;  %v2365_v0 = vsel %vm2342_vm3, %v2332_v35, %v3966_v42  ;;  %v1022_v22 = vld [vmem:[#allocation2 + $0x128] sm:$0xff] }
 0x239   : > { %v3990_v3 = vpop.permute.xlu0 %3989  ;;  %v2366_v8 = vsel %vm2342_vm3, %v2333_v19, %v3967_v26  ;;  %v3936_v58 = vunpack.i.l.bf16 %v5553_v21 }
 0x23a   : > { %v5623_v16 = vpop.permute.xlu1 %4014  ;;  %v3992_v41 = vunpack.i.h.bf16 %v3990_v3  ;;  %v3991_v2 = vunpack.i.l.bf16 %v3990_v3  ;;  %v2398_v3 = vsel %vm2375_vm4, %v2365_v0, %v3931_v18  ;;  %v2399_v17 = vsel %vm2375_vm4, %v2366_v8, %v3932_v10 }
 0x23b   : > { %v2431_v23 = vsel %vm2408_vm5, %v2398_v3, %v3936_v58 }
 0x23c   : > { %v2429_v44 = vsel %vm2408_vm5, %v2396_v47, %v3991_v2  ;;  %v2430_v36 = vsel %vm2408_vm5, %v2397_v32, %v3992_v41  ;;  %v2432_v41 = vsel %vm2408_vm5, %v2399_v17, %v3937_v28  ;;  %v2464_v32 = vsel %vm2441_vm6, %v2431_v23, %v3941_v20 }
 0x23d   : > { %v3995_v33 = vpop.permute.xlu0 %3994  ;;  %v2465_v21 = vsel %vm2441_vm6, %v2432_v41, %v3942_v12 }
 0x23e   : > { %v3997_v9 = vunpack.i.h.bf16 %v3995_v33  ;;  %v3996_v49 = vunpack.i.l.bf16 %v3995_v33  ;;  %v5631_v61 = vpop.permute.xlu1 %4019 }
 0x240   : > { %v2462_v53 = vsel %vm2441_vm6, %v2429_v44, %v3996_v49  ;;  %v2463_v46 = vsel %vm2441_vm6, %v2430_v36, %v3997_v9 }
 0x241   : > { %v2495_v1 = vsel %vm2474_vm7, %v2462_v53, %v3946_v30  ;;  %v2496_v6 = vsel %vm2474_vm7, %v2463_v46, %v3947_v15  ;;  %v5643_v56 = vpop.permute.xlu0 %3999 }
 0x242   : > { %v5645_v37 = vpop.permute.xlu1 %4039  ;;  %v2528_v29 = vsel %vm2507_vm8, %v2495_v1, %v3951_v55  ;;  %v2529_v43 = vsel %vm2507_vm8, %v2496_v6, %v3952_v25  ;;  %v3927_v1 = vunpack.i.h.bf16 %v5583_v31  ;;  %v3926_v6 = vunpack.i.l.bf16 %v5583_v31 }
 0x243   : > { %v2561_v27 = vsel %vm2540_vm9, %v2528_v29, %v3956_v54  ;;  %v2562_v50 = vsel %vm2540_vm9, %v2529_v43, %v3957_v52  ;;  %v3922_v52 = vunpack.i.h.bf16 %v5573_v7  ;;  %v3921_v54 = vunpack.i.l.bf16 %v5573_v7 }
 0x244   : > { %v2583_v62 = vpack.c.bf16 %v2562_v50, %v2561_v27  ;;  %v4042_v29 = vunpack.i.h.bf16 %v5645_v37  ;;  %v4041_v43 = vunpack.i.l.bf16 %v5645_v37  ;;  %v1021_v50 = vld [vmem:[#allocation2 + $0x120] sm:$0xff] }
 0x245   : > { %v5655_v60 = vpop.permute.xlu0 %4004  ;;  %v2334_v42 = vsel %vm329_vm1, %v1021_v50, %v3921_v54  ;;  %v2335_v7 = vsel %vm329_vm1, %v1022_v22, %v3922_v52  ;;  %v3531_v22 = vunpack.i.l.bf16 %v5078_v13 }
 0x246   : > { %v5657_v14 = vpop.permute.xlu1 %4044  ;;  %3487 = vmatprep.mubr.msk.bf16.mxu1 %vm2609_vm10, %v2583_v62  ;;  %v2367_v31 = vsel %vm2342_vm3, %v2334_v42, %v3926_v6  ;;  %v2368_v0 = vsel %vm2342_vm3, %v2335_v7, %v3927_v1  ;;  %v2336_v37 = vsel %vm329_vm1, %v5348_v57, %v4041_v43  ;;  %v2337_v8 = vsel %vm329_vm1, %v5350_v11, %v4042_v29  ;;  %v4421_v7 = vld [vmem:[#allocation2 + $0x150] sm:$0xff] }
 0x247   : > { %v4047_v10 = vunpack.i.h.bf16 %v5657_v14  ;;  %v4046_v18 = vunpack.i.l.bf16 %v5657_v14  ;;  %v4006_v6 = vunpack.i.l.bf16 %v5655_v60  ;;  %v4021_v42 = vunpack.i.l.bf16 %v5631_v61 }
 0x249   : > { %v5666_v5 = vpop.permute.xlu0 %4024 }
 0x24a   : > { %v4050_v34 = vpop.permute.xlu1 %4049  ;;  %v4027_v23 = vunpack.i.h.bf16 %v5666_v5  ;;  %v4026_v57 = vunpack.i.l.bf16 %v5666_v5 }
 0x24b   : > { %v4052_v2 = vunpack.i.h.bf16 %v4050_v34  ;;  %v4051_v51 = vunpack.i.l.bf16 %v4050_v34 }
 0x24d   : > { %v5674_v24 = vpop.permute.xlu0 %4029  ;;  %v2498_v9 = vsel %vm2474_vm7, %v2465_v21, %v4052_v2  ;;  %v2497_v49 = vsel %vm2474_vm7, %v2464_v32, %v4051_v51  ;;  %v2369_v21 = vsel %vm2342_vm3, %v2336_v37, %v4046_v18 }
 0x24e   : > { %v4055_v40 = vpop.permute.xlu1 %4054  ;;  %v4032_v2 = vunpack.i.h.bf16 %v5674_v24  ;;  %v4031_v14 = vunpack.i.l.bf16 %v5674_v24 }
 0x24f   : > { %v4057_v4 = vunpack.i.h.bf16 %v4055_v40  ;;  %v4056_v45 = vunpack.i.l.bf16 %v4055_v40 }
 0x251   : > { %v5680_v33 = vpop.permute.xlu0 %4034  ;;  %v2530_v44 = vsel %vm2507_vm8, %v2497_v49, %v4056_v45  ;;  %v2531_v36 = vsel %vm2507_vm8, %v2498_v9, %v4057_v4 }
 0x252   : > { %v4060_v47 = vpop.permute.xlu1 %4059  ;;  %v4037_v20 = vunpack.i.h.bf16 %v5680_v33  ;;  %v4036_v4 = vunpack.i.l.bf16 %v5680_v33 }
 0x253   : > { %v4062_v15 = vunpack.i.h.bf16 %v4060_v47  ;;  %v4061_v30 = vunpack.i.l.bf16 %v4060_v47  ;;  %v2370_v47 = vsel %vm2342_vm3, %v2337_v8, %v4047_v10 }
 0x255   : > { %v2563_v63 = vsel %vm2540_vm9, %v2530_v44, %v4061_v30  ;;  %v2564_v25 = vsel %vm2540_vm9, %v2531_v36, %v4062_v15  ;;  %v4065_v55 = vpop.permute.xlu0 %4064  ;;  %v4012_v15 = vunpack.i.h.bf16 %v5616_v39  ;;  %v4011_v30 = vunpack.i.l.bf16 %v5616_v39 }
 0x256   : > { %v2584_v53 = vpack.c.bf16 %v2564_v25, %v2563_v63  ;;  %v5690_v46 = vpop.permute.xlu1 %4079  ;;  %v4067_v48 = vunpack.i.h.bf16 %v4065_v55  ;;  %v4066_v62 = vunpack.i.l.bf16 %v4065_v55  ;;  %v4017_v36 = vunpack.i.h.bf16 %v5623_v16 }
 0x257   : > { %v4016_v63 = vunpack.i.l.bf16 %v5623_v16  ;;  %v4002_v55 = vunpack.i.h.bf16 %v5643_v56  ;;  %v2402_v52 = vsel %vm2375_vm4, %v2369_v21, %v4011_v30  ;;  %v2403_v54 = vsel %vm2375_vm4, %v2370_v47, %v4012_v15 }
 0x258   : > { %3488 = vmatmul.mubr.msk.bf16.gmra.mxu1 %vm2609_vm10, %v2584_v53  ;;  %v2401_v3 = vsel %vm2375_vm4, %v2368_v0, %v4067_v48  ;;  %v2400_v17 = vsel %vm2375_vm4, %v2367_v31, %v4066_v62  ;;  %v4001_v53 = vunpack.i.l.bf16 %v5643_v56  ;;  %v4007_v39 = vunpack.i.h.bf16 %v5655_v60 }
 0x259   : > { %v4070_v27 = vpop.permute.xlu0 %4069  ;;  %v2435_v56 = vsel %vm2408_vm5, %v2402_v52, %v4016_v63  ;;  %v2436_v48 = vsel %vm2408_vm5, %v2403_v54, %v4017_v36  ;;  %v4022_v62 = vunpack.i.h.bf16 %v5631_v61 }
 0x25a   : > { %v5699_v26 = vpop.permute.xlu1 %4084  ;;  %v4072_v35 = vunpack.i.h.bf16 %v4070_v27  ;;  %v4071_v19 = vunpack.i.l.bf16 %v4070_v27  ;;  %v2338_v60 = vsel %vm329_vm1, %v4421_v7, %v4001_v53 }
 0x25b   : > { %v2371_v0 = vsel %vm2342_vm3, %v2338_v60, %v4006_v6 }
 0x25c   : > { %v2433_v41 = vsel %vm2408_vm5, %v2400_v17, %v4071_v19  ;;  %v2434_v11 = vsel %vm2408_vm5, %v2401_v3, %v4072_v35  ;;  %v4422_v35 = vld [vmem:[#allocation2 + $0x158] sm:$0xff]  ;;  %v2468_v3 = vsel %vm2441_vm6, %v2435_v56, %v4021_v42  ;;  %v2469_v17 = vsel %vm2441_vm6, %v2436_v48, %v4022_v62  ;;  %v5796_v48 = vld [vmem:[%s6124_s5] ss:$0 sm:$0xff] }
 0x25d   : > { %v4075_v34 = vpop.permute.xlu0 %4074  ;;  %v2339_v19 = vsel %vm329_vm1, %v4422_v35, %v4002_v55 }
 0x25e   : > { %v4077_v28 = vunpack.i.h.bf16 %v4075_v34  ;;  %v4076_v58 = vunpack.i.l.bf16 %v4075_v34  ;;  %v5713_v40 = vpop.permute.xlu1 %4089  ;;  %v2372_v37 = vsel %vm2342_vm3, %v2339_v19, %v4007_v39 }
 0x260   : > { %v2466_v51 = vsel %vm2441_vm6, %v2433_v41, %v4076_v58  ;;  %v2467_v12 = vsel %vm2441_vm6, %v2434_v11, %v4077_v28  ;;  %v4082_v28 = vunpack.i.h.bf16 %v5690_v46  ;;  %v4081_v58 = vunpack.i.l.bf16 %v5690_v46 }
 0x261   : > { %v2499_v45 = vsel %vm2474_vm7, %v2466_v51, %v4026_v57  ;;  %v2500_v5 = vsel %vm2474_vm7, %v2467_v12, %v4027_v23  ;;  %v5727_v32 = vpop.permute.xlu0 %4094  ;;  %v4087_v23 = vunpack.i.h.bf16 %v5699_v26  ;;  %v4092_v57 = vunpack.i.h.bf16 %v5713_v40 }
 0x262   : > { %v4105_v9 = vpop.permute.xlu1 %4104  ;;  %v2532_v24 = vsel %vm2507_vm8, %v2499_v45, %v4031_v14  ;;  %v2533_v49 = vsel %vm2507_vm8, %v2500_v5, %v4032_v2  ;;  %v4097_v46 = vunpack.i.h.bf16 %v5727_v32  ;;  %v4096_v45 = vunpack.i.l.bf16 %v5727_v32 }
 0x263   : > { %v2565_v33 = vsel %vm2540_vm9, %v2532_v24, %v4036_v4  ;;  %v2566_v44 = vsel %vm2540_vm9, %v2533_v49, %v4037_v20  ;;  %v4107_v29 = vunpack.i.h.bf16 %v4105_v9  ;;  %v4106_v43 = vunpack.i.l.bf16 %v4105_v9 }
 0x264   : > { %v2585_v25 = vpack.c.bf16 %v2566_v44, %v2565_v33 }
 0x265   : > { %v5743_v1 = vpop.permute.xlu0 %4099  ;;  %v2340_v8 = vsel %vm329_vm1, %v5452_v59, %v4106_v43  ;;  %v2341_v10 = vsel %vm329_vm1, %v5454_v38, %v4107_v29  ;;  %v4086_v59 = vunpack.i.l.bf16 %v5699_v26  ;;  %v4091_v38 = vunpack.i.l.bf16 %v5713_v40 }
 0x266   : > { %v4110_v27 = vpop.permute.xlu1 %4109  ;;  %3491 = vmatprep.mubr.msk.bf16.mxu1 %vm2609_vm10, %v2585_v25  ;;  %v4102_v21 = vunpack.i.h.bf16 %v5743_v1  ;;  %v4101_v40 = vunpack.i.l.bf16 %v5743_v1 }
 0x267   : > { %v4112_v16 = vunpack.i.h.bf16 %v4110_v27  ;;  %v4111_v50 = vunpack.i.l.bf16 %v4110_v27 }
 0x269   : > { %v4135_v31 = vpop.permute.xlu0 %4134  ;;  %v2373_v61 = vsel %vm2342_vm3, %v2340_v8, %v4111_v50  ;;  %v2374_v34 = vsel %vm2342_vm3, %v2341_v10, %v4112_v16  ;;  %v5805_v10 = vld [vmem:[%s6125_s6] ss:$0 sm:$0xff] }
 0x26a   : > { %v4115_v18 = vpop.permute.xlu1 %4114  ;;  %v4137_v41 = vunpack.i.h.bf16 %v4135_v31  ;;  %v4136_v11 = vunpack.i.l.bf16 %v4135_v31  ;;  %v2406_v14 = vsel %vm2375_vm4, %v2373_v61, %v4081_v58  ;;  %v2407_v51 = vsel %vm2375_vm4, %v2374_v34, %v4082_v28 }
 0x26b   : > { %v4117_v12 = vunpack.i.h.bf16 %v4115_v18  ;;  %v4116_v20 = vunpack.i.l.bf16 %v4115_v18  ;;  %v2439_v24 = vsel %vm2408_vm5, %v2406_v14, %v4086_v59  ;;  %v2440_v49 = vsel %vm2408_vm5, %v2407_v51, %v4087_v23 }
 0x26c   : > { %v2405_v15 = vsel %vm2375_vm4, %v2372_v37, %v4137_v41  ;;  %v2404_v30 = vsel %vm2375_vm4, %v2371_v0, %v4136_v11  ;;  %v2472_v0 = vsel %vm2441_vm6, %v2439_v24, %v4091_v38  ;;  %v2473_v37 = vsel %vm2441_vm6, %v2440_v49, %v4092_v57 }
 0x26d   : > { %v4140_v2 = vpop.permute.xlu0 %4139  ;;  %v2502_v44 = vsel %vm2474_vm7, %v2469_v17, %v4117_v12  ;;  %v2501_v32 = vsel %vm2474_vm7, %v2468_v3, %v4116_v20  ;;  %v3532_v17 = vunpack.i.h.bf16 %v5078_v13  ;;  %v2505_v23 = vsel %vm2474_vm7, %v2472_v0, %v3531_v22 }
 0x26e   : > { %v4120_v4 = vpop.permute.xlu1 %4119  ;;  %v4142_v5 = vunpack.i.h.bf16 %v4140_v2  ;;  %v4141_v26 = vunpack.i.l.bf16 %v4140_v2 }
 0x26f   : > { %v4122_v47 = vunpack.i.h.bf16 %v4120_v4  ;;  %v4121_v9 = vunpack.i.l.bf16 %v4120_v4  ;;  %v2506_v41 = vsel %vm2474_vm7, %v2473_v37, %v3532_v17 }
 0x270   : > { %v2437_v55 = vsel %vm2408_vm5, %v2404_v30, %v4141_v26  ;;  %v2438_v53 = vsel %vm2408_vm5, %v2405_v15, %v4142_v5 }
 0x271   : > { %v4145_v33 = vpop.permute.xlu0 %4144  ;;  %v2534_v1 = vsel %vm2507_vm8, %v2501_v32, %v4121_v9  ;;  %v2535_v39 = vsel %vm2507_vm8, %v2502_v44, %v4122_v47 }
 0x272   : > { %v4147_v36 = vunpack.i.h.bf16 %v4145_v33  ;;  %v4146_v63 = vunpack.i.l.bf16 %v4145_v33  ;;  %v4125_v25 = vpop.permute.xlu1 %4124 }
 0x273   : > { %v4127_v52 = vunpack.i.h.bf16 %v4125_v25  ;;  %v4126_v54 = vunpack.i.l.bf16 %v4125_v25 }
 0x274   : > { %v2470_v6 = vsel %vm2441_vm6, %v2437_v55, %v4146_v63  ;;  %v2471_v29 = vsel %vm2441_vm6, %v2438_v53, %v4147_v36 }
 0x275   : > { %v2503_v43 = vsel %vm2474_vm7, %v2470_v6, %v4096_v45  ;;  %v2504_v27 = vsel %vm2474_vm7, %v2471_v29, %v4097_v46  ;;  %v2567_v16 = vsel %vm2540_vm9, %v2534_v1, %v4126_v54  ;;  %v2568_v50 = vsel %vm2540_vm9, %v2535_v39, %v4127_v52  ;;  %v4150_v56 = vpop.permute.xlu0 %4149 }
 0x276   : > { %v2586_v62 = vpack.c.bf16 %v2568_v50, %v2567_v16  ;;  %v4152_v42 = vunpack.i.h.bf16 %v4150_v56  ;;  %v4151_v7 = vunpack.i.l.bf16 %v4150_v56  ;;  %v2536_v60 = vsel %vm2507_vm8, %v2503_v43, %v4101_v40  ;;  %v4130_v35 = vpop.permute.xlu1 %4129 }
 0x277   : > { %v2537_v19 = vsel %vm2507_vm8, %v2504_v27, %v4102_v21  ;;  %v4131_v31 = vunpack.i.l.bf16 %v4130_v35  ;;  %v4132_v34 = vunpack.i.h.bf16 %v4130_v35 }
 0x278   : > { %v3469_v8 = vpop.f32.mrf.mxu1  ;;  %v2569_v18 = vsel %vm2540_vm9, %v2536_v60, %v4151_v7  ;;  %v2570_v61 = vsel %vm2540_vm9, %v2537_v19, %v4152_v42  ;;  %3492 = vmatmul.mubr.msk.bf16.gmra.mxu1 %vm2609_vm10, %v2586_v62 }
 0x279   : > { %v2831_v3 = vmul.f32 %v3469_v8, %v5796_v48  ;;  %v2587_v28 = vpack.c.bf16 %v2570_v61, %v2569_v18  ;;  %v2538_v11 = vsel %vm2507_vm8, %v2505_v23, %v4131_v31  ;;  %v2539_v12 = vsel %vm2507_vm8, %v2506_v41, %v4132_v34  ;;  %v3190_v41 = vld [vmem:[%s4501_s8 + $0x10] sm:$0xff] }
 0x27a   : > { %v2695_v58 = vpop.f32.mrf.mxu1  ;;  %v4155_v38 = vpop.permute.xlu1 %4154 }
 0x27b   : > { %v5816_v59 = vadd.f32 %v5805_v10, %v2831_v3  ;;  %v2829_v57 = vmul.f32 %v5796_v48, %v2695_v58  ;;  %v4157_v2 = vunpack.i.h.bf16 %v4155_v38  ;;  %v4156_v14 = vunpack.i.l.bf16 %v4155_v38  ;;  %3495 = vmatprep.mubr.msk.bf16.mxu1 %vm2609_vm10, %v2587_v28 }
 0x27c   : > { %v3470_v51 = vpop.f32.mrf.mxu1 }
 0x27d   : > { %v2902_v13 = vmin.f32 %v5816_v59, 20.0  ;;  %v5825_v22 = vadd.f32 %v5805_v10, %v2829_v57  ;;  %v2832_v20 = vmul.f32 %v3470_v51, %v5796_v48  ;;  %v2571_v4 = vsel %vm2540_vm9, %v2538_v11, %v4156_v14 }
 0x27e   : > { %v2572_v46 = vsel %vm2540_vm9, %v2539_v12, %v4157_v2  ;;  %v2698_v45 = vpop.f32.mrf.mxu1  ;;  %v3188_v12 = vld [vmem:[%s4501_s8] sm:$0xff] }
 0x27f   : > { %v2936_v5 = vmul.f32 1.442695, %v2902_v13  ;;  %v2900_v26 = vmin.f32 %v5825_v22, 20.0  ;;  %v2588_v21 = vpack.c.bf16 %v2572_v46, %v2571_v4  ;;  %v5832_v40 = vadd.f32 %v5805_v10, %v2832_v20 }
 0x280   : > { %v2830_v47 = vmul.f32 %v5796_v48, %v2698_v45 }
 0x281   : > { %4289 = vpow2.f32 %v2936_v5  ;;  %v2932_v9 = vmul.f32 1.442695, %v2900_v26  ;;  %v2903_v24 = vmin.f32 %v5832_v40, 20.0  ;;  %3496 = vmatmul.mubr.msk.bf16.gmra.mxu1 %vm2609_vm10, %v2588_v21 }
 0x282   : > { %v5838_v49 = vadd.f32 %v5805_v10, %v2830_v47  ;;  %v3189_v47 = vld [vmem:[%s4501_s8 + $0x8] sm:$0xff] }
 0x283   : > { %4291 = vpow2.f32 %v2932_v9  ;;  %v2938_v15 = vmul.f32 1.442695, %v2903_v24 }
 0x284   : > { %v2901_v30 = vmin.f32 %v5838_v49, 20.0 }
 0x285   : > { %4293 = vpow2.f32 %v2938_v15 }
 0x286   : > { %v2934_v33 = vmul.f32 1.442695, %v2901_v30 }
 0x288   : > { %4295 = vpow2.f32 %v2934_v33 }
 0x28e   : > { %v4290_v44 = vpop.eup %4289 }
 0x28f   : > { %v2998_v32 = vadd.f32 2.0, %v4290_v44 }
 0x290   : > { %v4292_v36 = vpop.eup %4291 }
 0x291   : > { %v3030_v63 = vmul.f32 %v4290_v44, %v2998_v32  ;;  %v2996_v25 = vadd.f32 2.0, %v4292_v36 }
 0x292   : > { %v4294_v55 = vpop.eup %4293 }
 0x293   : > { %v3062_v53 = vadd.f32 2.0, %v3030_v63  ;;  %v3028_v52 = vmul.f32 %v4292_v36, %v2996_v25  ;;  %v2999_v54 = vadd.f32 2.0, %v4294_v55 }
 0x295   : > { %v4296_v1 = vpop.eup %4295  ;;  %4297 = vrcp.f32 %v3062_v53  ;;  %v3060_v39 = vadd.f32 2.0, %v3028_v52  ;;  %v3031_v6 = vmul.f32 %v4294_v55, %v2999_v54 }
 0x296   : > { %v2997_v29 = vadd.f32 2.0, %v4296_v1 }
 0x297   : > { %4299 = vrcp.f32 %v3060_v39  ;;  %v3063_v43 = vadd.f32 2.0, %v3031_v6 }
 0x298   : > { %v3029_v27 = vmul.f32 %v4296_v1, %v2997_v29  ;;  %v3473_v16 = vpop.f32.mrf.mxu1 }
 0x299   : > { %4301 = vrcp.f32 %v3063_v43  ;;  %v2835_v50 = vmul.f32 %v3473_v16, %v5796_v48 }
 0x29a   : > { %v3061_v56 = vadd.f32 2.0, %v3029_v27  ;;  %v2711_v62 = vpop.f32.mrf.mxu1 }
 0x29b   : > { %v5843_v42 = vadd.f32 %v5805_v10, %v2835_v50  ;;  %v2833_v7 = vmul.f32 %v5796_v48, %v2711_v62 }
 0x29c   : > { %4303 = vrcp.f32 %v3061_v56  ;;  %v3474_v60 = vpop.f32.mrf.mxu1 }
 0x29d   : > { %v2906_v35 = vmin.f32 %v5843_v42, 20.0  ;;  %v5848_v19 = vadd.f32 %v5805_v10, %v2833_v7  ;;  %v2836_v31 = vmul.f32 %v3474_v60, %v5796_v48 }
 0x29e   : > { %v2714_v0 = vpop.f32.mrf.mxu1 }
 0x29f   : > { %v2944_v37 = vmul.f32 1.442695, %v2906_v35  ;;  %v2904_v8 = vmin.f32 %v5848_v19, 20.0  ;;  %v5853_v18 = vadd.f32 %v5805_v10, %v2836_v31  ;;  %v2834_v61 = vmul.f32 %v5796_v48, %v2714_v0 }
 0x2a1   : > { %4305 = vpow2.f32 %v2944_v37  ;;  %v2940_v34 = vmul.f32 1.442695, %v2904_v8  ;;  %v2907_v3 = vmin.f32 %v5853_v18, 20.0  ;;  %v5858_v17 = vadd.f32 %v5805_v10, %v2834_v61 }
 0x2a2   : > { %v4298_v28 = vpop.eup %4297 }
 0x2a3   : > { %v3097_v58 = vmul.f32 %v4298_v28, %v3030_v63  ;;  %4307 = vpow2.f32 %v2940_v34  ;;  %v2946_v23 = vmul.f32 1.442695, %v2907_v3  ;;  %v2905_v57 = vmin.f32 %v5858_v17, 20.0 }
 0x2a4   : > { %v4300_v38 = vpop.eup %4299 }
 0x2a5   : > { %v3158_v11 = vmul.f32 %v3097_v58, %v5816_v59  ;;  %v3093_v2 = vmul.f32 %v4300_v38, %v3028_v52  ;;  %4309 = vpow2.f32 %v2946_v23  ;;  %v2942_v14 = vmul.f32 1.442695, %v2905_v57  ;;  %v3191_v59 = vld [vmem:[%s4501_s8 + $0x18] sm:$0xff]  ;;  %v3194_v57 = vld [vmem:[%s4501_s8 + $0x30] sm:$0xff] }
 0x2a6   : > { %v4302_v51 = vpop.eup %4301 }
 0x2a7   : > { %v3222_v13 = vadd.f32 %v3190_v41, %v3158_v11  ;;  %v3156_v20 = vmul.f32 %v3093_v2, %v5825_v22  ;;  %v3099_v4 = vmul.f32 %v4302_v51, %v3031_v6  ;;  %4311 = vpow2.f32 %v2942_v14  ;;  %v3192_v14 = vld [vmem:[%s4501_s8 + $0x20] sm:$0xff] }
 0x2a9   : > { %v4304_v46 = vpop.eup %4303  ;;  %3254 = vst.msk [vmem:[%s5868_s14 + $0x10] sm:$0xff] %vm329_vm1, %v3222_v13  ;;  %v3220_v45 = vadd.f32 %v3188_v12, %v3156_v20  ;;  %v3159_v5 = vmul.f32 %v3099_v4, %v5832_v40  ;;  %v3195_v4 = vld [vmem:[%s4501_s8 + $0x38] sm:$0xff] }
 0x2aa   : > { %v3095_v26 = vmul.f32 %v4304_v46, %v3029_v27 }
 0x2ab   : > { %3252 = vst.msk [vmem:[%s5868_s14] sm:$0xff] %vm329_vm1, %v3220_v45  ;;  %v3223_v21 = vadd.f32 %v3191_v59, %v3159_v5  ;;  %v3193_v45 = vld [vmem:[%s4501_s8 + $0x28] sm:$0xff] }
 0x2ac   : > { %v3157_v9 = vmul.f32 %v3095_v26, %v5838_v49 }
 0x2ad   : > { %3255 = vst.msk [vmem:[%s5868_s14 + $0x18] sm:$0xff] %vm329_vm1, %v3223_v21 }
 0x2ae   : > { %v4306_v22 = vpop.eup %4305  ;;  %v3221_v24 = vadd.f32 %v3189_v47, %v3157_v9 }
 0x2af   : > { %v3002_v15 = vadd.f32 2.0, %v4306_v22 }
 0x2b0   : > { %v4308_v30 = vpop.eup %4307  ;;  %3253 = vst.msk [vmem:[%s5868_s14 + $0x8] sm:$0xff] %vm329_vm1, %v3221_v24 }
 0x2b1   : > { %v3034_v33 = vmul.f32 %v4306_v22, %v3002_v15  ;;  %v3000_v44 = vadd.f32 2.0, %v4308_v30 }
 0x2b2   : > { %v4310_v32 = vpop.eup %4309 }
 0x2b3   : > { %v3066_v36 = vadd.f32 2.0, %v3034_v33  ;;  %v3032_v40 = vmul.f32 %v4308_v30, %v3000_v44  ;;  %v3003_v63 = vadd.f32 2.0, %v4310_v32 }
 0x2b4   : > { %v4312_v25 = vpop.eup %4311 }
 0x2b5   : > { %4313 = vrcp.f32 %v3066_v36  ;;  %v3064_v55 = vadd.f32 2.0, %v3032_v40  ;;  %v3035_v53 = vmul.f32 %v4310_v32, %v3003_v63  ;;  %v3001_v52 = vadd.f32 2.0, %v4312_v25 }
 0x2b7   : > { %4315 = vrcp.f32 %v3064_v55  ;;  %v3067_v49 = vadd.f32 2.0, %v3035_v53  ;;  %v3033_v54 = vmul.f32 %v4312_v25, %v3001_v52 }
 0x2b8   : > { %v3477_v1 = vpop.f32.mrf.mxu1 }
 0x2b9   : > { %4317 = vrcp.f32 %v3067_v49  ;;  %v3065_v39 = vadd.f32 2.0, %v3033_v54  ;;  %v2839_v6 = vmul.f32 %v3477_v1, %v5796_v48 }
 0x2ba   : > { %v2727_v29 = vpop.f32.mrf.mxu1 }
 0x2bb   : > { %4319 = vrcp.f32 %v3065_v39  ;;  %v5886_v43 = vadd.f32 %v5805_v10, %v2839_v6  ;;  %v2837_v27 = vmul.f32 %v5796_v48, %v2727_v29 }
 0x2bc   : > { %v3478_v16 = vpop.f32.mrf.mxu1 }
 0x2bd   : > { %v2910_v50 = vmin.f32 %v5886_v43, 20.0  ;;  %v5891_v56 = vadd.f32 %v5805_v10, %v2837_v27  ;;  %v2840_v62 = vmul.f32 %v3478_v16, %v5796_v48 }
 0x2be   : > { %v2730_v7 = vpop.f32.mrf.mxu1 }
 0x2bf   : > { %v2952_v60 = vmul.f32 1.442695, %v2910_v50  ;;  %v2908_v35 = vmin.f32 %v5891_v56, 20.0  ;;  %v5896_v31 = vadd.f32 %v5805_v10, %v2840_v62  ;;  %v2838_v0 = vmul.f32 %v5796_v48, %v2730_v7 }
 0x2c1   : > { %4321 = vpow2.f32 %v2952_v60  ;;  %v2948_v37 = vmul.f32 1.442695, %v2908_v35  ;;  %v2911_v8 = vmin.f32 %v5896_v31, 20.0  ;;  %v5901_v61 = vadd.f32 %v5805_v10, %v2838_v0 }
 0x2c2   : > { %v4314_v34 = vpop.eup %4313 }
 0x2c3   : > { %v3105_v3 = vmul.f32 %v4314_v34, %v3034_v33  ;;  %4323 = vpow2.f32 %v2948_v37  ;;  %v2954_v28 = vmul.f32 1.442695, %v2911_v8  ;;  %v2909_v58 = vmin.f32 %v5901_v61, 20.0 }
 0x2c4   : > { %v4316_v23 = vpop.eup %4315 }
 0x2c5   : > { %v3162_v38 = vmul.f32 %v3105_v3, %v5843_v42  ;;  %v3101_v41 = vmul.f32 %v4316_v23, %v3032_v40  ;;  %4325 = vpow2.f32 %v2954_v28  ;;  %v2950_v11 = vmul.f32 1.442695, %v2909_v58  ;;  %v3198_v58 = vld [vmem:[%s4501_s8 + $0x50] sm:$0xff] }
 0x2c6   : > { %v4318_v2 = vpop.eup %4317 }
 0x2c7   : > { %v3226_v51 = vadd.f32 %v3194_v57, %v3162_v38  ;;  %v3160_v12 = vmul.f32 %v3101_v41, %v5848_v19  ;;  %v3107_v13 = vmul.f32 %v4318_v2, %v3035_v53  ;;  %4327 = vpow2.f32 %v2950_v11  ;;  %v3196_v11 = vld [vmem:[%s4501_s8 + $0x40] sm:$0xff] }
 0x2c8   : > { %v4320_v20 = vpop.eup %4319 }
 0x2c9   : > { %3258 = vst.msk [vmem:[%s5868_s14 + $0x30] sm:$0xff] %vm329_vm1, %v3226_v51  ;;  %v3224_v59 = vadd.f32 %v3192_v14, %v3160_v12  ;;  %v3163_v42 = vmul.f32 %v3107_v13, %v5853_v18  ;;  %v3103_v46 = vmul.f32 %v4320_v20, %v3033_v54  ;;  %v3199_v13 = vld [vmem:[%s4501_s8 + $0x58] sm:$0xff] }
 0x2cb   : > { %3256 = vst.msk [vmem:[%s5868_s14 + $0x20] sm:$0xff] %vm329_vm1, %v3224_v59  ;;  %v3227_v5 = vadd.f32 %v3195_v4, %v3163_v42  ;;  %v3161_v26 = vmul.f32 %v3103_v46, %v5858_v17  ;;  %v3197_v59 = vld [vmem:[%s4501_s8 + $0x48] sm:$0xff] }
 0x2cd   : > { %3259 = vst.msk [vmem:[%s5868_s14 + $0x38] sm:$0xff] %vm329_vm1, %v3227_v5  ;;  %v3225_v19 = vadd.f32 %v3193_v45, %v3161_v26 }
 0x2ce   : > { %v4322_v21 = vpop.eup %4321 }
 0x2cf   : > { %3257 = vst.msk [vmem:[%s5868_s14 + $0x28] sm:$0xff] %vm329_vm1, %v3225_v19  ;;  %v3006_v47 = vadd.f32 2.0, %v4322_v21 }
 0x2d0   : > { %v4324_v9 = vpop.eup %4323 }
 0x2d1   : > { %v3038_v22 = vmul.f32 %v4322_v21, %v3006_v47  ;;  %v3004_v24 = vadd.f32 2.0, %v4324_v9 }
 0x2d2   : > { %v4326_v15 = vpop.eup %4325 }
 0x2d3   : > { %v3070_v30 = vadd.f32 2.0, %v3038_v22  ;;  %v3036_v18 = vmul.f32 %v4324_v9, %v3004_v24  ;;  %v3007_v33 = vadd.f32 2.0, %v4326_v15 }
 0x2d4   : > { %v4328_v44 = vpop.eup %4327 }
 0x2d5   : > { %4329 = vrcp.f32 %v3070_v30  ;;  %v3068_v32 = vadd.f32 2.0, %v3036_v18  ;;  %v3039_v36 = vmul.f32 %v4326_v15, %v3007_v33  ;;  %v3005_v40 = vadd.f32 2.0, %v4328_v44 }
 0x2d7   : > { %4331 = vrcp.f32 %v3068_v32  ;;  %v3071_v17 = vadd.f32 2.0, %v3039_v36  ;;  %v3037_v63 = vmul.f32 %v4328_v44, %v3005_v40 }
 0x2d8   : > { %v3481_v25 = vpop.f32.mrf.mxu1 }
 0x2d9   : > { %4333 = vrcp.f32 %v3071_v17  ;;  %v3069_v55 = vadd.f32 2.0, %v3037_v63  ;;  %v2843_v53 = vmul.f32 %v3481_v25, %v5796_v48 }
 0x2da   : > { %v2743_v52 = vpop.f32.mrf.mxu1 }
 0x2db   : > { %4335 = vrcp.f32 %v3069_v55  ;;  %v5922_v49 = vadd.f32 %v5805_v10, %v2843_v53  ;;  %v2841_v54 = vmul.f32 %v5796_v48, %v2743_v52 }
 0x2dc   : > { %v3482_v1 = vpop.f32.mrf.mxu1 }
 0x2dd   : > { %v2914_v39 = vmin.f32 %v5922_v49, 20.0  ;;  %v5927_v6 = vadd.f32 %v5805_v10, %v2841_v54  ;;  %v2844_v29 = vmul.f32 %v3482_v1, %v5796_v48 }
 0x2de   : > { %v2746_v27 = vpop.f32.mrf.mxu1 }
 0x2df   : > { %v2960_v16 = vmul.f32 1.442695, %v2914_v39  ;;  %v2912_v50 = vmin.f32 %v5927_v6, 20.0  ;;  %v5932_v62 = vadd.f32 %v5805_v10, %v2844_v29  ;;  %v2842_v7 = vmul.f32 %v5796_v48, %v2746_v27 }
 0x2e1   : > { %4337 = vpow2.f32 %v2960_v16  ;;  %v2956_v60 = vmul.f32 1.442695, %v2912_v50  ;;  %v2915_v35 = vmin.f32 %v5932_v62, 20.0  ;;  %v5937_v0 = vadd.f32 %v5805_v10, %v2842_v7 }
 0x2e2   : > { %v4330_v37 = vpop.eup %4329 }
 0x2e3   : > { %v3113_v8 = vmul.f32 %v4330_v37, %v3038_v22  ;;  %4339 = vpow2.f32 %v2956_v60  ;;  %v2962_v34 = vmul.f32 1.442695, %v2915_v35  ;;  %v2913_v3 = vmin.f32 %v5937_v0, 20.0 }
 0x2e4   : > { %v4332_v28 = vpop.eup %4331 }
 0x2e5   : > { %v3166_v23 = vmul.f32 %v3113_v8, %v5886_v43  ;;  %v3109_v57 = vmul.f32 %v4332_v28, %v3036_v18  ;;  %4341 = vpow2.f32 %v2962_v34  ;;  %v2958_v38 = vmul.f32 1.442695, %v2913_v3  ;;  %v3202_v8 = vld [vmem:[%s4501_s8 + $0x70] sm:$0xff] }
 0x2e6   : > { %v4334_v41 = vpop.eup %4333 }
 0x2e7   : > { %v3230_v2 = vadd.f32 %v3198_v58, %v3166_v23  ;;  %v3164_v14 = vmul.f32 %v3109_v57, %v5891_v56  ;;  %v3115_v51 = vmul.f32 %v4334_v41, %v3039_v36  ;;  %4343 = vpow2.f32 %v2958_v38  ;;  %v3200_v57 = vld [vmem:[%s4501_s8 + $0x60] sm:$0xff] }
 0x2e8   : > { %v4336_v12 = vpop.eup %4335 }
 0x2e9   : > { %3262 = vst.msk [vmem:[%s5868_s14 + $0x50] sm:$0xff] %vm329_vm1, %v3230_v2  ;;  %v3228_v20 = vadd.f32 %v3196_v11, %v3164_v14  ;;  %v3167_v43 = vmul.f32 %v3115_v51, %v5896_v31  ;;  %v3111_v4 = vmul.f32 %v4336_v12, %v3037_v63  ;;  %v3203_v51 = vld [vmem:[%s4501_s8 + $0x78] sm:$0xff] }
 0x2eb   : > { %3260 = vst.msk [vmem:[%s5868_s14 + $0x40] sm:$0xff] %vm329_vm1, %v3228_v20  ;;  %v3231_v42 = vadd.f32 %v3199_v13, %v3167_v43  ;;  %v3165_v46 = vmul.f32 %v3111_v4, %v5901_v61  ;;  %v3201_v20 = vld [vmem:[%s4501_s8 + $0x68] sm:$0xff] }
 0x2ed   : > { %3263 = vst.msk [vmem:[%s5868_s14 + $0x58] sm:$0xff] %vm329_vm1, %v3231_v42  ;;  %v3229_v56 = vadd.f32 %v3197_v59, %v3165_v46 }
 0x2ee   : > { %v4338_v45 = vpop.eup %4337 }
 0x2ef   : > { %3261 = vst.msk [vmem:[%s5868_s14 + $0x48] sm:$0xff] %vm329_vm1, %v3229_v56  ;;  %v3010_v5 = vadd.f32 2.0, %v4338_v45 }
 0x2f0   : > { %v4340_v26 = vpop.eup %4339 }
 0x2f1   : > { %v3042_v19 = vmul.f32 %v4338_v45, %v3010_v5  ;;  %v3008_v21 = vadd.f32 2.0, %v4340_v26 }
 0x2f2   : > { %v4342_v47 = vpop.eup %4341 }
 0x2f3   : > { %v3074_v9 = vadd.f32 2.0, %v3042_v19  ;;  %v3040_v31 = vmul.f32 %v4340_v26, %v3008_v21  ;;  %v3011_v22 = vadd.f32 2.0, %v4342_v47 }
 0x2f4   : > { %v4344_v24 = vpop.eup %4343 }
 0x2f5   : > { %4345 = vrcp.f32 %v3074_v9  ;;  %v3072_v15 = vadd.f32 2.0, %v3040_v31  ;;  %v3043_v30 = vmul.f32 %v4342_v47, %v3011_v22  ;;  %v3009_v18 = vadd.f32 2.0, %v4344_v24 }
 0x2f7   : > { %4347 = vrcp.f32 %v3072_v15  ;;  %v3075_v61 = vadd.f32 2.0, %v3043_v30  ;;  %v3041_v33 = vmul.f32 %v4344_v24, %v3009_v18 }
 0x2f8   : > { %v3485_v32 = vpop.f32.mrf.mxu1 }
 0x2f9   : > { %4349 = vrcp.f32 %v3075_v61  ;;  %v3073_v44 = vadd.f32 2.0, %v3041_v33  ;;  %v2847_v36 = vmul.f32 %v3485_v32, %v5796_v48 }
 0x2fa   : > { %v2759_v40 = vpop.f32.mrf.mxu1 }
 0x2fb   : > { %4351 = vrcp.f32 %v3073_v44  ;;  %v5958_v17 = vadd.f32 %v5805_v10, %v2847_v36  ;;  %v2845_v63 = vmul.f32 %v5796_v48, %v2759_v40 }
 0x2fc   : > { %v3486_v25 = vpop.f32.mrf.mxu1 }
 0x2fd   : > { %v2918_v55 = vmin.f32 %v5958_v17, 20.0  ;;  %v5963_v53 = vadd.f32 %v5805_v10, %v2845_v63  ;;  %v2848_v52 = vmul.f32 %v3486_v25, %v5796_v48 }
 0x2fe   : > { %v2762_v54 = vpop.f32.mrf.mxu1 }
 0x2ff   : > { %v2968_v1 = vmul.f32 1.442695, %v2918_v55  ;;  %v2916_v39 = vmin.f32 %v5963_v53, 20.0  ;;  %v5968_v29 = vadd.f32 %v5805_v10, %v2848_v52  ;;  %v2846_v27 = vmul.f32 %v5796_v48, %v2762_v54 }
 0x301   : > { %4353 = vpow2.f32 %v2968_v1  ;;  %v2964_v50 = vmul.f32 1.442695, %v2916_v39  ;;  %v2919_v7 = vmin.f32 %v5968_v29, 20.0  ;;  %v5973_v60 = vadd.f32 %v5805_v10, %v2846_v27 }
 0x302   : > { %v4346_v16 = vpop.eup %4345 }
 0x303   : > { %v3121_v35 = vmul.f32 %v4346_v16, %v3042_v19  ;;  %4355 = vpow2.f32 %v2964_v50  ;;  %v2970_v34 = vmul.f32 1.442695, %v2919_v7  ;;  %v2917_v3 = vmin.f32 %v5973_v60, 20.0 }
 0x304   : > { %v4348_v37 = vpop.eup %4347 }
 0x305   : > { %v3170_v28 = vmul.f32 %v3121_v35, %v5922_v49  ;;  %v3117_v58 = vmul.f32 %v4348_v37, %v3040_v31  ;;  %4357 = vpow2.f32 %v2970_v34  ;;  %v2966_v38 = vmul.f32 1.442695, %v2917_v3 }
 0x306   : > { %v4350_v23 = vpop.eup %4349 }
 0x307   : > { %v3234_v41 = vadd.f32 %v3202_v8, %v3170_v28  ;;  %v3168_v11 = vmul.f32 %v3117_v58, %v5927_v6  ;;  %v3123_v2 = vmul.f32 %v4350_v23, %v3043_v30  ;;  %4359 = vpow2.f32 %v2966_v38  ;;  %v3206_v8 = vld [vmem:[%s4501_s8 + $0x90] sm:$0xff]  ;;  %v3204_v23 = vld [vmem:[%s4501_s8 + $0x80] sm:$0xff] }
 0x308   : > { %v4352_v14 = vpop.eup %4351 }
 0x309   : > { %3266 = vst.msk [vmem:[%s5868_s14 + $0x70] sm:$0xff] %vm329_vm1, %v3234_v41  ;;  %v3232_v12 = vadd.f32 %v3200_v57, %v3168_v11  ;;  %v3171_v49 = vmul.f32 %v3123_v2, %v5932_v62  ;;  %v3119_v13 = vmul.f32 %v4352_v14, %v3041_v33  ;;  %v3207_v2 = vld [vmem:[%s4501_s8 + $0x98] sm:$0xff] }
 0x30b   : > { %3264 = vst.msk [vmem:[%s5868_s14 + $0x60] sm:$0xff] %vm329_vm1, %v3232_v12  ;;  %v3235_v43 = vadd.f32 %v3203_v51, %v3171_v49  ;;  %v3169_v4 = vmul.f32 %v3119_v13, %v5937_v0  ;;  %v3205_v12 = vld [vmem:[%s4501_s8 + $0x88] sm:$0xff] }
 0x30d   : > { %3267 = vst.msk [vmem:[%s5868_s14 + $0x78] sm:$0xff] %vm329_vm1, %v3235_v43  ;;  %v3233_v6 = vadd.f32 %v3201_v20, %v3169_v4 }
 0x30e   : > { %v4354_v59 = vpop.eup %4353 }
 0x30f   : > { %3265 = vst.msk [vmem:[%s5868_s14 + $0x68] sm:$0xff] %vm329_vm1, %v3233_v6  ;;  %v3014_v42 = vadd.f32 2.0, %v4354_v59 }
 0x310   : > { %v4356_v46 = vpop.eup %4355 }
 0x311   : > { %v3046_v56 = vmul.f32 %v4354_v59, %v3014_v42  ;;  %v3012_v45 = vadd.f32 2.0, %v4356_v46 }
 0x312   : > { %v4358_v5 = vpop.eup %4357 }
 0x313   : > { %v3078_v26 = vadd.f32 2.0, %v3046_v56  ;;  %v3044_v62 = vmul.f32 %v4356_v46, %v3012_v45  ;;  %v3015_v19 = vadd.f32 2.0, %v4358_v5 }
 0x314   : > { %v4360_v21 = vpop.eup %4359 }
 0x315   : > { %4361 = vrcp.f32 %v3078_v26  ;;  %v3076_v47 = vadd.f32 2.0, %v3044_v62  ;;  %v3047_v9 = vmul.f32 %v4358_v5, %v3015_v19  ;;  %v3013_v31 = vadd.f32 2.0, %v4360_v21 }
 0x317   : > { %4363 = vrcp.f32 %v3076_v47  ;;  %v3079_v0 = vadd.f32 2.0, %v3047_v9  ;;  %v3045_v22 = vmul.f32 %v4360_v21, %v3013_v31 }
 0x318   : > { %v3489_v24 = vpop.f32.mrf.mxu1 }
 0x319   : > { %4365 = vrcp.f32 %v3079_v0  ;;  %v3077_v15 = vadd.f32 2.0, %v3045_v22  ;;  %v2851_v30 = vmul.f32 %v3489_v24, %v5796_v48 }
 0x31a   : > { %v2775_v18 = vpop.f32.mrf.mxu1 }
 0x31b   : > { %4367 = vrcp.f32 %v3077_v15  ;;  %v5994_v61 = vadd.f32 %v5805_v10, %v2851_v30  ;;  %v2849_v33 = vmul.f32 %v5796_v48, %v2775_v18 }
 0x31c   : > { %v3490_v44 = vpop.f32.mrf.mxu1 }
 0x31d   : > { %v2922_v32 = vmin.f32 %v5994_v61, 20.0  ;;  %v5999_v36 = vadd.f32 %v5805_v10, %v2849_v33  ;;  %v2852_v40 = vmul.f32 %v3490_v44, %v5796_v48 }
 0x31e   : > { %v2778_v63 = vpop.f32.mrf.mxu1 }
 0x31f   : > { %v2976_v25 = vmul.f32 1.442695, %v2922_v32  ;;  %v2920_v55 = vmin.f32 %v5999_v36, 20.0  ;;  %v6004_v52 = vadd.f32 %v5805_v10, %v2852_v40  ;;  %v2850_v54 = vmul.f32 %v5796_v48, %v2778_v63 }
 0x321   : > { %4369 = vpow2.f32 %v2976_v25  ;;  %v2972_v1 = vmul.f32 1.442695, %v2920_v55  ;;  %v2923_v39 = vmin.f32 %v6004_v52, 20.0  ;;  %v6009_v27 = vadd.f32 %v5805_v10, %v2850_v54 }
 0x322   : > { %v4362_v16 = vpop.eup %4361 }
 0x323   : > { %v3129_v50 = vmul.f32 %v4362_v16, %v3046_v56  ;;  %4371 = vpow2.f32 %v2972_v1  ;;  %v2978_v7 = vmul.f32 1.442695, %v2923_v39  ;;  %v2921_v35 = vmin.f32 %v6009_v27, 20.0 }
 0x324   : > { %v4364_v37 = vpop.eup %4363 }
 0x325   : > { %v3174_v34 = vmul.f32 %v3129_v50, %v5958_v17  ;;  %v3125_v3 = vmul.f32 %v4364_v37, %v3044_v62  ;;  %4373 = vpow2.f32 %v2978_v7  ;;  %v2974_v28 = vmul.f32 1.442695, %v2921_v35 }
 0x326   : > { %v4366_v58 = vpop.eup %4365 }
 0x327   : > { %v3238_v57 = vadd.f32 %v3206_v8, %v3174_v34  ;;  %v3172_v38 = vmul.f32 %v3125_v3, %v5963_v53  ;;  %v3131_v41 = vmul.f32 %v4366_v58, %v3047_v9  ;;  %4375 = vpow2.f32 %v2974_v28  ;;  %v3210_v34 = vld [vmem:[%s4501_s8 + $0xb0] sm:$0xff] }
 0x328   : > { %v4368_v11 = vpop.eup %4367 }
 0x329   : > { %3270 = vst.msk [vmem:[%s5868_s14 + $0x90] sm:$0xff] %vm329_vm1, %v3238_v57  ;;  %v3236_v14 = vadd.f32 %v3204_v23, %v3172_v38  ;;  %v3175_v17 = vmul.f32 %v3131_v41, %v5968_v29  ;;  %v3127_v51 = vmul.f32 %v4368_v11, %v3045_v22  ;;  %v3208_v11 = vld [vmem:[%s4501_s8 + $0xa0] sm:$0xff] }
 0x32b   : > { %3268 = vst.msk [vmem:[%s5868_s14 + $0x80] sm:$0xff] %vm329_vm1, %v3236_v14  ;;  %v3239_v49 = vadd.f32 %v3207_v2, %v3175_v17  ;;  %v3173_v13 = vmul.f32 %v3127_v51, %v5973_v60 }
 0x32d   : > { %3271 = vst.msk [vmem:[%s5868_s14 + $0x98] sm:$0xff] %vm329_vm1, %v3239_v49  ;;  %v3237_v53 = vadd.f32 %v3205_v12, %v3173_v13 }
 0x32e   : > { %v4370_v20 = vpop.eup %4369 }
 0x32f   : > { %3269 = vst.msk [vmem:[%s5868_s14 + $0x88] sm:$0xff] %vm329_vm1, %v3237_v53  ;;  %v3018_v43 = vadd.f32 2.0, %v4370_v20  ;;  %v3211_v53 = vld [vmem:[%s4501_s8 + $0xb8] sm:$0xff] }
 0x330   : > { %v4372_v4 = vpop.eup %4371 }
 0x331   : > { %v3050_v6 = vmul.f32 %v4370_v20, %v3018_v43  ;;  %v3016_v59 = vadd.f32 2.0, %v4372_v4 }
 0x332   : > { %v4374_v42 = vpop.eup %4373 }
 0x333   : > { %v3082_v46 = vadd.f32 2.0, %v3050_v6  ;;  %v3048_v29 = vmul.f32 %v4372_v4, %v3016_v59  ;;  %v3019_v56 = vadd.f32 2.0, %v4374_v42 }
 0x334   : > { %v4376_v45 = vpop.eup %4375 }
 0x335   : > { %4377 = vrcp.f32 %v3082_v46  ;;  %v3080_v5 = vadd.f32 2.0, %v3048_v29  ;;  %v3051_v26 = vmul.f32 %v4374_v42, %v3019_v56  ;;  %v3017_v62 = vadd.f32 2.0, %v4376_v45  ;;  %v3209_v46 = vld [vmem:[%s4501_s8 + $0xa8] sm:$0xff] }
 0x337   : > { %4379 = vrcp.f32 %v3080_v5  ;;  %v3083_v60 = vadd.f32 2.0, %v3051_v26  ;;  %v3049_v19 = vmul.f32 %v4376_v45, %v3017_v62 }
 0x338   : > { %v3493_v21 = vpop.f32.mrf.mxu1 }
 0x339   : > { %4381 = vrcp.f32 %v3083_v60  ;;  %v3081_v47 = vadd.f32 2.0, %v3049_v19  ;;  %v2855_v9 = vmul.f32 %v3493_v21, %v5796_v48 }
 0x33a   : > { %v2791_v31 = vpop.f32.mrf.mxu1 }
 0x33b   : > { %4383 = vrcp.f32 %v3081_v47  ;;  %v6030_v0 = vadd.f32 %v5805_v10, %v2855_v9  ;;  %v2853_v22 = vmul.f32 %v5796_v48, %v2791_v31 }
 0x33c   : > { %v3494_v24 = vpop.f32.mrf.mxu1 }
 0x33d   : > { %v2926_v15 = vmin.f32 %v6030_v0, 20.0  ;;  %v6035_v30 = vadd.f32 %v5805_v10, %v2853_v22  ;;  %v2856_v18 = vmul.f32 %v3494_v24, %v5796_v48 }
 0x33e   : > { %v2794_v33 = vpop.f32.mrf.mxu1 }
 0x33f   : > { %v2984_v44 = vmul.f32 1.442695, %v2926_v15  ;;  %v2924_v32 = vmin.f32 %v6035_v30, 20.0  ;;  %v6040_v40 = vadd.f32 %v5805_v10, %v2856_v18  ;;  %v2854_v63 = vmul.f32 %v5796_v48, %v2794_v33 }
 0x341   : > { %v3497_v25 = vpop.f32.mrf.mxu1  ;;  %4385 = vpow2.f32 %v2984_v44  ;;  %v2980_v55 = vmul.f32 1.442695, %v2924_v32  ;;  %v2927_v54 = vmin.f32 %v6040_v40, 20.0  ;;  %v6045_v1 = vadd.f32 %v5805_v10, %v2854_v63 }
 0x342   : > { %v4378_v39 = vpop.eup %4377  ;;  %v2859_v16 = vmul.f32 %v3497_v25, %v5796_v48 }
 0x343   : > { %v2807_v50 = vpop.f32.mrf.mxu1  ;;  %v3137_v7 = vmul.f32 %v4378_v39, %v3050_v6  ;;  %4387 = vpow2.f32 %v2980_v55  ;;  %v2986_v35 = vmul.f32 1.442695, %v2927_v54  ;;  %v2925_v37 = vmin.f32 %v6045_v1, 20.0 }
 0x344   : > { %v4380_v8 = vpop.eup %4379  ;;  %v6051_v3 = vadd.f32 %v5805_v10, %v2859_v16  ;;  %v2857_v28 = vmul.f32 %v5796_v48, %v2807_v50 }
 0x345   : > { %v3498_v58 = vpop.f32.mrf.mxu1  ;;  %v3178_v23 = vmul.f32 %v3137_v7, %v5994_v61  ;;  %v3133_v57 = vmul.f32 %v4380_v8, %v3048_v29  ;;  %4389 = vpow2.f32 %v2986_v35  ;;  %v2982_v38 = vmul.f32 1.442695, %v2925_v37 }
 0x346   : > { %v4382_v41 = vpop.eup %4381  ;;  %v2930_v2 = vmin.f32 %v6051_v3, 20.0  ;;  %v6058_v14 = vadd.f32 %v5805_v10, %v2857_v28  ;;  %v2860_v17 = vmul.f32 %v3498_v58, %v5796_v48 }
 0x347   : > { %v2810_v51 = vpop.f32.mrf.mxu1  ;;  %v3242_v12 = vadd.f32 %v3210_v34, %v3178_v23  ;;  %v3176_v49 = vmul.f32 %v3133_v57, %v5999_v36  ;;  %v3139_v13 = vmul.f32 %v4382_v41, %v3051_v26  ;;  %4391 = vpow2.f32 %v2982_v38 }
 0x348   : > { %v4384_v61 = vpop.eup %4383  ;;  %v2992_v20 = vmul.f32 1.442695, %v2930_v2  ;;  %v2928_v43 = vmin.f32 %v6058_v14, 20.0  ;;  %v6065_v4 = vadd.f32 %v5805_v10, %v2860_v17  ;;  %v2858_v6 = vmul.f32 %v5796_v48, %v2810_v51  ;;  %v3214_v51 = vld [vmem:[%s4501_s8 + $0xd0] sm:$0xff] }
 0x349   : > { %3274 = vst.msk [vmem:[%s5868_s14 + $0xb0] sm:$0xff] %vm329_vm1, %v3242_v12  ;;  %v3240_v59 = vadd.f32 %v3208_v11, %v3176_v49  ;;  %v3179_v42 = vmul.f32 %v3139_v13, %v6004_v52  ;;  %v3135_v36 = vmul.f32 %v4384_v61, %v3049_v19  ;;  %v3212_v61 = vld [vmem:[%s4501_s8 + $0xc0] sm:$0xff] }
 0x34a   : > { %4393 = vpow2.f32 %v2992_v20  ;;  %v2988_v29 = vmul.f32 1.442695, %v2928_v43  ;;  %v2931_v56 = vmin.f32 %v6065_v4, 20.0  ;;  %v6074_v45 = vadd.f32 %v5805_v10, %v2858_v6 }
 0x34b   : > { %3272 = vst.msk [vmem:[%s5868_s14 + $0xa0] sm:$0xff] %vm329_vm1, %v3240_v59  ;;  %v3243_v5 = vadd.f32 %v3211_v53, %v3179_v42  ;;  %v3177_v48 = vmul.f32 %v3135_v36, %v6009_v27  ;;  %v3215_v59 = vld [vmem:[%s4501_s8 + $0xd8] sm:$0xff] }
 0x34c   : > { %4395 = vpow2.f32 %v2988_v29  ;;  %v2994_v26 = vmul.f32 1.442695, %v2931_v56  ;;  %v2929_v62 = vmin.f32 %v6074_v45, 20.0 }
 0x34d   : > { %3275 = vst.msk [vmem:[%s5868_s14 + $0xb8] sm:$0xff] %vm329_vm1, %v3243_v5  ;;  %v3241_v52 = vadd.f32 %v3209_v46, %v3177_v48 }
 0x34e   : > { %v4386_v60 = vpop.eup %4385  ;;  %4397 = vpow2.f32 %v2994_v26  ;;  %v2990_v19 = vmul.f32 1.442695, %v2929_v62  ;;  %v3218_v62 = vld [vmem:[%s4501_s8 + $0xf0] sm:$0xff] }
 0x34f   : > { %3273 = vst.msk [vmem:[%s5868_s14 + $0xa8] sm:$0xff] %vm329_vm1, %v3241_v52  ;;  %v3022_v21 = vadd.f32 2.0, %v4386_v60 }
 0x350   : > { %v4388_v10 = vpop.eup %4387  ;;  %4399 = vpow2.f32 %v2990_v19  ;;  %v3216_v19 = vld [vmem:[%s4501_s8 + $0xe0] sm:$0xff] }
 0x351   : > { %v3054_v47 = vmul.f32 %v4386_v60, %v3022_v21  ;;  %v3020_v9 = vadd.f32 2.0, %v4388_v10 }
 0x352   : > { %v4390_v31 = vpop.eup %4389 }
 0x353   : > { %v3086_v22 = vadd.f32 2.0, %v3054_v47  ;;  %v3052_v27 = vmul.f32 %v4388_v10, %v3020_v9  ;;  %v3023_v24 = vadd.f32 2.0, %v4390_v31  ;;  %v3219_v9 = vld [vmem:[%s4501_s8 + $0xf8] sm:$0xff] }
 0x354   : > { %v4392_v15 = vpop.eup %4391 }
 0x355   : > { %4401 = vrcp.f32 %v3086_v22  ;;  %v3084_v18 = vadd.f32 2.0, %v3052_v27  ;;  %v3055_v33 = vmul.f32 %v4390_v31, %v3023_v24  ;;  %v3021_v44 = vadd.f32 2.0, %v4392_v15 }
 0x357   : > { %v4394_v32 = vpop.eup %4393  ;;  %4403 = vrcp.f32 %v3084_v18  ;;  %v3087_v63 = vadd.f32 2.0, %v3055_v33  ;;  %v3053_v25 = vmul.f32 %v4392_v15, %v3021_v44 }
 0x358   : > { %v3026_v55 = vadd.f32 2.0, %v4394_v32 }
 0x359   : > { %v4396_v54 = vpop.eup %4395  ;;  %4405 = vrcp.f32 %v3087_v63  ;;  %v3085_v39 = vadd.f32 2.0, %v3053_v25 }
 0x35a   : > { %v3058_v16 = vmul.f32 %v4394_v32, %v3026_v55  ;;  %v3024_v50 = vadd.f32 2.0, %v4396_v54 }
 0x35b   : > { %v4398_v7 = vpop.eup %4397  ;;  %4407 = vrcp.f32 %v3085_v39 }
 0x35c   : > { %v3090_v35 = vadd.f32 2.0, %v3058_v16  ;;  %v3056_v37 = vmul.f32 %v4396_v54, %v3024_v50  ;;  %v3027_v8 = vadd.f32 2.0, %v4398_v7 }
 0x35d   : > { %v4400_v34 = vpop.eup %4399 }
 0x35e   : > { %4409 = vrcp.f32 %v3090_v35  ;;  %v3088_v28 = vadd.f32 2.0, %v3056_v37  ;;  %v3059_v58 = vmul.f32 %v4398_v7, %v3027_v8  ;;  %v3025_v23 = vadd.f32 2.0, %v4400_v34 }
 0x360   : > { %4411 = vrcp.f32 %v3088_v28  ;;  %v3091_v57 = vadd.f32 2.0, %v3059_v58  ;;  %v3057_v38 = vmul.f32 %v4400_v34, %v3025_v23 }
 0x362   : > { %v4402_v41 = vpop.eup %4401  ;;  %4413 = vrcp.f32 %v3091_v57  ;;  %v3089_v11 = vadd.f32 2.0, %v3057_v38 }
 0x363   : > { %v3145_v2 = vmul.f32 %v4402_v41, %v3054_v47 }
 0x364   : > { %v4404_v17 = vpop.eup %4403  ;;  %4415 = vrcp.f32 %v3089_v11 }
 0x365   : > { %v3182_v12 = vmul.f32 %v3145_v2, %v6030_v0  ;;  %v3141_v49 = vmul.f32 %v4404_v17, %v3052_v27  ;;  %v3213_v0 = vld [vmem:[%s4501_s8 + $0xc8] sm:$0xff] }
 0x366   : > { %v4406_v13 = vpop.eup %4405 }
 0x367   : > { %v3246_v53 = vadd.f32 %v3214_v51, %v3182_v12  ;;  %v3180_v20 = vmul.f32 %v3141_v49, %v6035_v30  ;;  %v3147_v43 = vmul.f32 %v4406_v13, %v3055_v33 }
 0x368   : > { %v4408_v6 = vpop.eup %4407 }
 0x369   : > { %3278 = vst.msk [vmem:[%s5868_s14 + $0xd0] sm:$0xff] %vm329_vm1, %v3246_v53  ;;  %v3244_v42 = vadd.f32 %v3212_v61, %v3180_v20  ;;  %v3183_v36 = vmul.f32 %v3147_v43, %v6040_v40  ;;  %v3143_v46 = vmul.f32 %v4408_v6, %v3053_v25 }
 0x36b   : > { %v4410_v29 = vpop.eup %4409  ;;  %3276 = vst.msk [vmem:[%s5868_s14 + $0xc0] sm:$0xff] %vm329_vm1, %v3244_v42  ;;  %v3247_v56 = vadd.f32 %v3215_v59, %v3183_v36  ;;  %v3181_v30 = vmul.f32 %v3143_v46, %v6045_v1 }
 0x36c   : > { %v3153_v5 = vmul.f32 %v4410_v29, %v3058_v16 }
 0x36d   : > { %v4412_v48 = vpop.eup %4411  ;;  %3279 = vst.msk [vmem:[%s5868_s14 + $0xd8] sm:$0xff] %vm329_vm1, %v3247_v56  ;;  %v3245_v26 = vadd.f32 %v3213_v0, %v3181_v30 }
 0x36e   : > { %v3186_v40 = vmul.f32 %v3153_v5, %v6051_v3  ;;  %v3149_v52 = vmul.f32 %v4412_v48, %v3056_v37  ;;  %v3217_v3 = vld [vmem:[%s4501_s8 + $0xe8] sm:$0xff] }
 0x36f   : > { %v4414_v60 = vpop.eup %4413  ;;  %3277 = vst.msk [vmem:[%s5868_s14 + $0xc8] sm:$0xff] %vm329_vm1, %v3245_v26 }
 0x370   : > { %v3250_v21 = vadd.f32 %v3218_v62, %v3186_v40  ;;  %v3184_v1 = vmul.f32 %v3149_v52, %v6058_v14  ;;  %v3155_v10 = vmul.f32 %v4414_v60, %v3059_v58 }
 0x371   : > { %v4416_v47 = vpop.eup %4415 }
 0x372   : > { %3282 = vst.msk [vmem:[%s5868_s14 + $0xf0] sm:$0xff] %vm329_vm1, %v3250_v21  ;;  %v3248_v31 = vadd.f32 %v3216_v19, %v3184_v1  ;;  %v3187_v22 = vmul.f32 %v3155_v10, %v6065_v4  ;;  %v3151_v27 = vmul.f32 %v4416_v47, %v3057_v38 }
 0x374   : > { %3280 = vst.msk [vmem:[%s5868_s14 + $0xe0] sm:$0xff] %vm329_vm1, %v3248_v31  ;;  %v3251_v24 = vadd.f32 %v3219_v9, %v3187_v22  ;;  %v3185_v15 = vmul.f32 %v3151_v27, %v6074_v45 }
 0x376   : > { %3283 = vst.msk [vmem:[%s5868_s14 + $0xf8] sm:$0xff] %vm329_vm1, %v3251_v24  ;;  %v3249_v18 = vadd.f32 %v3217_v3, %v3185_v15 }
 0x378   : > { %3281 = vst.msk [vmem:[%s5868_s14 + $0xe8] sm:$0xff] %vm329_vm1, %v3249_v18 }
 0x379 PF: > { %s17_s24 = sadd.s32 1, %s4429_s24  }
 0x37a   : > { %p14_p4 = scmp.ge.s32.totalorder %s17_s24, 4  }
 0x37c   :  { %16 = sbr.rel (!%p14_p4) target bundleno = 1 (0x1), region = 80 }

</bundles_post_ra>
